<compile_context>
chip_gen: v7x
topology: tpu7x:2x2x1
jax: 0.10.0
libtpu: 0.0.40
codegen_flags: <defaults>
</compile_context>

<pallas_src>
import math

import jax
import jax.numpy as jnp
from jax.experimental import pallas as pl
from jax.experimental.pallas import tpu as pltpu


# ---------------------------------------------------------------------------
# Kernel: one grid step == one batch tile of `block_b` rows.
# ---------------------------------------------------------------------------
def _mlp_kernel(x_ref, w1_ref, b1_ref, w2_ref, b2_ref, w3_ref, b3_ref, o_ref):
    x = x_ref[...]                                               # (Bt, Din) bf16

    # layer1 + relu : (Bt, Din) @ (Din, H) -> (Bt, H), f32 accumulate
    h = jnp.dot(x, w1_ref[...], preferred_element_type=jnp.float32) + b1_ref[...]
    h = jnp.maximum(h, 0.0)

    # layer2 + relu : (Bt, H) @ (H, H) -> (Bt, H)
    h = jnp.dot(h.astype(w2_ref.dtype), w2_ref[...],
                preferred_element_type=jnp.float32) + b2_ref[...]
    h = jnp.maximum(h, 0.0)

    # layer3 (no activation) : (Bt, H) @ (H, Dout) -> (Bt, Dout)
    o_ref[...] = (jnp.dot(h.astype(w3_ref.dtype), w3_ref[...],
                          preferred_element_type=jnp.float32)
                  + b3_ref[...]).astype(o_ref.dtype)


def mlp_pallas(x, w1, b1, w2, b2, w3, b3, *, block_b=128,
               compute_dtype=jnp.bfloat16):
    """x: (B, Din) f32.  Weights stored as (in, out); biases as (out,)."""
    B, Din = x.shape
    H = w1.shape[1]
    Dout = w3.shape[1]

    # Batch tiling: full-array block if B is small, else 128-row tiles
    # (128 is a multiple of the 8-row sublane granule).
    if B <= block_b:
        bt, Bp = B, B
    else:
        bt = block_b
        Bp = pl.cdiv(B, bt) * bt
    if Bp != B:
        x = jnp.pad(x, ((0, Bp - B), (0, 0)))

    # bf16 inputs/weights (halves DMA bytes, native MXU input); f32 biases.
    xc = x.astype(compute_dtype)
    w1c = w1.astype(compute_dtype)
    w2c = w2.astype(compute_dtype)
    w3c = w3.astype(compute_dtype)
    b1r = b1.reshape(1, H).astype(jnp.float32)
    b2r = b2.reshape(1, H).astype(jnp.float32)
    b3r = b3.reshape(1, Dout).astype(jnp.float32)

    out = pl.pallas_call(
        _mlp_kernel,
        out_shape=jax.ShapeDtypeStruct((Bp, Dout), jnp.float32),
        grid_spec=pltpu.PrefetchScalarGridSpec(
            num_scalar_prefetch=0,
            grid=(Bp // bt,),
            in_specs=[
                pl.BlockSpec((bt, Din), lambda i: (i, 0)),   # x, tiled over batch
                pl.BlockSpec((Din, H), lambda i: (0, 0)),    # W1 (VMEM-resident)
                pl.BlockSpec((1, H), lambda i: (0, 0)),      # b1
                pl.BlockSpec((H, H), lambda i: (0, 0)),      # W2 (VMEM-resident)
                pl.BlockSpec((1, H), lambda i: (0, 0)),      # b2
                pl.BlockSpec((H, Dout), lambda i: (0, 0)),   # W3
                pl.BlockSpec((1, Dout), lambda i: (0, 0)),   # b3
            ],
            out_specs=pl.BlockSpec((bt, Dout), lambda i: (i, 0)),
        ),
        compiler_params=pltpu.CompilerParams(
            dimension_semantics=("parallel",)),
    )(xc, w1c, b1r, w2c, b2r, w3c, b3r)

    return out[:B]


# ---------------------------------------------------------------------------
# Parameter setup (PyTorch nn.Linear default init, weights stored as (in, out))
# ---------------------------------------------------------------------------
def make_params(key, din, dh, dout):
    ks = jax.random.split(key, 6)

    def linear(kw, kb, fan_in, fan_out):
        lim = 1.0 / math.sqrt(fan_in)
        w = jax.random.uniform(kw, (fan_in, fan_out), jnp.float32, -lim, lim)
        b = jax.random.uniform(kb, (fan_out,), jnp.float32, -lim, lim)
        return w, b

    w1, b1 = linear(ks[0], ks[1], din, dh)
    w2, b2 = linear(ks[2], ks[3], dh, dh)
    w3, b3 = linear(ks[4], ks[5], dh, dout)
    return w1, b1, w2, b2, w3, b3


# ---------------------------------------------------------------------------
# Pure-JAX f32 reference (mirrors the PyTorch forward)
# ---------------------------------------------------------------------------
def mlp_ref(x, w1, b1, w2, b2, w3, b3):
    h = jnp.maximum(x @ w1 + b1, 0.0)
    h = jnp.maximum(h @ w2 + b2, 0.0)
    return h @ w3 + b3


if __name__ == "__main__":
    INPUT_DIM, HIDDEN_DIM, OUTPUT_DIM = 216, 1024, 2   # as in the module
    B = 256                                            # 2 x 128-row tiles -> 2 grid steps

    key = jax.random.PRNGKey(0)
    kx, kp = jax.random.split(key)
    x = jax.random.normal(kx, (B, INPUT_DIM), dtype=jnp.float32)
    w1, b1, w2, b2, w3, b3 = make_params(kp, INPUT_DIM, HIDDEN_DIM, OUTPUT_DIM)

    y = mlp_pallas(x, w1, b1, w2, b2, w3, b3)
    y = jax.block_until_ready(y)

    y_ref = mlp_ref(x, w1, b1, w2, b2, w3, b3)
    assert y.shape == (B, OUTPUT_DIM)
    # bf16 inputs/weights with f32 accumulation: loose tolerance vs f32 reference.
    assert jnp.allclose(y, y_ref, atol=5e-2, rtol=5e-2), "mismatch vs reference"

    print("KERNEL_OK")
</pallas_src>

<mosaic_0001>
module attributes {stable_mosaic.version = 11 : i64} {
  func.func @_mlp_kernel(%arg0: i32, %arg1: memref<128x216xbf16, #tpu.memory_space<vmem>>, %arg2: memref<216x1024xbf16, #tpu.memory_space<vmem>>, %arg3: memref<1x1024xf32, #tpu.memory_space<vmem>>, %arg4: memref<1024x1024xbf16, #tpu.memory_space<vmem>>, %arg5: memref<1x1024xf32, #tpu.memory_space<vmem>>, %arg6: memref<1024x2xbf16, #tpu.memory_space<vmem>>, %arg7: memref<1x2xf32, #tpu.memory_space<vmem>>, %arg8: memref<128x2xf32, #tpu.memory_space<vmem>>) attributes {dimension_semantics = [#tpu.dimension_semantics<parallel>], iteration_bounds = array<i64: 2>, scalar_prefetch = 0 : i64, scratch_operands = 0 : i64, tpu.core_type = #tpu.core_type<tc>, window_params = [{transform_indices = @transform_0, window_bounds = array<i64: 128, 216>}, {pipeline_mode = #tpu.pipeline_mode<synchronous>, transform_indices = @transform_1, window_bounds = array<i64: 216, 1024>}, {pipeline_mode = #tpu.pipeline_mode<synchronous>, transform_indices = @transform_2, window_bounds = array<i64: 1, 1024>}, {pipeline_mode = #tpu.pipeline_mode<synchronous>, transform_indices = @transform_3, window_bounds = array<i64: 1024, 1024>}, {pipeline_mode = #tpu.pipeline_mode<synchronous>, transform_indices = @transform_4, window_bounds = array<i64: 1, 1024>}, {pipeline_mode = #tpu.pipeline_mode<synchronous>, transform_indices = @transform_5, window_bounds = array<i64: 1024, 2>}, {pipeline_mode = #tpu.pipeline_mode<synchronous>, transform_indices = @transform_6, window_bounds = array<i64: 1, 2>}, {transform_indices = @transform_7, window_bounds = array<i64: 128, 2>}]} {
    %c0 = arith.constant 0 : index
    %c0_0 = arith.constant 0 : index
    %0 = vector.load %arg1[%c0, %c0_0] : memref<128x216xbf16, #tpu.memory_space<vmem>>, vector<128x216xbf16>
    %c0_1 = arith.constant 0 : index
    %c0_2 = arith.constant 0 : index
    %1 = vector.load %arg2[%c0_1, %c0_2] : memref<216x1024xbf16, #tpu.memory_space<vmem>>, vector<216x1024xbf16>
    %cst = arith.constant dense<0.000000e+00> : vector<128x1024xf32>
    %2 = tpu.matmul %0, %1, %cst {dimension_numbers = #tpu.dot_dimension_numbers<[1], [0], [0], [1], [0, 0, 1, 1], [], []>} : vector<128x216xbf16>, vector<216x1024xbf16>, vector<128x1024xf32> -> vector<128x1024xf32>
    %c0_3 = arith.constant 0 : index
    %c0_4 = arith.constant 0 : index
    %3 = vector.load %arg3[%c0_3, %c0_4] : memref<1x1024xf32, #tpu.memory_space<vmem>>, vector<1x1024xf32>
    %4 = vector.broadcast %3 : vector<1x1024xf32> to vector<128x1024xf32>
    %5 = arith.addf %2, %4 : vector<128x1024xf32>
    %cst_5 = arith.constant 0.000000e+00 : f32
    %6 = vector.broadcast %cst_5 : f32 to vector<128x1024xf32>
    %7 = arith.maximumf %5, %6 : vector<128x1024xf32>
    %8 = arith.truncf %7 : vector<128x1024xf32> to vector<128x1024xbf16>
    %c0_6 = arith.constant 0 : index
    %c0_7 = arith.constant 0 : index
    %9 = vector.load %arg4[%c0_6, %c0_7] : memref<1024x1024xbf16, #tpu.memory_space<vmem>>, vector<1024x1024xbf16>
    %cst_8 = arith.constant dense<0.000000e+00> : vector<128x1024xf32>
    %10 = tpu.matmul %8, %9, %cst_8 {dimension_numbers = #tpu.dot_dimension_numbers<[1], [0], [0], [1], [0, 0, 1, 1], [], []>} : vector<128x1024xbf16>, vector<1024x1024xbf16>, vector<128x1024xf32> -> vector<128x1024xf32>
    %c0_9 = arith.constant 0 : index
    %c0_10 = arith.constant 0 : index
    %11 = vector.load %arg5[%c0_9, %c0_10] : memref<1x1024xf32, #tpu.memory_space<vmem>>, vector<1x1024xf32>
    %12 = vector.broadcast %11 : vector<1x1024xf32> to vector<128x1024xf32>
    %13 = arith.addf %10, %12 : vector<128x1024xf32>
    %cst_11 = arith.constant 0.000000e+00 : f32
    %14 = vector.broadcast %cst_11 : f32 to vector<128x1024xf32>
    %15 = arith.maximumf %13, %14 : vector<128x1024xf32>
    %16 = arith.truncf %15 : vector<128x1024xf32> to vector<128x1024xbf16>
    %c0_12 = arith.constant 0 : index
    %c0_13 = arith.constant 0 : index
    %17 = vector.load %arg6[%c0_12, %c0_13] : memref<1024x2xbf16, #tpu.memory_space<vmem>>, vector<1024x2xbf16>
    %cst_14 = arith.constant dense<0.000000e+00> : vector<128x2xf32>
    %18 = tpu.matmul %16, %17, %cst_14 {dimension_numbers = #tpu.dot_dimension_numbers<[1], [0], [0], [1], [0, 0, 1, 1], [], []>} : vector<128x1024xbf16>, vector<1024x2xbf16>, vector<128x2xf32> -> vector<128x2xf32>
    %c0_15 = arith.constant 0 : index
    %c0_16 = arith.constant 0 : index
    %19 = vector.load %arg7[%c0_15, %c0_16] : memref<1x2xf32, #tpu.memory_space<vmem>>, vector<1x2xf32>
    %20 = vector.broadcast %19 : vector<1x2xf32> to vector<128x2xf32>
    %21 = arith.addf %18, %20 : vector<128x2xf32>
    %c0_17 = arith.constant 0 : index
    %c0_18 = arith.constant 0 : index
    %22 = vector.load %arg8[%c0_17, %c0_18] : memref<128x2xf32, #tpu.memory_space<vmem>>, vector<128x2xf32>
    tpu.vector_store %arg8[%c0_17, %c0_18], %21 {strides = array<i32>} : memref<128x2xf32, #tpu.memory_space<vmem>>, vector<128x2xf32>,
    return
  }
  func.func @transform_0(%arg0: i32) -> (i32, i32) {
    %c0_i32 = arith.constant 0 : i32
    %c0_i32_0 = arith.constant 0 : i32
    return %arg0, %c0_i32 : i32, i32
  }
  func.func @transform_1(%arg0: i32) -> (i32, i32) {
    %c0_i32 = arith.constant 0 : i32
    %c0_i32_0 = arith.constant 0 : i32
    %c0_i32_1 = arith.constant 0 : i32
    return %c0_i32, %c0_i32_0 : i32, i32
  }
  func.func @transform_2(%arg0: i32) -> (i32, i32) {
    %c0_i32 = arith.constant 0 : i32
    %c0_i32_0 = arith.constant 0 : i32
    %c0_i32_1 = arith.constant 0 : i32
    return %c0_i32, %c0_i32_0 : i32, i32
  }
  func.func @transform_3(%arg0: i32) -> (i32, i32) {
    %c0_i32 = arith.constant 0 : i32
    %c0_i32_0 = arith.constant 0 : i32
    %c0_i32_1 = arith.constant 0 : i32
    return %c0_i32, %c0_i32_0 : i32, i32
  }
  func.func @transform_4(%arg0: i32) -> (i32, i32) {
    %c0_i32 = arith.constant 0 : i32
    %c0_i32_0 = arith.constant 0 : i32
    %c0_i32_1 = arith.constant 0 : i32
    return %c0_i32, %c0_i32_0 : i32, i32
  }
  func.func @transform_5(%arg0: i32) -> (i32, i32) {
    %c0_i32 = arith.constant 0 : i32
    %c0_i32_0 = arith.constant 0 : i32
    %c0_i32_1 = arith.constant 0 : i32
    return %c0_i32, %c0_i32_0 : i32, i32
  }
  func.func @transform_6(%arg0: i32) -> (i32, i32) {
    %c0_i32 = arith.constant 0 : i32
    %c0_i32_0 = arith.constant 0 : i32
    %c0_i32_1 = arith.constant 0 : i32
    return %c0_i32, %c0_i32_0 : i32, i32
  }
  func.func @transform_7(%arg0: i32) -> (i32, i32) {
    %c0_i32 = arith.constant 0 : i32
    %c0_i32_0 = arith.constant 0 : i32
    return %arg0, %c0_i32 : i32, i32
  }
}

</mosaic_0001>

<bundles_post_ra>
// kernel: tpu_custom_call.1
= control target key start
LH: loop header
LB: loop body
LE: loop exit
PB: predicated region body
PF: predicated region fallthrough
CT: control target
= control target key end

     0   :  { %12 = vsyncpa [#allocation3], 0  ;;  %s11977_s0 = inlined_call_operand.vmem [shape: bf16[256,216], index: 0, kind: input, shape index: {}]   ;;  %s11978_s1 = inlined_call_operand.hbm [shape: bf16[216,1024], index: 1, kind: input, shape index: {}]   ;;  %s11979_s2 = inlined_call_operand.hbm [shape: f32[1,1024], index: 2, kind: input, shape index: {}]   ;;  %s11980_s3 = inlined_call_operand.hbm [shape: bf16[1024,1024], index: 3, kind: input, shape index: {}]   ;;  %s11981_s4 = inlined_call_operand.hbm [shape: f32[1,1024], index: 4, kind: input, shape index: {}]   ;;  %s11982_s5 = inlined_call_operand.vmem [shape: bf16[1024,2], index: 5, kind: input, shape index: {}]   ;;  %s11983_s6 = inlined_call_operand.hbm [shape: f32[1,2], index: 6, kind: input, shape index: {}]   ;;  %s11984_s7 = inlined_call_operand.vmem [shape: f32[256,2], index: 7, kind: output, shape index: {}]  }
   0x1   :  { %13 = vsyncpa [#allocation5], 0 }
   0x2   :  { %14 = vsyncpa [#allocation8], 0  ;;  %s9867_s24 = smov 0  }
   0x3 LB: > { %s9820_s25 = smov [#allocation4]   ;;  %s7969_s27 = sadd.s32 4294967295, %s9818_s24   ;;  %s9818_s24 = sphi %s9867_s24, %s20_s24  }
   0x4   : > { %s229_s26 = sshll.u32 %s9820_s25, 4  ;;  %p7971_p0 = scmp.ge.s32.totalorder %s9818_s24, 1  ;;  %s9881_s26 = int_to_ptr.vmem [resolvable:$true] %s229_s26 }
   0x5   : > { %p203_p1 = scmp.lt.s32.totalorder %s9818_s24, 3  ;;  %p9877_p2 = scmp.eq.s32.totalorder %s7969_s27, 0 }
   0x6   : > { %s9821_s30 = smov [#allocation7]   ;;  %s9822_s9 = smov [#allocation2]  }
   0x7   : > { %s12054_s28 = scalar_select %p9877_p2, 1, 0 }
   0x8   : > { %p9883_p3 = pnand %p7971_p0, %p203_p1  ;;  %s253_s8 = sshll.u32 %s9821_s30, 4  ;;  %s9889_s8 = int_to_ptr.vmem [resolvable:$true] %s253_s8 }
   0x9   : > { %s215_s10 = sshll.u32 %s9822_s9, 4  ;;  %s9823_s12 = smov [#allocation6]   ;;  %s9897_s10 = int_to_ptr.vmem [resolvable:$true] %s215_s10 }
   0xa   : > { %s12055_s29 = scalar_select %p9883_p3, 1, 0 }
   0xb   : > { %p9521_p4 = pneg %p9883_p3  ;;  %s9899_s13 = sshll.u32 %s9823_s12, 4  ;;  %s240_s13 = int_to_ptr.vmem [resolvable:$true] %s9899_s13 }
   0xc   : > { %s9660_s16 = scalar_lea.hbm %s11979_s2, 128 }
   0xd   : > { %p9893_p5 = pnand %p9877_p2, %p9521_p4  ;;  %p9661_p6 = scmp.ne.s32.totalorder %s11979_s2, %s9660_s16 }
   0xe   : > { %p9667_p10 = scmp.lt.u32.totalorder %s9660_s16, %s11979_s2 }
   0xf   : > { %p9909_p7 = pneg %p9893_p5 }
  0x11   : > { %p9663_p8 = pnand %p9909_p7, %p9661_p6 }
  0x13   : > { %p9664_p9 = pneg %p9663_p8 }
  0x15   : > { %p9669_p11 = pnand %p9667_p10, %p9664_p9 }
  0x17   : > { %9672 = shalt.err (!%p9669_p11)
}
  0x18   : > { %s9673_s22 = scalar_lea.vmem %s9881_s26, 128  ;;  %p9681_p1 = scmp.lt.s32.totalorder %s9881_s26, %s9881_s26 }
  0x19   : > { %p9674_p12 = scmp.ne.s32.totalorder %s9881_s26, %s9673_s22  ;;  %p9682_p4 = scmp.lt.s32.totalorder %s9673_s22, %s9673_s22 }
  0x1b   : > { %p9676_p13 = pnand %p9674_p12, %p9909_p7  ;;  %p9683_p6 = por %p9682_p4, %p9681_p1 }
  0x1d   : > { %p9677_p0 = pneg %p9676_p13 }
  0x1f   : > { %p9684_p8 = pnand %p9683_p6, %p9677_p0 }
  0x21   : > { %9687 = shalt.err (!%p9684_p8)
}
  0x22   : > { %9527 = dma.hbm_to_vmem [thread:$0]  (!%p9893_p5), %s11979_s2, 128, %s9881_s26, [#allocation5]  }
  0x23   : > { %s9688_s12 = scalar_lea.hbm %s11981_s4, 128 }
  0x24   : > { %p9689_p9 = scmp.ne.s32.totalorder %s11981_s4, %s9688_s12  ;;  %p9695_p12 = scmp.lt.u32.totalorder %s9688_s12, %s11981_s4 }
  0x26   : > { %p9691_p10 = pnand %p9689_p9, %p9909_p7 }
  0x28   : > { %p9692_p11 = pneg %p9691_p10 }
  0x2a   : > { %p9697_p13 = pnand %p9695_p12, %p9692_p11 }
  0x2c   : > { %9700 = shalt.err (!%p9697_p13)
}
  0x2d   : > { %s9701_s26 = scalar_lea.vmem %s9889_s8, 128  ;;  %p9709_p6 = scmp.lt.s32.totalorder %s9889_s8, %s9889_s8 }
  0x2e   : > { %p9702_p0 = scmp.ne.s32.totalorder %s9889_s8, %s9701_s26  ;;  %p9710_p8 = scmp.lt.s32.totalorder %s9701_s26, %s9701_s26 }
  0x30   : > { %p9704_p1 = pnand %p9702_p0, %p9909_p7  ;;  %p9711_p9 = por %p9710_p8, %p9709_p6 }
  0x32   : > { %p9705_p4 = pneg %p9704_p1 }
  0x34   : > { %p9712_p10 = pnand %p9711_p9, %p9705_p4 }
  0x36   : > { %9715 = shalt.err (!%p9712_p10)
}
  0x37   : > { %9533 = dma.hbm_to_vmem [thread:$0]  (!%p9893_p5), %s11981_s4, 128, %s9889_s8, [#allocation8]  }
  0x38   : > { %s9716_s23 = scalar_lea.hbm %s11978_s1, 13824 }
  0x39   : > { %p9717_p11 = scmp.ne.s32.totalorder %s11978_s1, %s9716_s23  ;;  %p9723_p0 = scmp.lt.u32.totalorder %s9716_s23, %s11978_s1 }
  0x3b   : > { %p9719_p12 = pnand %p9717_p11, %p9909_p7 }
  0x3d   : > { %p9720_p13 = pneg %p9719_p12 }
  0x3f   : > { %p9725_p1 = pnand %p9723_p0, %p9720_p13 }
  0x41   : > { %9728 = shalt.err (!%p9725_p1)
}
  0x42   : > { %s9729_s8 = scalar_lea.vmem %s9897_s10, 13824  ;;  %p9737_p9 = scmp.lt.s32.totalorder %s9897_s10, %s9897_s10 }
  0x43   : > { %p9730_p4 = scmp.ne.s32.totalorder %s9897_s10, %s9729_s8  ;;  %p9738_p10 = scmp.lt.s32.totalorder %s9729_s8, %s9729_s8 }
  0x45   : > { %p9732_p6 = pnand %p9730_p4, %p9909_p7  ;;  %p9739_p11 = por %p9738_p10, %p9737_p9 }
  0x47   : > { %p9733_p8 = pneg %p9732_p6 }
  0x49   : > { %p9740_p12 = pnand %p9739_p11, %p9733_p8 }
  0x4b   : > { %9743 = shalt.err (!%p9740_p12)
}
  0x4c   : > { %s9824_s14 = smov 512   ;;  %s9825_s15 = smov 32  }
  0x4d   : > { %9524 = dma.hbm_to_vmem [thread:$0]  (!%p9893_p5), %s11978_s1, 13824, %s9897_s10, [#allocation3], %s9824_s14, %s9824_s14, %s9825_s15  }
  0x4e   : > { %s9744_s20 = scalar_lea.hbm %s11980_s3, 65536 }
  0x4f   : > { %p9745_p13 = scmp.ne.s32.totalorder %s11980_s3, %s9744_s20  ;;  %p9751_p4 = scmp.lt.u32.totalorder %s9744_s20, %s11980_s3 }
  0x51   : > { %p9747_p0 = pnand %p9745_p13, %p9909_p7 }
  0x53   : > { %p9748_p1 = pneg %p9747_p0 }
  0x55   : > { %p9753_p6 = pnand %p9751_p4, %p9748_p1 }
  0x57   : > { %9756 = shalt.err (!%p9753_p6)
}
  0x58   : > { %s9757_s30 = scalar_lea.vmem %s240_s13, 65536  ;;  %p9765_p11 = scmp.lt.s32.totalorder %s240_s13, %s240_s13 }
  0x59   : > { %p9758_p8 = scmp.ne.s32.totalorder %s240_s13, %s9757_s30  ;;  %p9766_p12 = scmp.lt.s32.totalorder %s9757_s30, %s9757_s30 }
  0x5b   : > { %p9760_p9 = pnand %p9758_p8, %p9909_p7  ;;  %p9767_p2 = por %p9766_p12, %p9765_p11 }
  0x5d   : > { %p9761_p10 = pneg %p9760_p9 }
  0x5f   : > { %p9768_p3 = pnand %p9767_p2, %p9761_p10 }
  0x61   : > { %9771 = shalt.err (!%p9768_p3)
}
  0x62   : > { %9530 = dma.hbm_to_vmem [thread:$0]  (!%p9893_p5), %s11980_s3, 65536, %s240_s13, [#allocation5], %s9824_s14, %s9824_s14, %s9825_s15  }
  0x63   : > { %s9826_s12 = smov [#allocation9]   ;;  %s9772_s26 = scalar_lea.hbm %s11983_s6, 16 }
  0x64   : > { %s267_s8 = sshll.u32 %s9826_s12, 4  ;;  %p9773_p13 = scmp.ne.s32.totalorder %s11983_s6, %s9772_s26  ;;  %s268_s8 = int_to_ptr.vmem [resolvable:$true] %s267_s8 }
  0x65   : > { %p9779_p0 = scmp.lt.u32.totalorder %s9772_s26, %s11983_s6 }
  0x66   : > { %p9775_p2 = pnand %p9773_p13, %p9909_p7 }
  0x68   : > { %p9776_p3 = pneg %p9775_p2 }
  0x6a   : > { %p9781_p1 = pnand %p9779_p0, %p9776_p3 }
  0x6c   : > { %9784 = shalt.err (!%p9781_p1)
}
  0x6d   : > { %s9785_s13 = scalar_lea.vmem %s268_s8, 16  ;;  %s9792_s14 = scalar_lea.vmem %s268_s8, 32 }
  0x6e   : > { %p9786_p4 = scmp.ne.s32.totalorder %s268_s8, %s9785_s13  ;;  %p9793_p9 = scmp.lt.s32.totalorder %s268_s8, %s268_s8 }
  0x6f   : > { %p9794_p10 = scmp.lt.s32.totalorder %s9792_s14, %s9785_s13 }
  0x70   : > { %p9788_p6 = pnand %p9786_p4, %p9909_p7 }
  0x71   : > { %p9795_p11 = por %p9794_p10, %p9793_p9 }
  0x72   : > { %p9789_p8 = pneg %p9788_p6 }
  0x74   : > { %p9796_p12 = pnand %p9795_p11, %p9789_p8 }
  0x76   : > { %9799 = shalt.err (!%p9796_p12)
}
  0x77   : > { %9536 = dma.hbm_to_vmem [thread:$0]  (!%p9893_p5), %s11983_s6, 16, %s268_s8, [#allocation8]  }
  0x78   : > { %p12058_p13 = scmp.ne.s32.totalorder %s12055_s29, 0 }
  0x7a   : > { %290 = sbr.rel (%p12058_p13) target bundleno = 1368 (0x558), region = 48 }
  0x81   : > { %p12059_p2 = scmp.ne.s32.totalorder %s12054_s28, 0 }
  0x83   : > { %9805 = dma.done.wait (%p12059_p2), [#allocation3], 13824  }
  0x84   : > { %9807 = vsyncadd (%p12059_p2), [#allocation3], 4294953472 }
  0x85   : > { %9809 = dma.done.wait (%p12059_p2), [#allocation5], 65664  }
  0x86   : > { %9811 = vsyncadd (%p12059_p2), [#allocation5], 4294901632 }
  0x87   : > { %9813 = dma.done.wait (%p12059_p2), [#allocation8], 144  }
  0x88   : > { %9815 = vsyncadd (%p12059_p2), [#allocation8], 4294967152  ;;  %s7984_s29 = sshll.u32 %s7969_s27, 4  ;;  %v369_v0 = vld [vmem:[#allocation2] sm:$0xff]  ;;  %vm1131_vm0 = vcmask 719872   ;;  %v370_v18 = vld [vmem:[#allocation2 + $0x8] sm:$0xff] }
  0x89   : > { %p340_p5 = scmp.lt.s32.totalorder %s7984_s29, 31  ;;  %v373_v1 = vld [vmem:[#allocation2 + $0x20] sm:$0xff]  ;;  %v374_v19 = vld [vmem:[#allocation2 + $0x28] sm:$0xff]  ;;  %vm1156_vm1 = vcmask 1043456   ;;  %vm7846_vm2 = vcmask 15360  }
  0x8a   : > { %v377_v2 = vld [vmem:[#allocation2 + $0x40] sm:$0xff]  ;;  %v8006_v3 = vcombine.high %v369_v0, %v373_v1  ;;  %v8005_v4 = vcombine.low %v369_v0, %v373_v1  ;;  %v8008_v20 = vcombine.high %v370_v18, %v374_v19  ;;  %v8007_v21 = vcombine.low %v370_v18, %v374_v19  ;;  %v378_v23 = vld [vmem:[#allocation2 + $0x48] sm:$0xff] }
  0x8b   : > { %s12145_s29 = smov (!%p340_p5, %s7984_s29), 31  ;;  %v381_v5 = vld [vmem:[#allocation2 + $0x60] sm:$0xff]  ;;  %v382_v24 = vld [vmem:[#allocation2 + $0x68] sm:$0xff] }
  0x8c   : > { %v8014_v6 = vcombine.high %v377_v2, %v381_v5  ;;  %v385_v7 = vld [vmem:[#allocation2 + $0x80] sm:$0xff]  ;;  %1181 = vmatprep.subr.bf16.mxu0 %v8006_v3  ;;  %s8732_s28 = sshll.u32 %s12145_s29, 3  ;;  %v8013_v9 = vcombine.low %v377_v2, %v381_v5  ;;  %1294 = vmatprep.subr.bf16.mxu1 %v8008_v20  ;;  %v8016_v26 = vcombine.high %v378_v23, %v382_v24  ;;  %v386_v27 = vld [vmem:[#allocation2 + $0x88] sm:$0xff] }
  0x8d   : > { %v389_v8 = vld [vmem:[#allocation2 + $0xa0] sm:$0xff]  ;;  %1182 = vmatpush1.bf16.msra.mxu0 %v8005_v4  ;;  %s10037_s19 = scalar_lea.vmem %s11977_s0, %s8732_s28  ;;  %v390_v28 = vld [vmem:[#allocation2 + $0xa8] sm:$0xff]  ;;  %1295 = vmatpush1.bf16.msra.mxu1 %v8007_v21  ;;  %v8015_v31 = vcombine.low %v378_v23, %v382_v24  ;;  %s11925_s20 = scalar_lea.vmem %s11984_s7, %s8732_s28 }
  0x8e   : > { %1183 = vmatprep.subr.bf16.mxu0 %v8014_v6  ;;  %v8022_v10 = vcombine.high %v385_v7, %v389_v8  ;;  %v393_v11 = vld [vmem:[#allocation2 + $0xc0] sm:$0xff]  ;;  %v8021_v13 = vcombine.low %v385_v7, %v389_v8  ;;  %1296 = vmatprep.subr.bf16.mxu1 %v8016_v26  ;;  %v8024_v32 = vcombine.high %v386_v27, %v390_v28  ;;  %v394_v33 = vld [vmem:[#allocation2 + $0xc8] sm:$0xff] }
  0x8f   : > { %v397_v12 = vld [vmem:[#allocation2 + $0xe0] sm:$0xff]  ;;  %v398_v35 = vld [vmem:[#allocation2 + $0xe8] sm:$0xff]  ;;  %v8023_v39 = vcombine.low %v386_v27, %v390_v28 }
  0x90   : > { %v401_v14 = vld [vmem:[#allocation2 + $0x100] sm:$0xff]  ;;  %v8030_v15 = vcombine.high %v393_v11, %v397_v12  ;;  %v8029_v22 = vcombine.low %v393_v11, %v397_v12  ;;  %v8032_v40 = vcombine.high %v394_v33, %v398_v35  ;;  %v402_v42 = vld [vmem:[#allocation2 + $0x108] sm:$0xff]  ;;  %v8031_v47 = vcombine.low %v394_v33, %v398_v35 }
  0x91   : > { %1184 = vmatpush1.bf16.msra.mxu0 %v8013_v9  ;;  %v10040_v16 = vld [vmem:[%s10037_s19 + $0x4] ss:$8 sps:$4 sm:$0xff]   ;;  %1297 = vmatpush1.bf16.msra.mxu1 %v8015_v31 }
  0x92   : > { %1185 = vmatprep.subr.bf16.mxu0 %v8022_v10  ;;  %v405_v17 = vld [vmem:[#allocation2 + $0x120] sm:$0xff]  ;;  %8118 = vmatprep.mubr.msk.bf16.mxu0 %vm1131_vm0, %v10040_v16  ;;  %v406_v43 = vld [vmem:[#allocation2 + $0x128] sm:$0xff] }
  0x93   : > { %8127 = vmatprep.mubr.msk.bf16.mxu1 %vm1131_vm0, %v10040_v16  ;;  %v8038_v25 = vcombine.high %v401_v14, %v405_v17  ;;  %v409_v29 = vld [vmem:[#allocation2 + $0x140] sm:$0xff]  ;;  %v8037_v34 = vcombine.low %v401_v14, %v405_v17  ;;  %1298 = vmatprep.subr.bf16.mxu1 %v8024_v32  ;;  %v8040_v48 = vcombine.high %v402_v42, %v406_v43  ;;  %v410_v49 = vld [vmem:[#allocation2 + $0x148] sm:$0xff] }
  0x94   : > { %v413_v30 = vld [vmem:[#allocation2 + $0x160] sm:$0xff]  ;;  %v414_v51 = vld [vmem:[#allocation2 + $0x168] sm:$0xff]  ;;  %v8039_v55 = vcombine.low %v402_v42, %v406_v43 }
  0x95   : > { %1186 = vmatpush1.bf16.msra.mxu0 %v8021_v13  ;;  %v8046_v36 = vcombine.high %v409_v29, %v413_v30  ;;  %v417_v37 = vld [vmem:[#allocation2 + $0x180] sm:$0xff]  ;;  %v8045_v41 = vcombine.low %v409_v29, %v413_v30  ;;  %1299 = vmatpush1.bf16.msra.mxu1 %v8023_v39  ;;  %v8048_v56 = vcombine.high %v410_v49, %v414_v51  ;;  %v418_v58 = vld [vmem:[#allocation2 + $0x188] sm:$0xff]  ;;  %v371_v39 = vld [vmem:[#allocation2 + $0x10] sm:$0xff] }
  0x96   : > { %1187 = vmatprep.subr.bf16.mxu0 %v8030_v15  ;;  %v421_v38 = vld [vmem:[#allocation2 + $0x1a0] sm:$0xff]  ;;  %1300 = vmatprep.subr.bf16.mxu1 %v8032_v40  ;;  %v422_v59 = vld [vmem:[#allocation2 + $0x1a8] sm:$0xff]  ;;  %v8047_v63 = vcombine.low %v410_v49, %v414_v51  ;;  %v375_v40 = vld [vmem:[#allocation2 + $0x30] sm:$0xff] }
  0x97   : > { %v8054_v44 = vcombine.high %v417_v37, %v421_v38  ;;  %v425_v45 = vld [vmem:[#allocation2 + $0x1c0] sm:$0xff]  ;;  %v8053_v50 = vcombine.low %v417_v37, %v421_v38  ;;  %v8056_v0 = vcombine.high %v418_v58, %v422_v59  ;;  %v426_v2 = vld [vmem:[#allocation2 + $0x1c8] sm:$0xff]  ;;  %v8055_v7 = vcombine.low %v418_v58, %v422_v59  ;;  %v10052_v51 = vld [vmem:[%s10037_s19 + $0x14] ss:$8 sps:$4 sm:$0xff]  }
  0x98   : > { %v429_v46 = vld [vmem:[#allocation2 + $0x1e0] sm:$0xff]  ;;  %v430_v3 = vld [vmem:[#allocation2 + $0x1e8] sm:$0xff] }
  0x99   : > { %1188 = vmatpush1.bf16.msra.mxu0 %v8029_v22  ;;  %v8062_v52 = vcombine.high %v425_v45, %v429_v46  ;;  %v433_v53 = vld [vmem:[#allocation2 + $0x200] sm:$0xff]  ;;  %1301 = vmatpush1.bf16.msra.mxu1 %v8031_v47  ;;  %v8061_v57 = vcombine.low %v425_v45, %v429_v46  ;;  %v8064_v8 = vcombine.high %v426_v2, %v430_v3  ;;  %v434_v10 = vld [vmem:[#allocation2 + $0x208] sm:$0xff]  ;;  %v379_v47 = vld [vmem:[#allocation2 + $0x50] sm:$0xff] }
  0x9a   : > { %1189 = vmatprep.subr.bf16.mxu0 %v8038_v25  ;;  %v437_v54 = vld [vmem:[#allocation2 + $0x220] sm:$0xff]  ;;  %1302 = vmatprep.subr.bf16.mxu1 %v8040_v48  ;;  %v438_v11 = vld [vmem:[#allocation2 + $0x228] sm:$0xff]  ;;  %v8063_v15 = vcombine.low %v426_v2, %v430_v3  ;;  %v8010_v45 = vcombine.high %v371_v39, %v375_v40  ;;  %v383_v48 = vld [vmem:[#allocation2 + $0x70] sm:$0xff] }
  0x9b   : > { %v8070_v60 = vcombine.high %v433_v53, %v437_v54  ;;  %v441_v61 = vld [vmem:[#allocation2 + $0x240] sm:$0xff]  ;;  %v8069_v1 = vcombine.low %v433_v53, %v437_v54  ;;  %v8072_v17 = vcombine.high %v434_v10, %v438_v11  ;;  %v442_v19 = vld [vmem:[#allocation2 + $0x248] sm:$0xff]  ;;  %v8071_v24 = vcombine.low %v434_v10, %v438_v11  ;;  %v10058_v2 = vld [vmem:[%s10037_s19 + $0x10] ss:$8 sps:$4 sm:$0xff]  }
  0x9c   : > { %v445_v62 = vld [vmem:[#allocation2 + $0x260] sm:$0xff]  ;;  %v446_v20 = vld [vmem:[#allocation2 + $0x268] sm:$0xff]  ;;  %v8009_v53 = vcombine.low %v371_v39, %v375_v40  ;;  %v8018_v54 = vcombine.high %v379_v47, %v383_v48  ;;  %v403_v10 = vld [vmem:[#allocation2 + $0x110] sm:$0xff] }
  0x9d   : > { %1190 = vmatpush1.bf16.msra.mxu0 %v8037_v34  ;;  %1303 = vmatpush1.bf16.msra.mxu1 %v8039_v55  ;;  %v8078_v4 = vcombine.high %v441_v61, %v445_v62  ;;  %v449_v5 = vld [vmem:[#allocation2 + $0x280] sm:$0xff]  ;;  %v8077_v9 = vcombine.low %v441_v61, %v445_v62  ;;  %v8080_v25 = vcombine.high %v442_v19, %v446_v20  ;;  %v450_v27 = vld [vmem:[#allocation2 + $0x288] sm:$0xff]  ;;  %v372_v61 = vld [vmem:[#allocation2 + $0x18] sm:$0xff] }
  0x9e   : > { %1191 = vmatprep.subr.bf16.mxu0 %v8046_v36  ;;  %1304 = vmatprep.subr.bf16.mxu1 %v8048_v56  ;;  %v453_v6 = vld [vmem:[#allocation2 + $0x2a0] sm:$0xff]  ;;  %v454_v28 = vld [vmem:[#allocation2 + $0x2a8] sm:$0xff]  ;;  %v8079_v31 = vcombine.low %v442_v19, %v446_v20  ;;  %v387_v56 = vld [vmem:[#allocation2 + $0x90] sm:$0xff] }
  0x9f   : > { %v8086_v12 = vcombine.high %v449_v5, %v453_v6  ;;  %v457_v13 = vld [vmem:[#allocation2 + $0x2c0] sm:$0xff]  ;;  %v8085_v18 = vcombine.low %v449_v5, %v453_v6  ;;  %v8088_v32 = vcombine.high %v450_v27, %v454_v28  ;;  %v458_v34 = vld [vmem:[#allocation2 + $0x2c8] sm:$0xff]  ;;  %v8087_v38 = vcombine.low %v450_v27, %v454_v28  ;;  %v376_v62 = vld [vmem:[#allocation2 + $0x38] sm:$0xff] }
  0xa0   : > { %v461_v14 = vld [vmem:[#allocation2 + $0x2e0] sm:$0xff]  ;;  %v462_v35 = vld [vmem:[#allocation2 + $0x2e8] sm:$0xff]  ;;  %v407_v11 = vld [vmem:[#allocation2 + $0x130] sm:$0xff] }
  0xa1   : > { %1192 = vmatpush1.bf16.msra.mxu0 %v8045_v41  ;;  %1305 = vmatpush1.bf16.msra.mxu1 %v8047_v63  ;;  %v8094_v21 = vcombine.high %v457_v13, %v461_v14  ;;  %v465_v22 = vld [vmem:[#allocation2 + $0x300] sm:$0xff]  ;;  %v8093_v26 = vcombine.low %v457_v13, %v461_v14  ;;  %v8096_v41 = vcombine.high %v458_v34, %v462_v35  ;;  %v466_v42 = vld [vmem:[#allocation2 + $0x308] sm:$0xff]  ;;  %v388_v13 = vld [vmem:[#allocation2 + $0x98] sm:$0xff] }
  0xa2   : > { %1193 = vmatprep.subr.bf16.mxu0 %v8054_v44  ;;  %1306 = vmatprep.subr.bf16.mxu1 %v8056_v0  ;;  %v469_v23 = vld [vmem:[#allocation2 + $0x320] sm:$0xff]  ;;  %v470_v43 = vld [vmem:[#allocation2 + $0x328] sm:$0xff]  ;;  %v8095_v46 = vcombine.low %v458_v34, %v462_v35  ;;  %v395_v0 = vld [vmem:[#allocation2 + $0xd0] sm:$0xff]  ;;  %v8041_v27 = vcombine.low %v403_v10, %v407_v11 }
  0xa3   : > { %v8102_v29 = vcombine.high %v465_v22, %v469_v23  ;;  %v473_v30 = vld [vmem:[#allocation2 + $0x340] sm:$0xff]  ;;  %v8101_v33 = vcombine.low %v465_v22, %v469_v23  ;;  %v8103_v55 = vcombine.low %v466_v42, %v470_v43  ;;  %v392_v14 = vld [vmem:[#allocation2 + $0xb8] sm:$0xff]  ;;  %v415_v19 = vld [vmem:[#allocation2 + $0x170] sm:$0xff] }
  0xa4   : > { %v8110_v36 = vcombine.high %v473_v30, %v473_v30  ;;  %v8109_v37 = vcombine.low %v473_v30, %v473_v30  ;;  %v10049_v49 = vld [vmem:[%s10037_s19] ss:$8 sps:$4 sm:$0xff]   ;;  %v10063_v5 = vld [vmem:[%s10037_s19 + $0x24] ss:$8 sps:$4 sm:$0xff]   ;;  %v10073_v22 = vld [vmem:[%s10037_s19 + $0x34] ss:$8 sps:$4 sm:$0xff]  }
  0xa5   : > { %1194 = vmatpush1.bf16.msra.mxu0 %v8053_v50  ;;  %1307 = vmatpush1.bf16.msra.mxu1 %v8055_v7  ;;  %v8104_v50 = vcombine.high %v466_v42, %v470_v43  ;;  %v380_v7 = vld [vmem:[#allocation2 + $0x58] sm:$0xff]  ;;  %v10069_v20 = vld [vmem:[%s10037_s19 + $0x20] ss:$8 sps:$4 sm:$0xff]   ;;  %v419_v28 = vld [vmem:[#allocation2 + $0x190] sm:$0xff] }
  0xa6   : > { %1195 = vmatprep.subr.bf16.mxu0 %v8062_v52  ;;  %1308 = vmatprep.subr.bf16.mxu1 %v8064_v8  ;;  %v1158_v44 = vsel %vm1156_vm1, %v8109_v37, 0  ;;  %v474_v52 = vld [vmem:[#allocation2 + $0x348] sm:$0xff]  ;;  %v384_v8 = vld [vmem:[#allocation2 + $0x78] sm:$0xff]  ;;  %v431_v37 = vld [vmem:[#allocation2 + $0x1f0] sm:$0xff] }
  0xa7   : > { %v8112_v58 = vcombine.high %v474_v52, %v474_v52  ;;  %v8111_v59 = vcombine.low %v474_v52, %v474_v52  ;;  %v8019_v23 = vcombine.low %v380_v7, %v384_v8  ;;  %v10085_v40 = vld [vmem:[%s10037_s19 + $0x44] ss:$8 sps:$4 sm:$0xff]   ;;  %v412_v42 = vld [vmem:[#allocation2 + $0x158] sm:$0xff] }
  0xa8   : > { %v416_v43 = vld [vmem:[#allocation2 + $0x178] sm:$0xff] }
  0xa9   : > { %1196 = vmatpush1.bf16.msra.mxu0 %v8061_v57  ;;  %1309 = vmatpush1.bf16.msra.mxu1 %v8063_v15  ;;  %v391_v57 = vld [vmem:[#allocation2 + $0xb0] sm:$0xff]  ;;  %v1164_v3 = vsel %vm1156_vm1, %v8111_v59, 0  ;;  %v8020_v15 = vcombine.high %v380_v7, %v384_v8  ;;  %v420_v52 = vld [vmem:[#allocation2 + $0x198] sm:$0xff] }
  0xaa   : > { %1197 = vmatprep.subr.bf16.mxu0 %v8070_v60  ;;  %1310 = vmatprep.subr.bf16.mxu1 %v8072_v17  ;;  %v8017_v60 = vcombine.low %v379_v47, %v383_v48  ;;  %v8026_v63 = vcombine.high %v387_v56, %v391_v57  ;;  %v8025_v6 = vcombine.low %v387_v56, %v391_v57  ;;  %v439_v47 = vld [vmem:[#allocation2 + $0x230] sm:$0xff]  ;;  %v436_v8 = vld [vmem:[#allocation2 + $0x218] sm:$0xff] }
  0xab   : > { %v443_v56 = vld [vmem:[#allocation2 + $0x250] sm:$0xff] }
  0xac   : > { %v447_v57 = vld [vmem:[#allocation2 + $0x270] sm:$0xff] }
  0xad   : > { %1198 = vmatpush1.bf16.msra.mxu0 %v8069_v1  ;;  %1311 = vmatpush1.bf16.msra.mxu1 %v8071_v24  ;;  %v399_v1 = vld [vmem:[#allocation2 + $0xf0] sm:$0xff]  ;;  %v396_v24 = vld [vmem:[#allocation2 + $0xd8] sm:$0xff] }
  0xae   : > { %1199 = vmatprep.subr.bf16.mxu0 %v8078_v4  ;;  %1312 = vmatprep.subr.bf16.mxu1 %v8080_v25  ;;  %v8012_v4 = vcombine.high %v372_v61, %v376_v62  ;;  %v8033_v17 = vcombine.low %v395_v0, %v399_v1  ;;  %v400_v25 = vld [vmem:[#allocation2 + $0xf8] sm:$0xff] }
  0xaf   : > { %v8036_v34 = vcombine.high %v396_v24, %v400_v25 }
  0xb1   : > { %1200 = vmatpush1.bf16.msra.mxu0 %v8077_v9  ;;  %1313 = vmatpush1.bf16.msra.mxu1 %v8079_v31  ;;  %v8034_v9 = vcombine.high %v395_v0, %v399_v1  ;;  %v8027_v31 = vcombine.low %v388_v13, %v392_v14 }
  0xb2   : > { %1201 = vmatprep.subr.bf16.mxu0 %v8086_v12  ;;  %1314 = vmatprep.subr.bf16.mxu1 %v8088_v32  ;;  %v8011_v12 = vcombine.low %v372_v61, %v376_v62  ;;  %v404_v32 = vld [vmem:[#allocation2 + $0x118] sm:$0xff]  ;;  %v8051_v61 = vcombine.low %v412_v42, %v416_v43 }
  0xb3   : > { %v428_v62 = vld [vmem:[#allocation2 + $0x1d8] sm:$0xff] }
  0xb5   : > { %1202 = vmatpush1.bf16.msra.mxu0 %v8085_v18  ;;  %1315 = vmatpush1.bf16.msra.mxu1 %v8087_v38  ;;  %v411_v18 = vld [vmem:[#allocation2 + $0x150] sm:$0xff] }
  0xb6   : > { %1203 = vmatprep.subr.bf16.mxu0 %v8094_v21  ;;  %1316 = vmatprep.subr.bf16.mxu1 %v8096_v41  ;;  %v8042_v21 = vcombine.high %v403_v10, %v407_v11  ;;  %v8050_v30 = vcombine.high %v411_v18, %v415_v19  ;;  %v8049_v35 = vcombine.low %v411_v18, %v415_v19  ;;  %v10081_v38 = vld [vmem:[%s10037_s19 + $0x30] ss:$8 sps:$4 sm:$0xff]  }
  0xb7   : > { %v8035_v41 = vcombine.low %v396_v24, %v400_v25  ;;  %v8081_v11 = vcombine.low %v443_v56, %v447_v57  ;;  %v444_v19 = vld [vmem:[#allocation2 + $0x258] sm:$0xff]  ;;  %v467_v25 = vld [vmem:[#allocation2 + $0x310] sm:$0xff] }
  0xb9   : > { %1204 = vmatpush1.bf16.msra.mxu0 %v8093_v26  ;;  %1317 = vmatpush1.bf16.msra.mxu1 %v8095_v46  ;;  %v8028_v26 = vcombine.high %v388_v13, %v392_v14  ;;  %v435_v46 = vld [vmem:[#allocation2 + $0x210] sm:$0xff] }
  0xba   : > { %1205 = vmatprep.subr.bf16.mxu0 %v8102_v29  ;;  %1318 = vmatprep.subr.bf16.mxu1 %v8104_v50  ;;  %v423_v29 = vld [vmem:[#allocation2 + $0x1b0] sm:$0xff]  ;;  %v8074_v59 = vcombine.high %v435_v46, %v439_v47  ;;  %v8073_v1 = vcombine.low %v435_v46, %v439_v47 }
  0xbb   : > { %v8058_v39 = vcombine.high %v419_v28, %v423_v29  ;;  %v463_v13 = vld [vmem:[#allocation2 + $0x2f0] sm:$0xff] }
  0xbc   : > { %v10105_v14 = vld [vmem:[%s10037_s19 + $0x50] ss:$8 sps:$4 sm:$0xff]  }
  0xbd   : > { %1206 = vmatpush1.bf16.msra.mxu0 %v8101_v33  ;;  %1319 = vmatpush1.bf16.msra.mxu1 %v8103_v55  ;;  %v408_v33 = vld [vmem:[#allocation2 + $0x138] sm:$0xff] }
  0xbe   : > { %8117 = vmatprep.subr.msk.bf16.mxu0 %vm1156_vm1, %v8110_v36  ;;  %8126 = vmatprep.subr.msk.bf16.mxu1 %vm1156_vm1, %v8112_v58  ;;  %v427_v36 = vld [vmem:[#allocation2 + $0x1d0] sm:$0xff]  ;;  %v8043_v50 = vcombine.low %v404_v32, %v408_v33  ;;  %v10093_v58 = vld [vmem:[%s10037_s19 + $0x40] ss:$8 sps:$4 sm:$0xff]  }
  0xbf   : > { %v8066_v48 = vcombine.high %v427_v36, %v431_v37  ;;  %v8065_v55 = vcombine.low %v427_v36, %v431_v37  ;;  %v10121_v36 = vld [vmem:[%s10037_s19 + $0x74] ss:$8 sps:$4 sm:$0xff]  }
  0xc1   : > { %1208 = vmatpush1.bf16.msra.mxu0 %v1158_v44  ;;  %1321 = vmatpush1.bf16.msra.mxu1 %v1164_v3  ;;  %v8044_v44 = vcombine.high %v404_v32, %v408_v33  ;;  %v451_v3 = vld [vmem:[#allocation2 + $0x290] sm:$0xff] }
  0xc2   : > { %1407 = vmatprep.subr.bf16.mxu0 %v8010_v45  ;;  %1520 = vmatprep.subr.bf16.mxu1 %v8012_v4  ;;  %v8057_v45 = vcombine.low %v419_v28, %v423_v29  ;;  %v455_v4 = vld [vmem:[#allocation2 + $0x2b0] sm:$0xff]  ;;  %v452_v29 = vld [vmem:[#allocation2 + $0x298] sm:$0xff] }
  0xc3   : > { %v8089_v24 = vcombine.low %v451_v3, %v455_v4  ;;  %v475_v33 = vld [vmem:[#allocation2 + $0x350] sm:$0xff] }
  0xc4   : > { %1214 = vmatmul.mubr.bf16.vlgmr.msra.gmra.mrb[0].mxu0 %v10049_v49  ;;  %1327 = vmatmul.mubr.bf16.vlgmr.msra.gmra.mrb[0].mxu1 %v10049_v49  ;;  %v8114_v46 = vcombine.high %v475_v33, %v475_v33  ;;  %v8113_v47 = vcombine.low %v475_v33, %v475_v33 }
  0xc5   : > { %8119 = vmatprep.mubr.msk.bf16.mxu0 %vm1131_vm0, %v10052_v51  ;;  %1408 = vmatpush1.bf16.msra.mxu0 %v8009_v53  ;;  %v424_v53 = vld [vmem:[#allocation2 + $0x1b8] sm:$0xff] }
  0xc6   : > { %1409 = vmatprep.subr.bf16.mxu0 %v8018_v54  ;;  %8128 = vmatprep.mubr.msk.bf16.mxu1 %vm1131_vm0, %v10052_v51  ;;  %v8052_v54 = vcombine.high %v412_v42, %v416_v43  ;;  %v8060_v0 = vcombine.high %v420_v52, %v424_v53  ;;  %v8059_v7 = vcombine.low %v420_v52, %v424_v53  ;;  %v468_v52 = vld [vmem:[#allocation2 + $0x318] sm:$0xff] }
  0xc7   : > { %1521 = vmatpush1.bf16.msra.mxu1 %v8011_v12  ;;  %v459_v12 = vld [vmem:[#allocation2 + $0x2d0] sm:$0xff]  ;;  %v472_v53 = vld [vmem:[#allocation2 + $0x338] sm:$0xff] }
  0xc8   : > { %1522 = vmatprep.subr.bf16.mxu1 %v8020_v15  ;;  %v8090_v15 = vcombine.high %v451_v3, %v455_v4  ;;  %v8097_v32 = vcombine.low %v459_v12, %v463_v13  ;;  %v1830_v3 = vld [vmem:[#allocation6 + $0x28] sm:$0xff]  ;;  %v1833_v4 = vld [vmem:[#allocation6 + $0x40] sm:$0xff] }
  0xc9   : > { %1410 = vmatpush1.bf16.msra.mxu0 %v8017_v60  ;;  %v10097_v60 = vld [vmem:[%s10037_s19 + $0x54] ss:$8 sps:$4 sm:$0xff]  }
  0xca   : > { %1411 = vmatprep.subr.bf16.mxu0 %v8026_v63  ;;  %v432_v63 = vld [vmem:[#allocation2 + $0x1f8] sm:$0xff] }
  0xcb   : > { %1523 = vmatpush1.bf16.msra.mxu1 %v8019_v23  ;;  %v8068_v10 = vcombine.high %v428_v62, %v432_v63  ;;  %v8067_v18 = vcombine.low %v428_v62, %v432_v63  ;;  %v8107_v62 = vcombine.low %v468_v52, %v472_v53 }
  0xcc   : > { %1224 = vmatmul.mubr.bf16.gmra.mrb[4].mxu0 %v10058_v2  ;;  %1524 = vmatprep.subr.bf16.mxu1 %v8028_v26  ;;  %v471_v26 = vld [vmem:[#allocation2 + $0x330] sm:$0xff] }
  0xcd   : > { %8120 = vmatprep.mubr.msk.bf16.mxu0 %vm1131_vm0, %v10063_v5  ;;  %1412 = vmatpush1.bf16.msra.mxu0 %v8025_v6  ;;  %v8082_v6 = vcombine.high %v443_v56, %v447_v57  ;;  %v8105_v43 = vcombine.low %v467_v25, %v471_v26  ;;  %v10134_v57 = vld [vmem:[%s10037_s19 + $0x70] ss:$8 sps:$4 sm:$0xff]  }
  0xce   : > { %1413 = vmatprep.subr.bf16.mxu0 %v8034_v9  ;;  %1337 = vmatmul.mubr.bf16.gmra.mrb[4].mxu1 %v10058_v2  ;;  %v440_v9 = vld [vmem:[#allocation2 + $0x238] sm:$0xff] }
  0xcf   : > { %8129 = vmatprep.mubr.msk.bf16.mxu1 %vm1131_vm0, %v10063_v5  ;;  %1525 = vmatpush1.bf16.msra.mxu1 %v8027_v31  ;;  %v8076_v23 = vcombine.high %v436_v8, %v440_v9  ;;  %v8075_v28 = vcombine.low %v436_v8, %v440_v9 }
  0xd0   : > { %1526 = vmatprep.subr.bf16.mxu1 %v8036_v34  ;;  %v10117_v34 = vld [vmem:[%s10037_s19 + $0x60] ss:$8 sps:$4 sm:$0xff]  }
  0xd1   : > { %1414 = vmatpush1.bf16.msra.mxu0 %v8033_v17  ;;  %v10109_v17 = vld [vmem:[%s10037_s19 + $0x64] ss:$8 sps:$4 sm:$0xff]  }
  0xd2   : > { %1415 = vmatprep.subr.bf16.mxu0 %v8042_v21  ;;  %v448_v21 = vld [vmem:[#allocation2 + $0x278] sm:$0xff] }
  0xd3   : > { %1527 = vmatpush1.bf16.msra.mxu1 %v8035_v41  ;;  %v8084_v31 = vcombine.high %v444_v19, %v448_v21  ;;  %v8083_v37 = vcombine.low %v444_v19, %v448_v21  ;;  %v464_v41 = vld [vmem:[#allocation2 + $0x2f8] sm:$0xff]  ;;  %v1853_v19 = vld [vmem:[#allocation6 + $0xe0] sm:$0xff]  ;;  %v1834_v21 = vld [vmem:[#allocation6 + $0x48] sm:$0xff] }
  0xd4   : > { %1234 = vmatmul.mubr.bf16.gmra.mrb[8].mxu0 %v10069_v20  ;;  %1528 = vmatprep.subr.bf16.mxu1 %v8044_v44  ;;  %v1825_v44 = vld [vmem:[#allocation6] sm:$0xff] }
  0xd5   : > { %8121 = vmatprep.mubr.msk.bf16.mxu0 %vm1131_vm0, %v10073_v22  ;;  %1416 = vmatpush1.bf16.msra.mxu0 %v8041_v27  ;;  %v8098_v27 = vcombine.high %v459_v12, %v463_v13 }
  0xd6   : > { %1417 = vmatprep.subr.bf16.mxu0 %v8050_v30  ;;  %1347 = vmatmul.mubr.bf16.gmra.mrb[8].mxu1 %v10069_v20  ;;  %v456_v30 = vld [vmem:[#allocation2 + $0x2b8] sm:$0xff] }
  0xd7   : > { %8130 = vmatprep.mubr.msk.bf16.mxu1 %vm1131_vm0, %v10073_v22  ;;  %1529 = vmatpush1.bf16.msra.mxu1 %v8043_v50  ;;  %v8092_v42 = vcombine.high %v452_v29, %v456_v30 }
  0xd8   : > { %1530 = vmatprep.subr.bf16.mxu1 %v8052_v54  ;;  %v1170_v54 = vsel %vm1156_vm1, %v8113_v47, 0  ;;  %v1877_v47 = vld [vmem:[#allocation6 + $0x1a0] sm:$0xff] }
  0xd9   : > { %1418 = vmatpush1.bf16.msra.mxu0 %v8049_v35  ;;  %v8106_v35 = vcombine.high %v467_v25, %v471_v26 }
  0xda   : > { %1419 = vmatprep.subr.bf16.mxu0 %v8058_v39  ;;  %v460_v39 = vld [vmem:[#allocation2 + $0x2d8] sm:$0xff] }
  0xdb   : > { %1531 = vmatpush1.bf16.msra.mxu1 %v8051_v61  ;;  %v8100_v50 = vcombine.high %v460_v39, %v464_v41  ;;  %v8099_v56 = vcombine.low %v460_v39, %v464_v41  ;;  %v476_v61 = vld [vmem:[#allocation2 + $0x358] sm:$0xff]  ;;  %v1869_v39 = vld [vmem:[#allocation6 + $0x160] sm:$0xff] }
  0xdc   : > { %1244 = vmatmul.mubr.bf16.gmra.mrb[12].mxu0 %v10081_v38  ;;  %1532 = vmatprep.subr.bf16.mxu1 %v8060_v0  ;;  %v8116_v63 = vcombine.high %v476_v61, %v476_v61  ;;  %v8115_v0 = vcombine.low %v476_v61, %v476_v61  ;;  %v1866_v61 = vld [vmem:[#allocation6 + $0x148] sm:$0xff] }
  0xdd   : > { %8122 = vmatprep.mubr.msk.bf16.mxu0 %vm1131_vm0, %v10085_v40  ;;  %1420 = vmatpush1.bf16.msra.mxu0 %v8057_v45  ;;  %v1829_v45 = vld [vmem:[#allocation6 + $0x20] sm:$0xff] }
  0xde   : > { %1421 = vmatprep.subr.bf16.mxu0 %v8066_v48  ;;  %1357 = vmatmul.mubr.bf16.gmra.mrb[12].mxu1 %v10081_v38  ;;  %v8091_v48 = vcombine.low %v452_v29, %v456_v30  ;;  %v8153_v9 = vcombine.low %v1825_v44, %v1829_v45  ;;  %v1842_v30 = vld [vmem:[#allocation6 + $0x88] sm:$0xff] }
  0xdf   : > { %8131 = vmatprep.mubr.msk.bf16.mxu1 %vm1131_vm0, %v10085_v40  ;;  %1533 = vmatpush1.bf16.msra.mxu1 %v8059_v7  ;;  %v1176_v7 = vsel %vm1156_vm1, %v8115_v0, 0 }
  0xe0   : > { %1534 = vmatprep.subr.bf16.mxu1 %v8068_v10 }
  0xe1   : > { %1422 = vmatpush1.bf16.msra.mxu0 %v8065_v55  ;;  %v8154_v55 = vcombine.high %v1825_v44, %v1829_v45 }
  0xe2   : > { %1423 = vmatprep.subr.bf16.mxu0 %v8074_v59  ;;  %v8108_v59 = vcombine.high %v468_v52, %v472_v53 }
  0xe3   : > { %1535 = vmatpush1.bf16.msra.mxu1 %v8067_v18  ;;  %v1849_v18 = vld [vmem:[#allocation6 + $0xc0] sm:$0xff] }
  0xe4   : > { %1254 = vmatmul.mubr.bf16.gmra.mrb[16].mxu0 %v10093_v58  ;;  %1536 = vmatprep.subr.bf16.mxu1 %v8076_v23  ;;  %v1838_v23 = vld [vmem:[#allocation6 + $0x68] sm:$0xff]  ;;  %v8178_v25 = vcombine.high %v1849_v18, %v1853_v19 }
  0xe5   : > { %8123 = vmatprep.mubr.msk.bf16.mxu0 %vm1131_vm0, %v10097_v60  ;;  %1424 = vmatpush1.bf16.msra.mxu0 %v8073_v1  ;;  %v1826_v1 = vld [vmem:[#allocation6 + $0x8] sm:$0xff]  ;;  %v8164_v29 = vcombine.high %v1834_v21, %v1838_v23 }
  0xe6   : > { %1425 = vmatprep.subr.bf16.mxu0 %v8082_v6  ;;  %1367 = vmatmul.mubr.bf16.gmra.mrb[16].mxu1 %v10093_v58  ;;  %v1837_v6 = vld [vmem:[#allocation6 + $0x60] sm:$0xff]  ;;  %v8156_v8 = vcombine.high %v1826_v1, %v1830_v3  ;;  %v8155_v26 = vcombine.low %v1826_v1, %v1830_v3 }
  0xe7   : > { %8132 = vmatprep.mubr.msk.bf16.mxu1 %vm1131_vm0, %v10097_v60  ;;  %1537 = vmatpush1.bf16.msra.mxu1 %v8075_v28  ;;  %v8162_v10 = vcombine.high %v1833_v4, %v1837_v6  ;;  %v8161_v12 = vcombine.low %v1833_v4, %v1837_v6  ;;  %v1861_v28 = vld [vmem:[#allocation6 + $0x120] sm:$0xff]  ;;  %v1878_v6 = vld [vmem:[#allocation6 + $0x1a8] sm:$0xff] }
  0xe8   : > { %1538 = vmatprep.subr.bf16.mxu1 %v8084_v31  ;;  %v1846_v31 = vld [vmem:[#allocation6 + $0xa8] sm:$0xff]  ;;  %v1893_v3 = vld [vmem:[#allocation6 + $0x220] sm:$0xff] }
  0xe9   : > { %1426 = vmatpush1.bf16.msra.mxu0 %v8081_v11  ;;  %v1845_v11 = vld [vmem:[#allocation6 + $0xa0] sm:$0xff]  ;;  %v8172_v41 = vcombine.high %v1842_v30, %v1846_v31 }
  0xea   : > { %1427 = vmatprep.subr.bf16.mxu0 %v8090_v15  ;;  %v9658_v15 = vld [vmem:[%s10037_s19 + $0x4] ss:$8 sps:$4 sm:$0xff]  }
  0xeb   : > { %1539 = vmatpush1.bf16.msra.mxu1 %v8083_v37  ;;  %v1865_v37 = vld [vmem:[#allocation6 + $0x140] sm:$0xff] }
  0xec   : > { %1264 = vmatmul.mubr.bf16.gmra.mrb[20].mxu0 %v10105_v14  ;;  %1540 = vmatprep.subr.bf16.mxu1 %v8092_v42  ;;  %v1850_v42 = vld [vmem:[#allocation6 + $0xc8] sm:$0xff]  ;;  %v8194_v45 = vcombine.high %v1865_v37, %v1869_v39  ;;  %v8193_v52 = vcombine.low %v1865_v37, %v1869_v39  ;;  %v1917_v37 = vld [vmem:[#allocation6 + $0x2e0] sm:$0xff] }
  0xed   : > { %8124 = vmatprep.mubr.msk.bf16.mxu0 %vm1131_vm0, %v10109_v17  ;;  %1428 = vmatpush1.bf16.msra.mxu0 %v8089_v24 }
  0xee   : > { %1429 = vmatprep.subr.bf16.mxu0 %v8098_v27  ;;  %1377 = vmatmul.mubr.bf16.gmra.mrb[20].mxu1 %v10105_v14  ;;  %v1857_v27 = vld [vmem:[#allocation6 + $0x100] sm:$0xff] }
  0xef   : > { %8133 = vmatprep.mubr.msk.bf16.mxu1 %vm1131_vm0, %v10109_v17  ;;  %1541 = vmatpush1.bf16.msra.mxu1 %v8091_v48  ;;  %v8186_v33 = vcombine.high %v1857_v27, %v1861_v28  ;;  %v8185_v44 = vcombine.low %v1857_v27, %v1861_v28  ;;  %v1909_v27 = vld [vmem:[#allocation6 + $0x2a0] sm:$0xff] }
  0xf0   : > { %1542 = vmatprep.subr.bf16.mxu1 %v8100_v50  ;;  %v1862_v50 = vld [vmem:[#allocation6 + $0x128] sm:$0xff] }
  0xf1   : > { %1430 = vmatpush1.bf16.msra.mxu0 %v8097_v32  ;;  %v8177_v32 = vcombine.low %v1849_v18, %v1853_v19  ;;  %v10174_v18 = vld [vmem:[#allocation6 + $0x428] sm:$0xff] }
  0xf2   : > { %1431 = vmatprep.subr.bf16.mxu0 %v8106_v35  ;;  %v8163_v35 = vcombine.low %v1834_v21, %v1838_v23  ;;  %v1886_v19 = vld [vmem:[#allocation6 + $0x1e8] sm:$0xff] }
  0xf3   : > { %1543 = vmatpush1.bf16.msra.mxu1 %v8099_v56  ;;  %v1885_v56 = vld [vmem:[#allocation6 + $0x1e0] sm:$0xff] }
  0xf4   : > { %1274 = vmatmul.mubr.bf16.gmra.mrb[24].mxu0 %v10117_v34  ;;  %1544 = vmatprep.subr.bf16.mxu1 %v8108_v59 }
  0xf5   : > { %8125 = vmatprep.mubr.msk.bf16.mxu0 %vm1131_vm0, %v10121_v36  ;;  %1432 = vmatpush1.bf16.msra.mxu0 %v8105_v43  ;;  %v1854_v43 = vld [vmem:[#allocation6 + $0xe8] sm:$0xff] }
  0xf6   : > { %8135 = vmatprep.subr.msk.bf16.mxu0 %vm1156_vm1, %v8114_v46  ;;  %1387 = vmatmul.mubr.bf16.gmra.mrb[24].mxu1 %v10117_v34  ;;  %v8171_v46 = vcombine.low %v1842_v30, %v1846_v31  ;;  %v8180_v48 = vcombine.high %v1850_v42, %v1854_v43  ;;  %v1894_v30 = vld [vmem:[#allocation6 + $0x228] sm:$0xff] }
  0xf7   : > { %8134 = vmatprep.mubr.msk.bf16.mxu1 %vm1131_vm0, %v10121_v36  ;;  %1545 = vmatpush1.bf16.msra.mxu1 %v8107_v62  ;;  %v1870_v62 = vld [vmem:[#allocation6 + $0x168] sm:$0xff] }
  0xf8   : > { %8144 = vmatprep.subr.msk.bf16.mxu1 %vm1156_vm1, %v8116_v63  ;;  %v8196_v4 = vcombine.high %v1866_v61, %v1870_v62 }
  0xf9   : > { %1434 = vmatpush1.bf16.msra.mxu0 %v1170_v54  ;;  %v8179_v54 = vcombine.low %v1850_v42, %v1854_v43  ;;  %v1902_v42 = vld [vmem:[#allocation6 + $0x268] sm:$0xff] }
  0xfa   : > { %4939 = vmatprep.subr.bf16.mxu0 %v8154_v55  ;;  %v1881_v55 = vld [vmem:[#allocation6 + $0x1c0] sm:$0xff] }
  0xfb   : > { %1547 = vmatpush1.bf16.msra.mxu1 %v1176_v7  ;;  %v8210_v0 = vcombine.high %v1881_v55, %v1885_v56  ;;  %v8209_v7 = vcombine.low %v1881_v55, %v1885_v56  ;;  %v1914_v55 = vld [vmem:[#allocation6 + $0x2c8] sm:$0xff] }
  0xfc   : > { %1284 = vmatmul.mubr.bf16.gmra.mrb[28].mxu0 %v10134_v57  ;;  %5391 = vmatprep.subr.bf16.mxu1 %v8156_v8  ;;  %v1918_v56 = vld [vmem:[#allocation6 + $0x2e8] sm:$0xff] }
  0xfd   : > { %8136 = vmatprep.mubr.msk.bf16.mxu0 %vm1131_vm0, %v10040_v16  ;;  %v1841_v16 = vld [vmem:[#allocation6 + $0x80] sm:$0xff] }
  0xfe   : > { %1397 = vmatmul.mubr.bf16.gmra.mrb[28].mxu1 %v10134_v57  ;;  %v8170_v13 = vcombine.high %v1841_v16, %v1845_v11  ;;  %v8169_v24 = vcombine.low %v1841_v16, %v1845_v11  ;;  %v8195_v16 = vcombine.low %v1866_v61, %v1870_v62  ;;  %v10168_v11 = vld [vmem:[#allocation6 + $0x400] sm:$0xff] }
  0xff   : > { %8145 = vmatprep.mubr.msk.bf16.mxu1 %vm1131_vm0, %v9658_v15 }
 0x104   : > { %1440 = vmatmul.mubr.bf16.vlgmr.msra.gmra.mrb[32].mxu0 %v10049_v49 }
 0x105   : > { %8137 = vmatprep.mubr.msk.bf16.mxu0 %vm1131_vm0, %v10052_v51  ;;  %4940 = vmatpush1.bf16.msra.mxu0 %v8153_v9  ;;  %v1897_v9 = vld [vmem:[#allocation6 + $0x240] sm:$0xff] }
 0x106   : > { %4941 = vmatprep.subr.bf16.mxu0 %v8162_v10  ;;  %1553 = vmatmul.mubr.bf16.vlgmr.msra.gmra.mrb[32].mxu1 %v10049_v49  ;;  %v1873_v49 = vld [vmem:[#allocation6 + $0x180] sm:$0xff] }
 0x107   : > { %5392 = vmatpush1.bf16.msra.mxu1 %v8155_v26  ;;  %8146 = vmatprep.mubr.msk.bf16.mxu1 %vm1131_vm0, %v10052_v51  ;;  %v1858_v51 = vld [vmem:[#allocation6 + $0x108] sm:$0xff]  ;;  %v8202_v53 = vcombine.high %v1873_v49, %v1877_v47  ;;  %v8201_v63 = vcombine.low %v1873_v49, %v1877_v47  ;;  %v1901_v10 = vld [vmem:[#allocation6 + $0x260] sm:$0xff] }
 0x108   : > { %5393 = vmatprep.subr.bf16.mxu1 %v8164_v29  ;;  %v8188_v59 = vcombine.high %v1858_v51, %v1862_v50  ;;  %v8187_v1 = vcombine.low %v1858_v51, %v1862_v50  ;;  %v1905_v26 = vld [vmem:[#allocation6 + $0x280] sm:$0xff]  ;;  %v1890_v29 = vld [vmem:[#allocation6 + $0x208] sm:$0xff]  ;;  %v8225_v31 = vcombine.low %v1897_v9, %v1901_v10 }
 0x109   : > { %4942 = vmatpush1.bf16.msra.mxu0 %v8161_v12  ;;  %v10170_v12 = vld [vmem:[#allocation6 + $0x420] sm:$0xff]  ;;  %v8220_v39 = vcombine.high %v1890_v29, %v1894_v30  ;;  %v8233_v43 = vcombine.low %v1905_v26, %v1909_v27  ;;  %v1910_v47 = vld [vmem:[#allocation6 + $0x2a8] sm:$0xff] }
 0x10a   : > { %4943 = vmatprep.subr.bf16.mxu0 %v8170_v13  ;;  %v10172_v13 = vld [vmem:[#allocation6 + $0x408] sm:$0xff]  ;;  %v8281_v23 = vcombine.low %v10168_v11, %v10170_v12 }
 0x10b   : > { %5394 = vmatpush1.bf16.msra.mxu1 %v8163_v35  ;;  %v1913_v35 = vld [vmem:[#allocation6 + $0x2c0] sm:$0xff] }
 0x10c   : > { %1450 = vmatmul.mubr.bf16.gmra.mrb[36].mxu0 %v10058_v2  ;;  %5395 = vmatprep.subr.bf16.mxu1 %v8172_v41  ;;  %v1898_v41 = vld [vmem:[#allocation6 + $0x248] sm:$0xff] }
 0x10d   : > { %8138 = vmatprep.mubr.msk.bf16.mxu0 %vm1131_vm0, %v10063_v5  ;;  %4944 = vmatpush1.bf16.msra.mxu0 %v8169_v24  ;;  %v8226_v24 = vcombine.high %v1897_v9, %v1901_v10  ;;  %v8228_v49 = vcombine.high %v1898_v41, %v1902_v42  ;;  %v8227_v50 = vcombine.low %v1898_v41, %v1902_v42  ;;  %v1934_v9 = vld [vmem:[#allocation6 + $0x368] sm:$0xff] }
 0x10e   : > { %4945 = vmatprep.subr.bf16.mxu0 %v8178_v25  ;;  %1563 = vmatmul.mubr.bf16.gmra.mrb[36].mxu1 %v10058_v2  ;;  %v1889_v2 = vld [vmem:[#allocation6 + $0x200] sm:$0xff] }
 0x10f   : > { %5396 = vmatpush1.bf16.msra.mxu1 %v8171_v46  ;;  %8147 = vmatprep.mubr.msk.bf16.mxu1 %vm1131_vm0, %v10063_v5  ;;  %v1874_v5 = vld [vmem:[#allocation6 + $0x188] sm:$0xff]  ;;  %v8218_v8 = vcombine.high %v1889_v2, %v1893_v3  ;;  %v8217_v21 = vcombine.low %v1889_v2, %v1893_v3  ;;  %v1925_v46 = vld [vmem:[#allocation6 + $0x320] sm:$0xff] }
 0x110   : > { %5397 = vmatprep.subr.bf16.mxu1 %v8180_v48  ;;  %v8204_v15 = vcombine.high %v1874_v5, %v1878_v6  ;;  %v8203_v25 = vcombine.low %v1874_v5, %v1878_v6  ;;  %v8241_v48 = vcombine.low %v1913_v35, %v1917_v37  ;;  %v1945_v5 = vld [vmem:[#allocation6 + $0x3c0] sm:$0xff] }
 0x111   : > { %4946 = vmatpush1.bf16.msra.mxu0 %v8177_v32  ;;  %v8234_v32 = vcombine.high %v1905_v26, %v1909_v27  ;;  %v1949_v6 = vld [vmem:[#allocation6 + $0x3e0] sm:$0xff]  ;;  %v1946_v26 = vld [vmem:[#allocation6 + $0x3c8] sm:$0xff] }
 0x112   : > { %4947 = vmatprep.subr.bf16.mxu0 %v8186_v33  ;;  %v1950_v27 = vld [vmem:[#allocation6 + $0x3e8] sm:$0xff] }
 0x113   : > { %5398 = vmatpush1.bf16.msra.mxu1 %v8179_v54 }
 0x114   : > { %1460 = vmatmul.mubr.bf16.gmra.mrb[40].mxu0 %v10069_v20  ;;  %5399 = vmatprep.subr.bf16.mxu1 %v8188_v59 }
 0x115   : > { %8139 = vmatprep.mubr.msk.bf16.mxu0 %vm1131_vm0, %v10073_v22  ;;  %4948 = vmatpush1.bf16.msra.mxu0 %v8185_v44  ;;  %v8242_v44 = vcombine.high %v1913_v35, %v1917_v37 }
 0x116   : > { %4949 = vmatprep.subr.bf16.mxu0 %v8194_v45  ;;  %1573 = vmatmul.mubr.bf16.gmra.mrb[40].mxu1 %v10069_v20  ;;  %v1882_v20 = vld [vmem:[#allocation6 + $0x1c8] sm:$0xff]  ;;  %v8219_v45 = vcombine.low %v1890_v29, %v1894_v30  ;;  %v8276_v29 = vcombine.high %v1946_v26, %v1950_v27  ;;  %v8284_v30 = vcombine.high %v10172_v13, %v10174_v18 }
 0x117   : > { %5400 = vmatpush1.bf16.msra.mxu1 %v8187_v1  ;;  %8148 = vmatprep.mubr.msk.bf16.mxu1 %vm1131_vm0, %v10073_v22  ;;  %v8283_v22 = vcombine.low %v10172_v13, %v10174_v18  ;;  %v8212_v28 = vcombine.high %v1882_v20, %v1886_v19  ;;  %v8211_v33 = vcombine.low %v1882_v20, %v1886_v19  ;;  %v1926_v1 = vld [vmem:[#allocation6 + $0x328] sm:$0xff] }
 0x118   : > { %5401 = vmatprep.subr.bf16.mxu1 %v8196_v4  ;;  %v8243_v4 = vcombine.low %v1914_v55, %v1918_v56  ;;  %v1938_v20 = vld [vmem:[#allocation6 + $0x388] sm:$0xff] }
 0x119   : > { %4950 = vmatpush1.bf16.msra.mxu0 %v8193_v52  ;;  %v1929_v52 = vld [vmem:[#allocation6 + $0x340] sm:$0xff]  ;;  %v1942_v19 = vld [vmem:[#allocation6 + $0x3a8] sm:$0xff] }
 0x11a   : > { %4951 = vmatprep.subr.bf16.mxu0 %v8202_v53  ;;  %v1933_v53 = vld [vmem:[#allocation6 + $0x360] sm:$0xff] }
 0x11b   : > { %5402 = vmatpush1.bf16.msra.mxu1 %v8195_v16  ;;  %v8258_v61 = vcombine.high %v1929_v52, %v1933_v53  ;;  %v8257_v2 = vcombine.low %v1929_v52, %v1933_v53  ;;  %v8274_v16 = vcombine.high %v1945_v5, %v1949_v6  ;;  %v10233_v52 = vld [vmem:[#allocation6 + $0x448] sm:$0xff] }
 0x11c   : > { %1470 = vmatmul.mubr.bf16.gmra.mrb[44].mxu0 %v10081_v38  ;;  %5403 = vmatprep.subr.bf16.mxu1 %v8204_v15  ;;  %v10235_v53 = vld [vmem:[#allocation6 + $0x468] sm:$0xff] }
 0x11d   : > { %8140 = vmatprep.mubr.msk.bf16.mxu0 %vm1131_vm0, %v10085_v40  ;;  %4952 = vmatpush1.bf16.msra.mxu0 %v8201_v63  ;;  %v1941_v63 = vld [vmem:[#allocation6 + $0x3a0] sm:$0xff] }
 0x11e   : > { %4953 = vmatprep.subr.bf16.mxu0 %v8210_v0  ;;  %1583 = vmatmul.mubr.bf16.gmra.mrb[44].mxu1 %v10081_v38  ;;  %v1921_v38 = vld [vmem:[#allocation6 + $0x300] sm:$0xff]  ;;  %v8244_v0 = vcombine.high %v1914_v55, %v1918_v56 }
 0x11f   : > { %5404 = vmatpush1.bf16.msra.mxu1 %v8203_v25  ;;  %8149 = vmatprep.mubr.msk.bf16.mxu1 %vm1131_vm0, %v10085_v40  ;;  %v1906_v40 = vld [vmem:[#allocation6 + $0x288] sm:$0xff]  ;;  %v8250_v51 = vcombine.high %v1921_v38, %v1925_v46  ;;  %v8249_v59 = vcombine.low %v1921_v38, %v1925_v46  ;;  %v8268_v25 = vcombine.high %v1938_v20, %v1942_v19 }
 0x120   : > { %5405 = vmatprep.subr.bf16.mxu1 %v8212_v28  ;;  %v8236_v54 = vcombine.high %v1906_v40, %v1910_v47  ;;  %v8235_v62 = vcombine.low %v1906_v40, %v1910_v47  ;;  %v8267_v28 = vcombine.low %v1938_v20, %v1942_v19  ;;  %v10228_v40 = vld [vmem:[#allocation6 + $0x440] sm:$0xff]  ;;  %v10280_v20 = vld [vmem:[#allocation6 + $0x4e8] sm:$0xff] }
 0x121   : > { %4954 = vmatpush1.bf16.msra.mxu0 %v8209_v7  ;;  %v10230_v47 = vld [vmem:[#allocation6 + $0x460] sm:$0xff] }
 0x122   : > { %4955 = vmatprep.subr.bf16.mxu0 %v8218_v8  ;;  %v1930_v8 = vld [vmem:[#allocation6 + $0x348] sm:$0xff] }
 0x123   : > { %5406 = vmatpush1.bf16.msra.mxu1 %v8211_v33  ;;  %v10210_v33 = vld [vmem:[#allocation4] sm:$0xff] }
 0x124   : > { %1480 = vmatmul.mubr.bf16.gmra.mrb[48].mxu0 %v10093_v58  ;;  %5407 = vmatprep.subr.bf16.mxu1 %v8220_v39 }
 0x125   : > { %8141 = vmatprep.mubr.msk.bf16.mxu0 %vm1131_vm0, %v10097_v60  ;;  %4956 = vmatpush1.bf16.msra.mxu0 %v8217_v21  ;;  %v8282_v21 = vcombine.high %v10168_v11, %v10170_v12  ;;  %v10309_v11 = vld [vmem:[#allocation6 + $0x508] sm:$0xff] }
 0x126   : > { %4957 = vmatprep.subr.bf16.mxu0 %v8226_v24  ;;  %1593 = vmatmul.mubr.bf16.gmra.mrb[48].mxu1 %v10093_v58  ;;  %v1937_v58 = vld [vmem:[#allocation6 + $0x380] sm:$0xff]  ;;  %v8259_v24 = vcombine.low %v1930_v8, %v1934_v9  ;;  %v10311_v12 = vld [vmem:[#allocation6 + $0x528] sm:$0xff] }
 0x127   : > { %5408 = vmatpush1.bf16.msra.mxu1 %v8219_v45  ;;  %8150 = vmatprep.mubr.msk.bf16.mxu1 %vm1131_vm0, %v10097_v60  ;;  %v1922_v60 = vld [vmem:[#allocation6 + $0x308] sm:$0xff]  ;;  %v8266_v3 = vcombine.high %v1937_v58, %v1941_v63  ;;  %v8265_v10 = vcombine.low %v1937_v58, %v1941_v63  ;;  %v8289_v63 = vcombine.low %v10228_v40, %v10230_v47 }
 0x128   : > { %5409 = vmatprep.subr.bf16.mxu1 %v8228_v49  ;;  %v8252_v7 = vcombine.high %v1922_v60, %v1926_v1  ;;  %v8251_v15 = vcombine.low %v1922_v60, %v1926_v1  ;;  %v10251_v60 = vld [vmem:[#allocation6 + $0x4c0] sm:$0xff] }
 0x129   : > { %4958 = vmatpush1.bf16.msra.mxu0 %v8225_v31  ;;  %v10253_v1 = vld [vmem:[#allocation6 + $0x4e0] sm:$0xff] }
 0x12a   : > { %4959 = vmatprep.subr.bf16.mxu0 %v8234_v32 }
 0x12b   : > { %5410 = vmatpush1.bf16.msra.mxu1 %v8227_v50 }
 0x12c   : > { %1490 = vmatmul.mubr.bf16.gmra.mrb[52].mxu0 %v10105_v14  ;;  %5411 = vmatprep.subr.bf16.mxu1 %v8236_v54  ;;  %v10237_v54 = vld [vmem:[#allocation6 + $0x480] sm:$0xff] }
 0x12d   : > { %8142 = vmatprep.mubr.msk.bf16.mxu0 %vm1131_vm0, %v10109_v17  ;;  %4960 = vmatpush1.bf16.msra.mxu0 %v8233_v43 }
 0x12e   : > { %4961 = vmatprep.subr.bf16.mxu0 %v8242_v44  ;;  %1603 = vmatmul.mubr.bf16.gmra.mrb[52].mxu1 %v10105_v14  ;;  %v8260_v14 = vcombine.high %v1930_v8, %v1934_v9 }
 0x12f   : > { %5412 = vmatpush1.bf16.msra.mxu1 %v8235_v62  ;;  %8151 = vmatprep.mubr.msk.bf16.mxu1 %vm1131_vm0, %v10109_v17  ;;  %v8273_v17 = vcombine.low %v1945_v5, %v1949_v6  ;;  %v10243_v62 = vld [vmem:[#allocation6 + $0x4a8] sm:$0xff]  ;;  %v8291_v5 = vcombine.low %v10233_v52, %v10235_v53  ;;  %v8292_v6 = vcombine.high %v10233_v52, %v10235_v53  ;;  %v10321_v52 = vld [vmem:[#allocation6 + $0x540] sm:$0xff] }
 0x130   : > { %5413 = vmatprep.subr.bf16.mxu1 %v8244_v0  ;;  %v8290_v0 = vcombine.high %v10228_v40, %v10230_v47  ;;  %v10323_v53 = vld [vmem:[#allocation6 + $0x560] sm:$0xff] }
 0x131   : > { %4962 = vmatpush1.bf16.msra.mxu0 %v8241_v48 }
 0x132   : > { %4963 = vmatprep.subr.bf16.mxu0 %v8250_v51 }
 0x133   : > { %5414 = vmatpush1.bf16.msra.mxu1 %v8243_v4 }
 0x134   : > { %1500 = vmatmul.mubr.bf16.gmra.mrb[56].mxu0 %v10117_v34  ;;  %5415 = vmatprep.subr.bf16.mxu1 %v8252_v7 }
 0x135   : > { %8143 = vmatprep.mubr.msk.bf16.mxu0 %vm1131_vm0, %v10121_v36  ;;  %4964 = vmatpush1.bf16.msra.mxu0 %v8249_v59  ;;  %v10239_v59 = vld [vmem:[#allocation6 + $0x4a0] sm:$0xff] }
 0x136   : > { %4965 = vmatprep.subr.bf16.mxu0 %v8258_v61  ;;  %1613 = vmatmul.mubr.bf16.gmra.mrb[56].mxu1 %v10117_v34  ;;  %v8275_v34 = vcombine.low %v1946_v26, %v1950_v27  ;;  %v10241_v61 = vld [vmem:[#allocation6 + $0x488] sm:$0xff] }
 0x137   : > { %5416 = vmatpush1.bf16.msra.mxu1 %v8251_v15  ;;  %8152 = vmatprep.mubr.msk.bf16.mxu1 %vm1131_vm0, %v10121_v36  ;;  %v479_v36 = vlaneseq  ;;  %v8299_v15 = vcombine.low %v10241_v61, %v10243_v62 }
 0x138   : > { %5417 = vmatprep.subr.bf16.mxu1 %v8260_v14  ;;  %v10278_v14 = vld [vmem:[#allocation6 + $0x4c8] sm:$0xff] }
 0x139   : > { %4966 = vmatpush1.bf16.msra.mxu0 %v8257_v2  ;;  %v10207_v31 = vshrl.u32 %v479_v36, 7  ;;  %v8307_v36 = vcombine.low %v10278_v14, %v10280_v20 }
 0x13a   : > { %4967 = vmatprep.subr.bf16.mxu0 %v8266_v3 }
 0x13b   : > { %5418 = vmatpush1.bf16.msra.mxu1 %v8259_v24  ;;  %12060 = vst [vmem:[#allocation13_spill] sm:$0xff] %v10207_v31  ;;  %v11991_v32 = vsub.s32 0, %v10207_v31  ;;  %v11989_v35 = vsub.s32 1, %v10207_v31  ;;  %v11990_v46 = vsub.s32 2, %v10207_v31  ;;  %v11988_v48 = vsub.s32 3, %v10207_v31 }
 0x13c   : > { %1510 = vmatmul.mubr.bf16.gmra.mrb[60].mxu0 %v10134_v57  ;;  %5419 = vmatprep.subr.bf16.mxu1 %v8268_v25  ;;  %v8306_v24 = vcombine.high %v10251_v60, %v10253_v1 }
 0x13d   : > { %4968 = vmatpush1.bf16.msra.mxu0 %v8265_v10  ;;  %v10221_v37 = vrot.slane %v10210_v33, %v11989_v35  ;;  %v10258_v2 = vrot.slane %v10210_v33, %v11990_v46  ;;  %v10269_v7 = vrot.slane %v10210_v33, %v11988_v48  ;;  %v8297_v10 = vcombine.low %v10237_v54, %v10239_v59 }
 0x13e   : > { %4969 = vmatprep.subr.bf16.mxu0 %v8274_v16  ;;  %1623 = vmatmul.mubr.bf16.gmra.mrb[60].mxu1 %v10134_v57  ;;  %v10216_v57 = vrot.slane %v10210_v33, %v11991_v32  ;;  %v8298_v16 = vcombine.high %v10237_v54, %v10239_v59  ;;  %v10370_v54 = vld [vmem:[#allocation6 + $0x588] sm:$0xff]  ;;  %v10524_v32 = vld [vmem:[#allocation6 + $0x6e0] sm:$0xff] }
 0x13f   : > { %5420 = vmatpush1.bf16.msra.mxu1 %v8267_v28  ;;  %v8305_v28 = vcombine.low %v10251_v60, %v10253_v1  ;;  %v10372_v59 = vld [vmem:[#allocation6 + $0x5a8] sm:$0xff] }
 0x140   : > { %5421 = vmatprep.subr.bf16.mxu1 %v8276_v29  ;;  %v8332_v60 = vcombine.high %v10370_v54, %v10372_v59  ;;  %v10404_v1 = vld [vmem:[#allocation6 + $0x5c8] sm:$0xff] }
 0x141   : > { %4970 = vmatpush1.bf16.msra.mxu0 %v8273_v17 }
 0x142   : > { %5052 = vmatprep.subr.bf16.mxu0 %v8282_v21  ;;  %v8300_v21 = vcombine.high %v10241_v61, %v10243_v62 }
 0x143   : > { %5422 = vmatpush1.bf16.msra.mxu1 %v8275_v34 }
 0x144   : > { %5504 = vmatprep.subr.bf16.mxu1 %v8284_v30 }
 0x197   : > { %v1215_v39 = vpop.f32.mrb[0].mxu0  ;;  %v1328_v25 = vpop.f32.mrb[0].mxu1 }
 0x198   : > { %v1216_v41 = vadd.f32 %v1215_v39, %v10216_v57  ;;  %v1217_v42 = vpop.f32.mrb[1].mxu0  ;;  %v1329_v29 = vadd.f32 %v1328_v25, %v10258_v2  ;;  %v1330_v34 = vpop.f32.mrb[1].mxu1  ;;  %v10304_v39 = vld [vmem:[#allocation6 + $0x500] sm:$0xff]  ;;  %v10334_v25 = vld [vmem:[#allocation6 + $0x548] sm:$0xff] }
 0x199   : > { %v1218_v43 = vadd.f32 %v1217_v42, %v10221_v37  ;;  %v1219_v44 = vpop.f32.mrb[2].mxu0  ;;  %v1331_v42 = vadd.f32 %v1330_v34, %v10269_v7 }
 0x19a   : > { %v1220_v45 = vadd.f32 %v1219_v44, %v10216_v57  ;;  %v1221_v38 = vpop.f32.mrb[3].mxu0  ;;  %v1633_v51 = vmax.f32 %v1216_v41, 0.0  ;;  %v10306_v41 = vld [vmem:[#allocation6 + $0x520] sm:$0xff]  ;;  %v1635_v13 = vmax.f32 %v1329_v29, 0.0 }
 0x19b   : > { %v1222_v49 = vadd.f32 %v1221_v38, %v10221_v37  ;;  %v1634_v55 = vmax.f32 %v1218_v43, 0.0  ;;  %v1332_v43 = vpop.f32.mrb[2].mxu1 }
 0x19c   : > { %v1641_v50 = vmax.f32 %v1220_v45, 0.0  ;;  %v1333_v18 = vadd.f32 %v1332_v43, %v10258_v2 }
 0x19d   : > { %v1642_v56 = vmax.f32 %v1222_v49, 0.0  ;;  %v1636_v49 = vmax.f32 %v1331_v42, 0.0  ;;  %v8321_v42 = vcombine.low %v10321_v52, %v10323_v53 }
 0x19e   : > { %v10245_v58 = vpack.c.bf16 %v1641_v50, %v1633_v51  ;;  %v8308_v51 = vcombine.high %v10278_v14, %v10280_v20  ;;  %v8314_v50 = vcombine.high %v10304_v39, %v10306_v41  ;;  %v10406_v14 = vld [vmem:[#allocation6 + $0x5e8] sm:$0xff] }
 0x19f   : > { %v10260_v3 = vpack.c.bf16 %v1642_v56, %v1634_v55  ;;  %v1225_v4 = vpop.f32.mrb[4].mxu0  ;;  %v1643_v55 = vmax.f32 %v1333_v18, 0.0  ;;  %v10362_v18 = vld [vmem:[#allocation6 + $0x580] sm:$0xff] }
 0x1a0   : > { %v1226_v8 = vadd.f32 %v1225_v4, %v10216_v57  ;;  %v1227_v9 = vpop.f32.mrb[5].mxu0  ;;  %v8313_v4 = vcombine.low %v10304_v39, %v10306_v41  ;;  %v10440_v39 = vld [vmem:[#allocation6 + $0x608] sm:$0xff] }
 0x1a1   : > { %v1228_v19 = vadd.f32 %v1227_v9, %v10221_v37  ;;  %v1229_v17 = vpop.f32.mrb[6].mxu0  ;;  %4971 = vmatprep.mubr.bf16.mxu0 %v10260_v3  ;;  %5423 = vmatprep.mubr.bf16.mxu1 %v10260_v3  ;;  %v10442_v41 = vld [vmem:[#allocation6 + $0x628] sm:$0xff] }
 0x1a2   : > { %v1230_v26 = vadd.f32 %v1229_v17, %v10216_v57  ;;  %v1231_v27 = vpop.f32.mrb[7].mxu0  ;;  %4972 = vmatmul.mubr.bf16.vlgmr.msra.gmra.mrb[64].mxu0 %v10245_v58  ;;  %5424 = vmatmul.mubr.bf16.vlgmr.msra.gmra.mrb[64].mxu1 %v10245_v58  ;;  %v1649_v44 = vmax.f32 %v1226_v8, 0.0  ;;  %v8316_v17 = vcombine.high %v10309_v11, %v10311_v12 }
 0x1a3   : > { %v1232_v30 = vadd.f32 %v1231_v27, %v10221_v37  ;;  %5053 = vmatpush1.bf16.msra.mxu0 %v8281_v23  ;;  %5505 = vmatpush1.bf16.msra.mxu1 %v8283_v22  ;;  %v1334_v23 = vpop.f32.mrb[3].mxu1  ;;  %v1650_v22 = vmax.f32 %v1228_v19, 0.0 }
 0x1a4   : > { %v1657_v45 = vmax.f32 %v1230_v26, 0.0  ;;  %5054 = vmatprep.subr.bf16.mxu0 %v8290_v0  ;;  %5506 = vmatprep.subr.bf16.mxu1 %v8292_v6  ;;  %v1335_v40 = vadd.f32 %v1334_v23, %v10269_v7  ;;  %v8315_v6 = vcombine.low %v10309_v11, %v10311_v12  ;;  %v1338_v29 = vpop.f32.mrb[4].mxu1  ;;  %v10364_v23 = vld [vmem:[#allocation6 + $0x5a0] sm:$0xff] }
 0x1a5   : > { %v1658_v38 = vmax.f32 %v1232_v30, 0.0  ;;  %v1339_v43 = vadd.f32 %v1338_v29, %v10258_v2 }
 0x1a6   : > { %v10315_v47 = vpack.c.bf16 %v1657_v45, %v1649_v44  ;;  %v1644_v8 = vmax.f32 %v1335_v40, 0.0  ;;  %v1340_v44 = vpop.f32.mrb[5].mxu1 }
 0x1a7   : > { %v10325_v56 = vpack.c.bf16 %v1658_v38, %v1650_v22  ;;  %5055 = vmatpush1.bf16.msra.mxu0 %v8289_v63  ;;  %v1235_v0 = vpop.f32.mrb[8].mxu0  ;;  %5507 = vmatpush1.bf16.msra.mxu1 %v8291_v5  ;;  %v10336_v63 = vld [vmem:[#allocation6 + $0x568] sm:$0xff]  ;;  %v10338_v5 = vpack.c.bf16 %v1643_v55, %v1635_v13  ;;  %v1341_v22 = vadd.f32 %v1340_v44, %v10269_v7  ;;  %v1342_v38 = vpop.f32.mrb[6].mxu1  ;;  %v1651_v61 = vmax.f32 %v1339_v43, 0.0 }
 0x1a8   : > { %v1236_v9 = vadd.f32 %v1235_v0, %v10216_v57  ;;  %v1237_v19 = vpop.f32.mrb[9].mxu0  ;;  %5056 = vmatprep.subr.bf16.mxu0 %v8298_v16  ;;  %5508 = vmatprep.subr.bf16.mxu1 %v8300_v21  ;;  %v8322_v16 = vcombine.high %v10321_v52, %v10323_v53  ;;  %v10345_v21 = vpack.c.bf16 %v1644_v8, %v1636_v49  ;;  %v10474_v53 = vld [vmem:[#allocation6 + $0x648] sm:$0xff] }
 0x1a9   : > { %12061 = vst [vmem:[#allocation14_spill] sm:$0xff] %v10338_v5  ;;  %v1238_v26 = vadd.f32 %v1237_v19, %v10221_v37  ;;  %v1239_v27 = vpop.f32.mrb[10].mxu0  ;;  %4981 = vmatprep.mubr.bf16.mxu0 %v10325_v56  ;;  %5433 = vmatprep.mubr.bf16.mxu1 %v10325_v56  ;;  %v8323_v13 = vcombine.low %v10334_v25, %v10336_v63  ;;  %v1652_v0 = vmax.f32 %v1341_v22, 0.0 }
 0x1aa   : > { %12062 = vst [vmem:[#allocation15_spill] sm:$0xff] %v10345_v21  ;;  %v1240_v34 = vadd.f32 %v1239_v27, %v10216_v57  ;;  %v1241_v30 = vpop.f32.mrb[11].mxu0  ;;  %4982 = vmatmul.mubr.bf16.gmra.mrb[68].mxu0 %v10315_v47  ;;  %5434 = vmatmul.mubr.bf16.gmra.mrb[68].mxu1 %v10315_v47  ;;  %v1665_v49 = vmax.f32 %v1236_v9, 0.0  ;;  %v1343_v62 = vadd.f32 %v1342_v38, %v10258_v2  ;;  %v10384_v27 = vld [vmem:[#allocation6 + $0x5e0] sm:$0xff] }
 0x1ab   : > { %v1242_v45 = vadd.f32 %v1241_v30, %v10221_v37  ;;  %5057 = vmatpush1.bf16.msra.mxu0 %v8297_v10  ;;  %5509 = vmatpush1.bf16.msra.mxu1 %v8299_v15  ;;  %v1344_v10 = vpop.f32.mrb[7].mxu1  ;;  %v1666_v15 = vmax.f32 %v1238_v26, 0.0  ;;  %v8324_v19 = vcombine.high %v10334_v25, %v10336_v63  ;;  %v8329_v30 = vcombine.low %v10362_v18, %v10364_v23  ;;  %v10476_v25 = vld [vmem:[#allocation6 + $0x668] sm:$0xff] }
 0x1ac   : > { %v1673_v40 = vmax.f32 %v1240_v34, 0.0  ;;  %5058 = vmatprep.subr.bf16.mxu0 %v8306_v24  ;;  %5510 = vmatprep.subr.bf16.mxu1 %v8308_v51  ;;  %v1345_v8 = vadd.f32 %v1344_v10, %v10269_v7  ;;  %v8330_v24 = vcombine.high %v10362_v18, %v10364_v23  ;;  %v10382_v51 = vld [vmem:[#allocation6 + $0x5c0] sm:$0xff]  ;;  %v1659_v29 = vmax.f32 %v1343_v62, 0.0  ;;  %v1348_v38 = vpop.f32.mrb[8].mxu1  ;;  %v10510_v18 = vld [vmem:[#allocation6 + $0x688] sm:$0xff] }
 0x1ad   : > { %v1674_v55 = vmax.f32 %v1242_v45, 0.0  ;;  %v8331_v43 = vcombine.low %v10370_v54, %v10372_v59  ;;  %v1349_v62 = vadd.f32 %v1348_v38, %v10258_v2  ;;  %v1350_v10 = vpop.f32.mrb[9].mxu1  ;;  %v8348_v52 = vcombine.high %v10440_v39, %v10442_v41  ;;  %v10512_v23 = vld [vmem:[#allocation6 + $0x6a8] sm:$0xff] }
 0x1ae   : > { %v10376_v9 = vpack.c.bf16 %v1673_v40, %v1665_v49  ;;  %v1660_v44 = vmax.f32 %v1345_v8, 0.0  ;;  %v10408_v20 = vpack.c.bf16 %v1659_v29, %v1651_v61  ;;  %v8337_v61 = vcombine.low %v10382_v51, %v10384_v27  ;;  %v10434_v8 = vld [vmem:[#allocation6 + $0x620] sm:$0xff] }
 0x1af   : > { %v10386_v34 = vpack.c.bf16 %v1674_v55, %v1666_v15  ;;  %5059 = vmatpush1.bf16.msra.mxu0 %v8305_v28  ;;  %v1245_v26 = vpop.f32.mrb[12].mxu0  ;;  %5511 = vmatpush1.bf16.msra.mxu1 %v8307_v36  ;;  %v8339_v55 = vcombine.low %v10404_v1, %v10406_v14  ;;  %v1351_v29 = vadd.f32 %v1350_v10, %v10269_v7  ;;  %v1667_v11 = vmax.f32 %v1349_v62, 0.0  ;;  %v10454_v10 = vld [vmem:[#allocation6 + $0x660] sm:$0xff] }
 0x1b0   : > { %12063 = vst [vmem:[#allocation16_spill] sm:$0xff] %v10376_v9  ;;  %v1246_v45 = vadd.f32 %v1245_v26, %v10216_v57  ;;  %v1247_v22 = vpop.f32.mrb[13].mxu0  ;;  %5060 = vmatprep.subr.bf16.mxu0 %v8314_v50  ;;  %5512 = vmatprep.subr.bf16.mxu1 %v8316_v17  ;;  %12065 = vst [vmem:[#allocation18_spill] sm:$0xff] %v10408_v20  ;;  %v8338_v50 = vcombine.high %v10382_v51, %v10384_v27  ;;  %v1352_v26 = vpop.f32.mrb[10].mxu1  ;;  %v10544_v27 = vld [vmem:[#allocation6 + $0x6c8] sm:$0xff] }
 0x1b1   : > { %12064 = vst [vmem:[#allocation17_spill] sm:$0xff] %v10386_v34  ;;  %v1248_v28 = vadd.f32 %v1247_v22, %v10221_v37  ;;  %v1249_v36 = vpop.f32.mrb[14].mxu0  ;;  %4991 = vmatprep.mubr.bf16.mxu0 %v10386_v34  ;;  %5443 = vmatprep.mubr.bf16.mxu1 %v10386_v34  ;;  %v10415_v17 = vpack.c.bf16 %v1660_v44, %v1652_v0  ;;  %v10432_v0 = vld [vmem:[#allocation6 + $0x600] sm:$0xff]  ;;  %v1668_v38 = vmax.f32 %v1351_v29, 0.0 }
 0x1b2   : > { %v1250_v49 = vadd.f32 %v1249_v36, %v10216_v57  ;;  %v1251_v40 = vpop.f32.mrb[15].mxu0  ;;  %4992 = vmatmul.mubr.bf16.gmra.mrb[72].mxu0 %v10376_v9  ;;  %5444 = vmatmul.mubr.bf16.gmra.mrb[72].mxu1 %v10376_v9  ;;  %v1681_v44 = vmax.f32 %v1246_v45, 0.0  ;;  %v1353_v12 = vadd.f32 %v1352_v26, %v10258_v2  ;;  %v8347_v29 = vcombine.low %v10440_v39, %v10442_v41  ;;  %v2213_v34 = vld [vmem:[#allocation6 + $0xc20] sm:$0xff] }
 0x1b3   : > { %12066 = vst [vmem:[#allocation19_spill] sm:$0xff] %v10415_v17  ;;  %v1252_v15 = vadd.f32 %v1251_v40, %v10221_v37  ;;  %5061 = vmatpush1.bf16.msra.mxu0 %v8313_v4  ;;  %5513 = vmatpush1.bf16.msra.mxu1 %v8315_v6  ;;  %v1354_v4 = vpop.f32.mrb[11].mxu1  ;;  %v1682_v6 = vmax.f32 %v1248_v28, 0.0  ;;  %v8364_v51 = vcombine.high %v10510_v18, %v10512_v23 }
 0x1b4   : > { %v1689_v22 = vmax.f32 %v1250_v49, 0.0  ;;  %5062 = vmatprep.subr.bf16.mxu0 %v8322_v16  ;;  %5514 = vmatprep.subr.bf16.mxu1 %v8324_v19  ;;  %v1355_v40 = vadd.f32 %v1354_v4, %v10269_v7  ;;  %v8340_v49 = vcombine.high %v10404_v1, %v10406_v14  ;;  %v8346_v16 = vcombine.high %v10432_v0, %v10434_v8  ;;  %v10452_v19 = vld [vmem:[#allocation6 + $0x640] sm:$0xff]  ;;  %v1358_v4 = vpop.f32.mrb[12].mxu1  ;;  %v10546_v1 = vld [vmem:[#allocation6 + $0x6e8] sm:$0xff] }
 0x1b5   : > { %v1690_v36 = vmax.f32 %v1252_v15, 0.0  ;;  %v1675_v62 = vmax.f32 %v1353_v12, 0.0  ;;  %v8345_v15 = vcombine.low %v10432_v0, %v10434_v8  ;;  %v10580_v0 = vld [vmem:[#allocation6 + $0x708] sm:$0xff] }
 0x1b6   : > { %v10446_v45 = vpack.c.bf16 %v1689_v22, %v1681_v44  ;;  %v1676_v44 = vmax.f32 %v1355_v40, 0.0  ;;  %v1359_v40 = vadd.f32 %v1358_v4, %v10258_v2  ;;  %v10582_v8 = vld [vmem:[#allocation6 + $0x728] sm:$0xff] }
 0x1b7   : > { %v10456_v26 = vpack.c.bf16 %v1690_v36, %v1682_v6  ;;  %5063 = vmatpush1.bf16.msra.mxu0 %v8321_v42  ;;  %v1255_v28 = vpop.f32.mrb[16].mxu0  ;;  %5515 = vmatpush1.bf16.msra.mxu1 %v8323_v13  ;;  %v10478_v63 = vpack.c.bf16 %v1675_v62, %v1667_v11  ;;  %v8353_v11 = vcombine.low %v10452_v19, %v10454_v10  ;;  %v1360_v62 = vpop.f32.mrb[13].mxu1 }
 0x1b8   : > { %12067 = vst [vmem:[#allocation20_spill] sm:$0xff] %v10446_v45  ;;  %v1256_v22 = vadd.f32 %v1255_v28, %v10216_v57  ;;  %v1257_v12 = vpop.f32.mrb[17].mxu0  ;;  %5064 = vmatprep.subr.bf16.mxu0 %v8330_v24  ;;  %5516 = vmatprep.subr.bf16.mxu1 %v8332_v60  ;;  %v8354_v24 = vcombine.high %v10452_v19, %v10454_v10  ;;  %v1362_v4 = vpop.f32.mrb[14].mxu1  ;;  %v1683_v54 = vmax.f32 %v1359_v40, 0.0  ;;  %v10614_v10 = vld [vmem:[#allocation6 + $0x748] sm:$0xff] }
 0x1b9   : > { %12068 = vst [vmem:[#allocation21_spill] sm:$0xff] %v10456_v26  ;;  %12069 = vst [vmem:[#allocation22_spill] sm:$0xff] %v10478_v63  ;;  %v1258_v42 = vadd.f32 %v1257_v12, %v10221_v37  ;;  %v1259_v13 = vpop.f32.mrb[18].mxu0  ;;  %5001 = vmatprep.mubr.bf16.mxu0 %v10456_v26  ;;  %5453 = vmatprep.mubr.bf16.mxu1 %v10456_v26  ;;  %v10485_v60 = vpack.c.bf16 %v1676_v44, %v1668_v38  ;;  %v10502_v44 = vld [vmem:[#allocation6 + $0x680] sm:$0xff] }
 0x1ba   : > { %v1260_v6 = vadd.f32 %v1259_v13, %v10216_v57  ;;  %v1261_v36 = vpop.f32.mrb[19].mxu0  ;;  %5002 = vmatmul.mubr.bf16.gmra.mrb[76].mxu0 %v10446_v45  ;;  %5454 = vmatmul.mubr.bf16.gmra.mrb[76].mxu1 %v10446_v45  ;;  %v8355_v38 = vcombine.low %v10474_v53, %v10476_v25  ;;  %v10504_v12 = vld [vmem:[#allocation6 + $0x6a0] sm:$0xff]  ;;  %v1361_v13 = vadd.f32 %v1360_v62, %v10269_v7  ;;  %v1697_v48 = vmax.f32 %v1256_v22, 0.0 }
 0x1bb   : > { %12070 = vst [vmem:[#allocation23_spill] sm:$0xff] %v10485_v60  ;;  %v1262_v28 = vadd.f32 %v1261_v36, %v10221_v37  ;;  %5065 = vmatpush1.bf16.msra.mxu0 %v8329_v30  ;;  %5517 = vmatpush1.bf16.msra.mxu1 %v8331_v43  ;;  %v1363_v59 = vadd.f32 %v1362_v4, %v10258_v2  ;;  %v1364_v30 = vpop.f32.mrb[15].mxu1  ;;  %v1698_v43 = vmax.f32 %v1258_v42, 0.0 }
 0x1bc   : > { %v1705_v36 = vmax.f32 %v1260_v6, 0.0  ;;  %5066 = vmatprep.subr.bf16.mxu0 %v8338_v50  ;;  %5518 = vmatprep.subr.bf16.mxu1 %v8340_v49  ;;  %v1684_v46 = vmax.f32 %v1361_v13, 0.0  ;;  %v1365_v62 = vadd.f32 %v1364_v30, %v10269_v7  ;;  %v8356_v6 = vcombine.high %v10474_v53, %v10476_v25  ;;  %v10522_v49 = vld [vmem:[#allocation6 + $0x6c0] sm:$0xff]  ;;  %v10616_v53 = vld [vmem:[#allocation6 + $0x768] sm:$0xff] }
 0x1bd   : > { %v1706_v35 = vmax.f32 %v1262_v28, 0.0  ;;  %v8362_v50 = vcombine.high %v10502_v44, %v10504_v12  ;;  %v1691_v40 = vmax.f32 %v1363_v59, 0.0  ;;  %v1368_v59 = vpop.f32.mrb[16].mxu1  ;;  %v10594_v28 = vld [vmem:[#allocation6 + $0x760] sm:$0xff]  ;;  %v8380_v19 = vcombine.high %v10580_v0, %v10582_v8 }
 0x1be   : > { %v10516_v22 = vpack.c.bf16 %v1705_v36, %v1697_v48  ;;  %v8361_v48 = vcombine.low %v10502_v44, %v10504_v12  ;;  %v1692_v13 = vmax.f32 %v1365_v62, 0.0  ;;  %v1369_v62 = vadd.f32 %v1368_v59, %v10258_v2  ;;  %v10648_v44 = vld [vmem:[#allocation6 + $0x7a0] sm:$0xff] }
 0x1bf   : > { %v10526_v4 = vpack.c.bf16 %v1706_v35, %v1698_v43  ;;  %5067 = vmatpush1.bf16.msra.mxu0 %v8337_v61  ;;  %v1265_v42 = vpop.f32.mrb[20].mxu0  ;;  %5519 = vmatpush1.bf16.msra.mxu1 %v8339_v55  ;;  %v10548_v14 = vpack.c.bf16 %v1691_v40, %v1683_v54  ;;  %v1370_v40 = vpop.f32.mrb[17].mxu1 }
 0x1c0   : > { %12071 = vst [vmem:[#allocation24_spill] sm:$0xff] %v10516_v22  ;;  %v1266_v36 = vadd.f32 %v1265_v42, %v10216_v57  ;;  %v1267_v35 = vpop.f32.mrb[21].mxu0  ;;  %5068 = vmatprep.subr.bf16.mxu0 %v8346_v16  ;;  %5520 = vmatprep.subr.bf16.mxu1 %v8348_v52  ;;  %v10555_v52 = vpack.c.bf16 %v1692_v13, %v1684_v46  ;;  %v10572_v13 = vld [vmem:[#allocation6 + $0x700] sm:$0xff]  ;;  %v1372_v59 = vpop.f32.mrb[18].mxu1  ;;  %v1699_v39 = vmax.f32 %v1369_v62, 0.0 }
 0x1c1   : > { %12072 = vst [vmem:[#allocation25_spill] sm:$0xff] %v10526_v4  ;;  %12073 = vst [vmem:[#allocation26_spill] sm:$0xff] %v10548_v14  ;;  %v1268_v61 = vadd.f32 %v1267_v35, %v10221_v37  ;;  %v1269_v55 = vpop.f32.mrb[22].mxu0  ;;  %5011 = vmatprep.mubr.bf16.mxu0 %v10526_v4  ;;  %5463 = vmatprep.mubr.bf16.mxu1 %v10526_v4  ;;  %v10574_v35 = vld [vmem:[#allocation6 + $0x720] sm:$0xff]  ;;  %v1373_v41 = vadd.f32 %v1372_v59, %v10258_v2 }
 0x1c2   : > { %12074 = vst [vmem:[#allocation27_spill] sm:$0xff] %v10555_v52  ;;  %v1270_v30 = vadd.f32 %v1269_v55, %v10216_v57  ;;  %v1271_v43 = vpop.f32.mrb[23].mxu0  ;;  %5012 = vmatmul.mubr.bf16.gmra.mrb[80].mxu0 %v10516_v22  ;;  %5464 = vmatmul.mubr.bf16.gmra.mrb[80].mxu1 %v10516_v22  ;;  %v1371_v55 = vadd.f32 %v1370_v40, %v10269_v7  ;;  %v1713_v54 = vmax.f32 %v1266_v36, 0.0 }
 0x1c3   : > { %v1272_v42 = vadd.f32 %v1271_v43, %v10221_v37  ;;  %5069 = vmatpush1.bf16.msra.mxu0 %v8345_v15  ;;  %5521 = vmatpush1.bf16.msra.mxu1 %v8347_v29  ;;  %v1374_v15 = vpop.f32.mrb[19].mxu1  ;;  %v1714_v29 = vmax.f32 %v1268_v61, 0.0  ;;  %v1707_v62 = vmax.f32 %v1373_v41, 0.0 }
 0x1c4   : > { %v1721_v43 = vmax.f32 %v1270_v30, 0.0  ;;  %5070 = vmatprep.subr.bf16.mxu0 %v8354_v24  ;;  %5522 = vmatprep.subr.bf16.mxu1 %v8356_v6  ;;  %v1700_v16 = vmax.f32 %v1371_v55, 0.0  ;;  %v1375_v40 = vadd.f32 %v1374_v15, %v10269_v7  ;;  %v8372_v30 = vcombine.high %v10544_v27, %v10546_v1  ;;  %v10592_v6 = vld [vmem:[#allocation6 + $0x740] sm:$0xff]  ;;  %v1378_v41 = vpop.f32.mrb[20].mxu1 }
 0x1c5   : > { %v1722_v46 = vmax.f32 %v1272_v42, 0.0  ;;  %v8378_v24 = vcombine.high %v10572_v13, %v10574_v35  ;;  %v10618_v25 = vpack.c.bf16 %v1707_v62, %v1699_v39  ;;  %v1380_v62 = vpop.f32.mrb[21].mxu1 }
 0x1c6   : > { %v10586_v36 = vpack.c.bf16 %v1721_v43, %v1713_v54  ;;  %v1708_v55 = vmax.f32 %v1375_v40, 0.0  ;;  %v1379_v40 = vadd.f32 %v1378_v41, %v10258_v2  ;;  %v12080_v41 = vcombine.high %v10522_v49, %v10524_v32 }
 0x1c7   : > { %v10596_v59 = vpack.c.bf16 %v1722_v46, %v1714_v29  ;;  %5071 = vmatpush1.bf16.msra.mxu0 %v8353_v11  ;;  %v1275_v61 = vpop.f32.mrb[24].mxu0  ;;  %5523 = vmatpush1.bf16.msra.mxu1 %v8355_v38  ;;  %12077 = vst [vmem:[#allocation30_spill] sm:$0xff] %v10618_v25 }
 0x1c8   : > { %12075 = vst [vmem:[#allocation28_spill] sm:$0xff] %v10586_v36  ;;  %v1276_v43 = vadd.f32 %v1275_v61, %v10216_v57  ;;  %v1277_v46 = vpop.f32.mrb[25].mxu0  ;;  %5072 = vmatprep.subr.bf16.mxu0 %v8362_v50  ;;  %5524 = vmatprep.subr.bf16.mxu1 %v8364_v51  ;;  %v10625_v51 = vpack.c.bf16 %v1708_v55, %v1700_v16  ;;  %v1715_v12 = vmax.f32 %v1379_v40, 0.0  ;;  %v11992_v40 = vsub.s32 4, %v10207_v31 }
 0x1c9   : > { %12076 = vst [vmem:[#allocation29_spill] sm:$0xff] %v10596_v59  ;;  %v1278_v11 = vadd.f32 %v1277_v46, %v10221_v37  ;;  %v1279_v38 = vpop.f32.mrb[26].mxu0  ;;  %5021 = vmatprep.mubr.bf16.mxu0 %v10596_v59  ;;  %5473 = vmatprep.mubr.bf16.mxu1 %v10596_v59  ;;  %v12079_v16 = vcombine.low %v10510_v18, %v10512_v23 }
 0x1ca   : > { %12078 = vst [vmem:[#allocation31_spill] sm:$0xff] %v10625_v51  ;;  %v1280_v15 = vadd.f32 %v1279_v38, %v10216_v57  ;;  %v1281_v29 = vpop.f32.mrb[27].mxu0  ;;  %5022 = vmatmul.mubr.bf16.gmra.mrb[84].mxu0 %v10586_v36  ;;  %5474 = vmatmul.mubr.bf16.gmra.mrb[84].mxu1 %v10586_v36  ;;  %v1381_v46 = vadd.f32 %v1380_v62, %v10269_v7  ;;  %v1382_v38 = vpop.f32.mrb[22].mxu1  ;;  %v1729_v39 = vmax.f32 %v1276_v43, 0.0 }
 0x1cb   : > { %v1282_v61 = vadd.f32 %v1281_v29, %v10221_v37  ;;  %5073 = vmatpush1.bf16.msra.mxu0 %v8361_v48  ;;  %5525 = vmatpush1.bf16.msra.mxu1 %v12079_v16  ;;  %v10646_v29 = vld [vmem:[#allocation6 + $0x780] sm:$0xff]  ;;  %v1383_v18 = vadd.f32 %v1382_v38, %v10258_v2  ;;  %v1384_v23 = vpop.f32.mrb[23].mxu1  ;;  %v1730_v48 = vmax.f32 %v1278_v11, 0.0  ;;  %v12083_v11 = vcombine.low %v10522_v49, %v10524_v32 }
 0x1cc   : > { %v1737_v50 = vmax.f32 %v1280_v15, 0.0  ;;  %5074 = vmatprep.subr.bf16.mxu0 %v12080_v41  ;;  %5526 = vmatprep.subr.bf16.mxu1 %v8372_v30  ;;  %v1716_v55 = vmax.f32 %v1381_v46, 0.0  ;;  %v1385_v62 = vadd.f32 %v1384_v23, %v10269_v7  ;;  %v8388_v15 = vcombine.high %v10614_v10, %v10616_v53  ;;  %v10656_v41 = vld [vmem:[#allocation6 + $0x788] sm:$0xff] }
 0x1cd   : > { %v1738_v16 = vmax.f32 %v1282_v61, 0.0  ;;  %v10658_v30 = vld [vmem:[#allocation6 + $0x7a8] sm:$0xff]  ;;  %v1723_v42 = vmax.f32 %v1383_v18, 0.0  ;;  %v11993_v38 = vsub.s32 5, %v10207_v31 }
 0x1ce   : > { %v10652_v43 = vpack.c.bf16 %v1737_v50, %v1729_v39  ;;  %v12084_v50 = vcombine.low %v10544_v27, %v10546_v1  ;;  %v8394_v39 = vcombine.high %v10646_v29, %v10648_v44  ;;  %v1724_v46 = vmax.f32 %v1385_v62, 0.0  ;;  %v1388_v62 = vpop.f32.mrb[24].mxu1 }
 0x1cf   : > { %v10661_v54 = vpack.c.bf16 %v1738_v16, %v1730_v48  ;;  %5075 = vmatpush1.bf16.msra.mxu0 %v12083_v11  ;;  %v1285_v61 = vpop.f32.mrb[28].mxu0  ;;  %v10678_v49 = vpack.c.bf16 %v1723_v42, %v1715_v12  ;;  %v8396_v48 = vcombine.high %v10656_v41, %v10658_v30  ;;  %v1389_v42 = vadd.f32 %v1388_v62, %v10258_v2  ;;  %v1390_v12 = vpop.f32.mrb[25].mxu1 }
 0x1d0   : > { %12081 = vst [vmem:[#allocation32_spill] sm:$0xff] %v10652_v43  ;;  %5527 = vmatpush1.bf16.msra.mxu1 %v12084_v50  ;;  %v1286_v18 = vadd.f32 %v1285_v61, %v10216_v57  ;;  %v1287_v23 = vpop.f32.mrb[29].mxu0  ;;  %5076 = vmatprep.subr.bf16.mxu0 %v8378_v24  ;;  %v10685_v16 = vpack.c.bf16 %v1724_v46, %v1716_v55  ;;  %v10703_v50 = vld [vmem:[#allocation6 + $0x7c0] sm:$0xff] }
 0x1d1   : > { %12082 = vst [vmem:[#allocation33_spill] sm:$0xff] %v10661_v54  ;;  %5528 = vmatprep.subr.bf16.mxu1 %v8380_v19  ;;  %12085 = vst [vmem:[#allocation34_spill] sm:$0xff] %v10678_v49  ;;  %v1288_v27 = vadd.f32 %v1287_v23, %v10221_v37  ;;  %v1289_v1 = vpop.f32.mrb[30].mxu0  ;;  %5031 = vmatprep.mubr.bf16.mxu0 %v10661_v54  ;;  %v10694_v11 = vrot.slane %v10210_v33, %v11992_v40  ;;  %v10705_v46 = vld [vmem:[#allocation6 + $0x7e0] sm:$0xff] }
 0x1d2   : > { %5483 = vmatprep.mubr.bf16.mxu1 %v10661_v54  ;;  %12086 = vst [vmem:[#allocation35_spill] sm:$0xff] %v10685_v16  ;;  %v1290_v24 = vadd.f32 %v1289_v1, %v10216_v57  ;;  %v1291_v19 = vpop.f32.mrb[31].mxu0  ;;  %5032 = vmatmul.mubr.bf16.gmra.mrb[88].mxu0 %v10652_v43  ;;  %v12087_v55 = vcombine.low %v10572_v13, %v10574_v35  ;;  %v1392_v1 = vpop.f32.mrb[26].mxu1  ;;  %v10716_v35 = vld [vmem:[#allocation6 + $0x7c8] sm:$0xff] }
 0x1d3   : > { %5484 = vmatmul.mubr.bf16.gmra.mrb[88].mxu1 %v10652_v43  ;;  %v1292_v61 = vadd.f32 %v1291_v19, %v10221_v37  ;;  %v12088_v57 = vcombine.low %v10580_v0, %v10582_v8  ;;  %v1391_v23 = vadd.f32 %v1390_v12, %v10269_v7  ;;  %v10711_v62 = vrot.slane %v10210_v33, %v11993_v38  ;;  %v10718_v0 = vld [vmem:[#allocation6 + $0x7e8] sm:$0xff]  ;;  %v10730_v43 = vld [vmem:[#allocation6 + $0x820] sm:$0xff] }
 0x1d4   : > { %5077 = vmatpush1.bf16.msra.mxu0 %v12087_v55  ;;  %v1745_v37 = vmax.f32 %v1286_v18, 0.0  ;;  %v1753_v19 = vmax.f32 %v1290_v24, 0.0  ;;  %v12089_v13 = vcombine.high %v10592_v6, %v10594_v28  ;;  %v1731_v8 = vmax.f32 %v1389_v42, 0.0  ;;  %v1394_v55 = vpop.f32.mrb[27].mxu1 }
 0x1d5   : > { %5529 = vmatpush1.bf16.msra.mxu1 %v12088_v57  ;;  %v1393_v12 = vadd.f32 %v1392_v1, %v10258_v2  ;;  %v1746_v57 = vmax.f32 %v1288_v27, 0.0  ;;  %v1754_v40 = vmax.f32 %v1292_v61, 0.0  ;;  %v1732_v32 = vmax.f32 %v1391_v23, 0.0 }
 0x1d6   : > { %5078 = vmatprep.subr.bf16.mxu0 %v12089_v13  ;;  %5530 = vmatprep.subr.bf16.mxu1 %v8388_v15  ;;  %v1395_v38 = vadd.f32 %v1394_v55, %v10269_v7  ;;  %v10722_v18 = vpack.c.bf16 %v1753_v19, %v1745_v37  ;;  %v8395_v24 = vcombine.low %v10656_v41, %v10658_v30  ;;  %v10728_v13 = vld [vmem:[#allocation6 + $0x800] sm:$0xff] }
 0x1d7   : > { %v8401_v15 = vcombine.low %v10703_v50, %v10705_v46  ;;  %v1739_v42 = vmax.f32 %v1393_v12, 0.0  ;;  %v10732_v1 = vpack.c.bf16 %v1754_v40, %v1746_v57  ;;  %v12092_v27 = vcombine.low %v10592_v6, %v10594_v28  ;;  %v1441_v37 = vpop.f32.mrb[32].mxu0 }
 0x1d8   : > { %12090 = vst [vmem:[#allocation36_spill] sm:$0xff] %v10722_v18  ;;  %v12093_v61 = vcombine.low %v10614_v10, %v10616_v53  ;;  %v8402_v41 = vcombine.high %v10703_v50, %v10705_v46  ;;  %v8403_v30 = vcombine.low %v10716_v35, %v10718_v0  ;;  %v1740_v23 = vmax.f32 %v1395_v38, 0.0  ;;  %v1443_v6 = vpop.f32.mrb[33].mxu0  ;;  %v10753_v53 = vld [vmem:[#allocation6 + $0x808] sm:$0xff] }
 0x1d9   : > { %12091 = vst [vmem:[#allocation37_spill] sm:$0xff] %v10732_v1  ;;  %5079 = vmatpush1.bf16.msra.mxu0 %v12092_v27  ;;  %v8404_v40 = vcombine.high %v10716_v35, %v10718_v0  ;;  %v10746_v19 = vpack.c.bf16 %v1739_v42, %v1731_v8  ;;  %v1442_v28 = vadd.f32 %v1441_v37, %v10694_v11  ;;  %v10755_v38 = vld [vmem:[#allocation6 + $0x828] sm:$0xff]  ;;  %v1445_v46 = vpop.f32.mrb[34].mxu0  ;;  %v11996_v57 = vsub.s32 6, %v10207_v31 }
 0x1da   : > { %5531 = vmatpush1.bf16.msra.mxu1 %v12093_v61  ;;  %5080 = vmatprep.subr.bf16.mxu0 %v8394_v39  ;;  %v8410_v10 = vcombine.high %v10728_v13, %v10730_v43  ;;  %v10757_v39 = vpack.c.bf16 %v1740_v23, %v1732_v32  ;;  %v1444_v50 = vadd.f32 %v1443_v6, %v10711_v62  ;;  %v1447_v55 = vpop.f32.mrb[35].mxu0 }
 0x1db   : > { %5532 = vmatprep.subr.bf16.mxu1 %v8396_v48  ;;  %12094 = vst [vmem:[#allocation38_spill] sm:$0xff] %v10746_v19  ;;  %5041 = vmatprep.mubr.bf16.mxu0 %v10732_v1  ;;  %v1398_v48 = vpop.f32.mrb[28].mxu1  ;;  %v1637_v8 = vmax.f32 %v1442_v28, 0.0  ;;  %v1446_v12 = vadd.f32 %v1445_v46, %v10694_v11  ;;  %v12096_v32 = vcombine.low %v10646_v29, %v10648_v44 }
 0x1dc   : > { %5493 = vmatprep.mubr.bf16.mxu1 %v10732_v1  ;;  %12095 = vst [vmem:[#allocation39_spill] sm:$0xff] %v10757_v39  ;;  %5042 = vmatmul.mubr.bf16.gmra.mrb[92].mxu0 %v10722_v18  ;;  %v1399_v35 = vadd.f32 %v1398_v48, %v10258_v2  ;;  %v1400_v0 = vpop.f32.mrb[29].mxu1  ;;  %v1638_v61 = vmax.f32 %v1444_v50, 0.0  ;;  %v1448_v23 = vadd.f32 %v1447_v55, %v10711_v62  ;;  %v10778_v50 = vld [vmem:[#allocation6 + $0x860] sm:$0xff] }
 0x1dd   : > { %5494 = vmatmul.mubr.bf16.gmra.mrb[92].mxu1 %v10722_v18  ;;  %5081 = vmatpush1.bf16.msra.mxu0 %v12096_v32  ;;  %v1401_v42 = vadd.f32 %v1400_v0, %v10269_v7  ;;  %v1402_v27 = vpop.f32.mrb[30].mxu1  ;;  %v8412_v28 = vcombine.high %v10753_v53, %v10755_v38  ;;  %v1645_v44 = vmax.f32 %v1446_v12, 0.0  ;;  %v8409_v55 = vcombine.low %v10728_v13, %v10730_v43  ;;  %v2090_v32 = vld [vmem:[#allocation6 + $0x848] sm:$0xff] }
 0x1de   : > { %5533 = vmatpush1.bf16.msra.mxu1 %v8395_v24  ;;  %5082 = vmatprep.subr.bf16.mxu0 %v8402_v41  ;;  %v1747_v6 = vmax.f32 %v1399_v35, 0.0  ;;  %v1403_v48 = vadd.f32 %v1402_v27, %v10258_v2  ;;  %v1404_v29 = vpop.f32.mrb[31].mxu1  ;;  %v10776_v24 = vld [vmem:[#allocation6 + $0x840] sm:$0xff]  ;;  %v1646_v0 = vmax.f32 %v1448_v23, 0.0  ;;  %v2094_v35 = vld [vmem:[#allocation6 + $0x868] sm:$0xff]  ;;  %v8411_v12 = vcombine.low %v10753_v53, %v10755_v38 }
 0x1df   : > { %5084 = vmatprep.mubr.bf16.mxu0 %v10345_v21  ;;  %5534 = vmatprep.subr.bf16.mxu1 %v8404_v40  ;;  %v1748_v46 = vmax.f32 %v1401_v42, 0.0  ;;  %v1405_v41 = vadd.f32 %v1404_v29, %v10269_v7  ;;  %v10783_v2 = vpack.c.bf16 %v1645_v44, %v1637_v8  ;;  %v10788_v40 = vrot.slane %v10210_v33, %v11996_v57  ;;  %v1451_v27 = vpop.f32.mrb[36].mxu0  ;;  %v10801_v23 = vld [vmem:[#allocation6 + $0x880] sm:$0xff] }
 0x1e0   : > { %5536 = vmatprep.mubr.bf16.mxu1 %v10345_v21  ;;  %v1755_v37 = vmax.f32 %v1403_v48, 0.0  ;;  %v10792_v42 = vpack.c.bf16 %v1646_v0, %v1638_v61  ;;  %v12098_v43 = vsub.s32 7, %v10207_v31  ;;  %v8418_v8 = vcombine.high %v10776_v24, %v10778_v50  ;;  %v1453_v38 = vpop.f32.mrb[37].mxu0  ;;  %v2110_v31 = vld [vmem:[#allocation6 + $0x8e8] sm:$0xff] }
 0x1e1   : > { %5083 = vmatpush1.bf16.msra.mxu0 %v8401_v15  ;;  %v1756_v7 = vmax.f32 %v1405_v41, 0.0  ;;  %v10803_v15 = vld [vmem:[#allocation6 + $0x8a0] sm:$0xff]  ;;  %v1452_v53 = vadd.f32 %v1451_v27, %v10694_v11  ;;  %v8417_v61 = vcombine.low %v10776_v24, %v10778_v50  ;;  %v8420_v48 = vcombine.high %v2090_v32, %v2094_v35  ;;  %v1455_v44 = vpop.f32.mrb[38].mxu0  ;;  %v1554_v41 = vpop.f32.mrb[32].mxu1 }
 0x1e2   : > { %5535 = vmatpush1.bf16.msra.mxu1 %v8403_v30  ;;  %12097 = vst [vmem:[#allocation40_spill] sm:$0xff] %v10792_v42  ;;  %v10797_v13 = vrot.slane %v10210_v33, %v12098_v43  ;;  %5165 = vmatprep.subr.bf16.mxu0 %v8410_v10  ;;  %v10805_v30 = vpack.c.bf16 %v1755_v37, %v1747_v6  ;;  %v10810_v33 = vld [vmem:[#allocation6 + $0x888] sm:$0xff]  ;;  %v1457_v24 = vpop.f32.mrb[39].mxu0  ;;  %v1556_v27 = vpop.f32.mrb[33].mxu1 }
 0x1e3   : > { %5617 = vmatprep.subr.bf16.mxu1 %v8412_v28  ;;  %v10812_v10 = vld [vmem:[#allocation6 + $0x8a8] sm:$0xff]  ;;  %v10814_v28 = vpack.c.bf16 %v1756_v7, %v1748_v46  ;;  %v1454_v29 = vadd.f32 %v1453_v38, %v10711_v62  ;;  %v8419_v37 = vcombine.low %v2090_v32, %v2094_v35  ;;  %v1653_v6 = vmax.f32 %v1452_v53, 0.0  ;;  %v1558_v57 = vpop.f32.mrb[34].mxu1 }
 0x1e4   : > { %5085 = vmatmul.mubr.bf16.vlgmr.msra.gmra.mrb[64].mxu0 %v10338_v5  ;;  %v1456_v0 = vadd.f32 %v1455_v44, %v10694_v11  ;;  %v1555_v50 = vadd.f32 %v1554_v41, %v10788_v40  ;;  %v8426_v46 = vcombine.high %v10801_v23, %v10803_v15  ;;  %v1458_v43 = vadd.f32 %v1457_v24, %v10711_v62  ;;  %v10832_v44 = vld [vmem:[#allocation6 + $0x8e0] sm:$0xff] }
 0x1e5   : > { %12099 = vst [vmem:[#allocation41_spill] sm:$0xff] %v10814_v28  ;;  %5537 = vmatmul.mubr.bf16.vlgmr.msra.gmra.mrb[64].mxu1 %v10338_v5  ;;  %5166 = vmatpush1.bf16.msra.mxu0 %v8409_v55  ;;  %v1654_v7 = vmax.f32 %v1454_v29, 0.0  ;;  %v1557_v38 = vadd.f32 %v1556_v27, %v10797_v13  ;;  %v8428_v32 = vcombine.high %v10810_v33, %v10812_v10  ;;  %v10830_v29 = vld [vmem:[#allocation6 + $0x8c0] sm:$0xff]  ;;  %v2106_v27 = vld [vmem:[#allocation6 + $0x8c8] sm:$0xff] }
 0x1e6   : > { %5618 = vmatpush1.bf16.msra.mxu1 %v8411_v12  ;;  %5167 = vmatprep.subr.bf16.mxu0 %v8418_v8  ;;  %v1661_v35 = vmax.f32 %v1456_v0, 0.0  ;;  %v1639_v53 = vmax.f32 %v1555_v50, 0.0  ;;  %v1559_v55 = vadd.f32 %v1558_v57, %v10788_v40  ;;  %v1560_v12 = vpop.f32.mrb[35].mxu1  ;;  %v1662_v41 = vmax.f32 %v1458_v43, 0.0 }
 0x1e7   : > { %5094 = vmatprep.mubr.bf16.mxu0 %v10415_v17  ;;  %5546 = vmatprep.mubr.bf16.mxu1 %v10415_v17  ;;  %v1640_v24 = vmax.f32 %v1557_v38, 0.0  ;;  %v1561_v8 = vadd.f32 %v1560_v12, %v10797_v13  ;;  %v8425_v57 = vcombine.low %v10801_v23, %v10803_v15  ;;  %v1461_v17 = vpop.f32.mrb[40].mxu0  ;;  %v8434_v38 = vcombine.high %v10830_v29, %v10832_v44  ;;  %v1564_v12 = vpop.f32.mrb[36].mxu1 }
 0x1e8   : > { %5619 = vmatprep.subr.bf16.mxu1 %v8420_v48  ;;  %v10835_v5 = vpack.c.bf16 %v1661_v35, %v1653_v6  ;;  %v1647_v0 = vmax.f32 %v1559_v55, 0.0  ;;  %v8427_v48 = vcombine.low %v10810_v33, %v10812_v10  ;;  %v10841_v50 = vpack.c.bf16 %v1662_v41, %v1654_v7  ;;  %v10845_v6 = vld [vmem:[#allocation6 + $0x900] sm:$0xff]  ;;  %v10854_v10 = vld [vmem:[#allocation6 + $0x908] sm:$0xff] }
 0x1e9   : > { %5168 = vmatpush1.bf16.msra.mxu0 %v8417_v61  ;;  %v1648_v43 = vmax.f32 %v1561_v8, 0.0  ;;  %v10847_v35 = vld [vmem:[#allocation6 + $0x920] sm:$0xff]  ;;  %v1462_v61 = vadd.f32 %v1461_v17, %v10694_v11  ;;  %v8433_v15 = vcombine.low %v10830_v29, %v10832_v44  ;;  %v8436_v33 = vcombine.high %v2106_v27, %v2110_v31  ;;  %v1566_v8 = vpop.f32.mrb[37].mxu1 }
 0x1ea   : > { %5620 = vmatpush1.bf16.msra.mxu1 %v8419_v37  ;;  %5169 = vmatprep.subr.bf16.mxu0 %v8426_v46  ;;  %v1463_v37 = vpop.f32.mrb[41].mxu0  ;;  %v10850_v23 = vpack.c.bf16 %v1647_v0, %v1639_v53  ;;  %v10856_v46 = vld [vmem:[#allocation6 + $0x928] sm:$0xff]  ;;  %v8435_v17 = vcombine.low %v2106_v27, %v2110_v31  ;;  %v1565_v44 = vadd.f32 %v1564_v12, %v10788_v40  ;;  %v1568_v21 = vpop.f32.mrb[38].mxu1 }
 0x1eb   : > { %5621 = vmatprep.subr.bf16.mxu1 %v8428_v32  ;;  %v1464_v7 = vadd.f32 %v1463_v37, %v10711_v62  ;;  %v1465_v32 = vpop.f32.mrb[42].mxu0  ;;  %v10859_v55 = vpack.c.bf16 %v1648_v43, %v1640_v24  ;;  %v1669_v53 = vmax.f32 %v1462_v61, 0.0  ;;  %v8442_v0 = vcombine.high %v10845_v6, %v10847_v35 }
 0x1ec   : > { %5095 = vmatmul.mubr.bf16.gmra.mrb[68].mxu0 %v10408_v20  ;;  %v1466_v41 = vadd.f32 %v1465_v32, %v10694_v11  ;;  %v1467_v29 = vpop.f32.mrb[43].mxu0  ;;  %v1567_v37 = vadd.f32 %v1566_v8, %v10797_v13  ;;  %v8444_v31 = vcombine.high %v10854_v10, %v10856_v46  ;;  %v1655_v61 = vmax.f32 %v1565_v44, 0.0  ;;  %v10876_v32 = vld [vmem:[#allocation6 + $0x960] sm:$0xff]  ;;  %v2122_v8 = vld [vmem:[#allocation6 + $0x948] sm:$0xff] }
 0x1ed   : > { %5547 = vmatmul.mubr.bf16.gmra.mrb[68].mxu1 %v10408_v20  ;;  %5170 = vmatpush1.bf16.msra.mxu0 %v8425_v57  ;;  %v1670_v24 = vmax.f32 %v1464_v7, 0.0  ;;  %v1468_v43 = vadd.f32 %v1467_v29, %v10711_v62  ;;  %v1569_v57 = vadd.f32 %v1568_v21, %v10788_v40  ;;  %v10874_v7 = vld [vmem:[#allocation6 + $0x940] sm:$0xff]  ;;  %v2126_v20 = vld [vmem:[#allocation6 + $0x968] sm:$0xff]  ;;  %v8441_v21 = vcombine.low %v10845_v6, %v10847_v35 }
 0x1ee   : > { %5622 = vmatpush1.bf16.msra.mxu1 %v8427_v48  ;;  %5171 = vmatprep.subr.bf16.mxu0 %v8434_v38  ;;  %v1677_v27 = vmax.f32 %v1466_v41, 0.0  ;;  %v1570_v48 = vpop.f32.mrb[39].mxu1  ;;  %v1656_v29 = vmax.f32 %v1567_v37, 0.0  ;;  %v8450_v37 = vcombine.high %v10874_v7, %v10876_v32  ;;  %v8449_v35 = vcombine.low %v10874_v7, %v10876_v32 }
 0x1ef   : > { %5104 = vmatprep.mubr.bf16.mxu0 %v10485_v60  ;;  %5556 = vmatprep.mubr.bf16.mxu1 %v10485_v60  ;;  %v1678_v12 = vmax.f32 %v1468_v43, 0.0  ;;  %v1571_v38 = vadd.f32 %v1570_v48, %v10797_v13  ;;  %v1663_v41 = vmax.f32 %v1569_v57, 0.0  ;;  %v1471_v60 = vpop.f32.mrb[44].mxu0  ;;  %v1574_v48 = vpop.f32.mrb[40].mxu1 }
 0x1f0   : > { %5623 = vmatprep.subr.bf16.mxu1 %v8436_v33  ;;  %v10879_v18 = vpack.c.bf16 %v1677_v27, %v1669_v53  ;;  %v8443_v33 = vcombine.low %v10854_v10, %v10856_v46  ;;  %v10889_v53 = vld [vmem:[#allocation6 + $0x980] sm:$0xff]  ;;  %v8452_v10 = vcombine.high %v2122_v8, %v2126_v20  ;;  %v10898_v46 = vld [vmem:[#allocation6 + $0x988] sm:$0xff]  ;;  %v1575_v32 = vadd.f32 %v1574_v48, %v10788_v40 }
 0x1f1   : > { %5172 = vmatpush1.bf16.msra.mxu0 %v8433_v15  ;;  %v10885_v44 = vpack.c.bf16 %v1678_v12, %v1670_v24  ;;  %v1664_v43 = vmax.f32 %v1571_v38, 0.0  ;;  %v10891_v27 = vld [vmem:[#allocation6 + $0x9a0] sm:$0xff]  ;;  %v1472_v15 = vadd.f32 %v1471_v60, %v10694_v11  ;;  %v10894_v6 = vpack.c.bf16 %v1663_v41, %v1655_v61  ;;  %v1576_v38 = vpop.f32.mrb[41].mxu1 }
 0x1f2   : > { %5624 = vmatpush1.bf16.msra.mxu1 %v8435_v17  ;;  %5173 = vmatprep.subr.bf16.mxu0 %v8442_v0  ;;  %v1473_v17 = vpop.f32.mrb[45].mxu0  ;;  %v10900_v0 = vld [vmem:[#allocation6 + $0x9a8] sm:$0xff]  ;;  %v8451_v60 = vcombine.low %v2122_v8, %v2126_v20  ;;  %v8458_v41 = vcombine.high %v10889_v53, %v10891_v27  ;;  %v1578_v1 = vpop.f32.mrb[42].mxu1 }
 0x1f3   : > { %5625 = vmatprep.subr.bf16.mxu1 %v8444_v31  ;;  %v1474_v24 = vadd.f32 %v1473_v17, %v10711_v62  ;;  %v1475_v31 = vpop.f32.mrb[46].mxu0  ;;  %v10903_v57 = vpack.c.bf16 %v1664_v43, %v1656_v29  ;;  %v1685_v61 = vmax.f32 %v1472_v15, 0.0  ;;  %v1577_v17 = vadd.f32 %v1576_v38, %v10797_v13  ;;  %v2138_v38 = vld [vmem:[#allocation6 + $0x9c8] sm:$0xff] }
 0x1f4   : > { %5105 = vmatmul.mubr.bf16.gmra.mrb[72].mxu0 %v10478_v63  ;;  %v1476_v12 = vadd.f32 %v1475_v31, %v10694_v11  ;;  %v1477_v7 = vpop.f32.mrb[47].mxu0  ;;  %v8460_v20 = vcombine.high %v10898_v46, %v10900_v0  ;;  %v1671_v15 = vmax.f32 %v1575_v32, 0.0  ;;  %v10920_v31 = vld [vmem:[#allocation6 + $0x9e0] sm:$0xff] }
 0x1f5   : > { %5557 = vmatmul.mubr.bf16.gmra.mrb[72].mxu1 %v10478_v63  ;;  %5174 = vmatpush1.bf16.msra.mxu0 %v8441_v21  ;;  %v1686_v29 = vmax.f32 %v1474_v24, 0.0  ;;  %v1478_v43 = vadd.f32 %v1477_v7, %v10711_v62  ;;  %v1579_v21 = vadd.f32 %v1578_v1, %v10788_v40  ;;  %v10918_v24 = vld [vmem:[#allocation6 + $0x9c0] sm:$0xff]  ;;  %v1672_v7 = vmax.f32 %v1577_v17, 0.0  ;;  %v2142_v63 = vld [vmem:[#allocation6 + $0x9e8] sm:$0xff] }
 0x1f6   : > { %5626 = vmatpush1.bf16.msra.mxu1 %v8443_v33  ;;  %5175 = vmatprep.subr.bf16.mxu0 %v8450_v37  ;;  %v1693_v8 = vmax.f32 %v1476_v12, 0.0  ;;  %v1580_v33 = vpop.f32.mrb[43].mxu1  ;;  %v8457_v1 = vcombine.low %v10889_v53, %v10891_v27  ;;  %v8466_v17 = vcombine.high %v10918_v24, %v10920_v31  ;;  %v8465_v27 = vcombine.low %v10918_v24, %v10920_v31 }
 0x1f7   : > { %5114 = vmatprep.mubr.bf16.mxu0 %v10555_v52  ;;  %5566 = vmatprep.mubr.bf16.mxu1 %v10555_v52  ;;  %v1694_v48 = vmax.f32 %v1478_v43, 0.0  ;;  %v1581_v37 = vadd.f32 %v1580_v33, %v10797_v13  ;;  %v1679_v12 = vmax.f32 %v1579_v21, 0.0  ;;  %v1481_v52 = vpop.f32.mrb[48].mxu0  ;;  %v1584_v33 = vpop.f32.mrb[44].mxu1 }
 0x1f8   : > { %5627 = vmatprep.subr.bf16.mxu1 %v8452_v10  ;;  %v10923_v54 = vpack.c.bf16 %v1693_v8, %v1685_v61  ;;  %v8459_v10 = vcombine.low %v10898_v46, %v10900_v0  ;;  %v10933_v61 = vld [vmem:[#allocation6 + $0xa00] sm:$0xff]  ;;  %v8468_v46 = vcombine.high %v2138_v38, %v2142_v63  ;;  %v10942_v0 = vld [vmem:[#allocation6 + $0xa08] sm:$0xff]  ;;  %v1585_v31 = vadd.f32 %v1584_v33, %v10788_v40 }
 0x1f9   : > { %5176 = vmatpush1.bf16.msra.mxu0 %v8449_v35  ;;  %v10929_v32 = vpack.c.bf16 %v1694_v48, %v1686_v29  ;;  %v1680_v43 = vmax.f32 %v1581_v37, 0.0  ;;  %v10935_v8 = vld [vmem:[#allocation6 + $0xa20] sm:$0xff]  ;;  %v1482_v35 = vadd.f32 %v1481_v52, %v10694_v11  ;;  %v10938_v53 = vpack.c.bf16 %v1679_v12, %v1671_v15  ;;  %v1586_v37 = vpop.f32.mrb[45].mxu1 }
 0x1fa   : > { %5628 = vmatpush1.bf16.msra.mxu1 %v8451_v60  ;;  %5177 = vmatprep.subr.bf16.mxu0 %v8458_v41  ;;  %v1483_v60 = vpop.f32.mrb[49].mxu0  ;;  %v10944_v41 = vld [vmem:[#allocation6 + $0xa28] sm:$0xff]  ;;  %v8467_v52 = vcombine.low %v2138_v38, %v2142_v63  ;;  %v8474_v12 = vcombine.high %v10933_v61, %v10935_v8  ;;  %v1588_v36 = vpop.f32.mrb[46].mxu1 }
 0x1fb   : > { %5629 = vmatprep.subr.bf16.mxu1 %v8460_v20  ;;  %v1484_v29 = vadd.f32 %v1483_v60, %v10711_v62  ;;  %v1485_v20 = vpop.f32.mrb[50].mxu0  ;;  %v10947_v21 = vpack.c.bf16 %v1680_v43, %v1672_v7  ;;  %v1701_v15 = vmax.f32 %v1482_v35, 0.0  ;;  %v1587_v60 = vadd.f32 %v1586_v37, %v10797_v13  ;;  %v2154_v37 = vld [vmem:[#allocation6 + $0xa48] sm:$0xff] }
 0x1fc   : > { %5115 = vmatmul.mubr.bf16.gmra.mrb[76].mxu0 %v10548_v14  ;;  %v1486_v48 = vadd.f32 %v1485_v20, %v10694_v11  ;;  %v1487_v24 = vpop.f32.mrb[51].mxu0  ;;  %v8476_v63 = vcombine.high %v10942_v0, %v10944_v41  ;;  %v1687_v35 = vmax.f32 %v1585_v31, 0.0  ;;  %v10964_v20 = vld [vmem:[#allocation6 + $0xa60] sm:$0xff] }
 0x1fd   : > { %5567 = vmatmul.mubr.bf16.gmra.mrb[76].mxu1 %v10548_v14  ;;  %5178 = vmatpush1.bf16.msra.mxu0 %v8457_v1  ;;  %v1702_v7 = vmax.f32 %v1484_v29, 0.0  ;;  %v1488_v43 = vadd.f32 %v1487_v24, %v10711_v62  ;;  %v1589_v1 = vadd.f32 %v1588_v36, %v10788_v40  ;;  %v10962_v29 = vld [vmem:[#allocation6 + $0xa40] sm:$0xff]  ;;  %v1688_v24 = vmax.f32 %v1587_v60, 0.0  ;;  %v2158_v14 = vld [vmem:[#allocation6 + $0xa68] sm:$0xff] }
 0x1fe   : > { %5630 = vmatpush1.bf16.msra.mxu1 %v8459_v10  ;;  %5179 = vmatprep.subr.bf16.mxu0 %v8466_v17  ;;  %v1709_v38 = vmax.f32 %v1486_v48, 0.0  ;;  %v1590_v10 = vpop.f32.mrb[47].mxu1  ;;  %v8473_v36 = vcombine.low %v10933_v61, %v10935_v8  ;;  %v8482_v60 = vcombine.high %v10962_v29, %v10964_v20  ;;  %v8481_v8 = vcombine.low %v10962_v29, %v10964_v20 }
 0x1ff   : > { %5124 = vmatprep.mubr.bf16.mxu0 %v10625_v51  ;;  %5576 = vmatprep.mubr.bf16.mxu1 %v10625_v51  ;;  %v1710_v33 = vmax.f32 %v1488_v43, 0.0  ;;  %v1591_v17 = vadd.f32 %v1590_v10, %v10797_v13  ;;  %v1695_v48 = vmax.f32 %v1589_v1, 0.0  ;;  %v1491_v51 = vpop.f32.mrb[52].mxu0  ;;  %v1594_v10 = vpop.f32.mrb[48].mxu1 }
 0x200   : > { %5631 = vmatprep.subr.bf16.mxu1 %v8468_v46  ;;  %v10967_v59 = vpack.c.bf16 %v1709_v38, %v1701_v15  ;;  %v8475_v46 = vcombine.low %v10942_v0, %v10944_v41  ;;  %v10977_v15 = vld [vmem:[#allocation6 + $0xa80] sm:$0xff]  ;;  %v8484_v0 = vcombine.high %v2154_v37, %v2158_v14  ;;  %v10986_v41 = vld [vmem:[#allocation6 + $0xa88] sm:$0xff]  ;;  %v1595_v20 = vadd.f32 %v1594_v10, %v10788_v40 }
 0x201   : > { %5180 = vmatpush1.bf16.msra.mxu0 %v8465_v27  ;;  %v10973_v31 = vpack.c.bf16 %v1710_v33, %v1702_v7  ;;  %v1696_v43 = vmax.f32 %v1591_v17, 0.0  ;;  %v10979_v38 = vld [vmem:[#allocation6 + $0xaa0] sm:$0xff]  ;;  %v1492_v27 = vadd.f32 %v1491_v51, %v10694_v11  ;;  %v10982_v61 = vpack.c.bf16 %v1695_v48, %v1687_v35  ;;  %v1596_v17 = vpop.f32.mrb[49].mxu1 }
 0x202   : > { %5632 = vmatpush1.bf16.msra.mxu1 %v8467_v52  ;;  %5181 = vmatprep.subr.bf16.mxu0 %v8474_v12  ;;  %v1493_v52 = vpop.f32.mrb[53].mxu0  ;;  %v10988_v12 = vld [vmem:[#allocation6 + $0xaa8] sm:$0xff]  ;;  %v8483_v51 = vcombine.low %v2154_v37, %v2158_v14  ;;  %v8490_v48 = vcombine.high %v10977_v15, %v10979_v38  ;;  %v1598_v22 = vpop.f32.mrb[50].mxu1 }
 0x203   : > { %5633 = vmatprep.subr.bf16.mxu1 %v8476_v63  ;;  %v1494_v7 = vadd.f32 %v1493_v52, %v10711_v62  ;;  %v1495_v63 = vpop.f32.mrb[54].mxu0  ;;  %v10991_v1 = vpack.c.bf16 %v1696_v43, %v1688_v24  ;;  %v1717_v35 = vmax.f32 %v1492_v27, 0.0  ;;  %v1597_v52 = vadd.f32 %v1596_v17, %v10797_v13  ;;  %v2170_v17 = vld [vmem:[#allocation6 + $0xac8] sm:$0xff] }
 0x204   : > { %5125 = vmatmul.mubr.bf16.gmra.mrb[80].mxu0 %v10618_v25  ;;  %v1496_v33 = vadd.f32 %v1495_v63, %v10694_v11  ;;  %v1497_v29 = vpop.f32.mrb[55].mxu0  ;;  %v8492_v14 = vcombine.high %v10986_v41, %v10988_v12  ;;  %v1703_v27 = vmax.f32 %v1595_v20, 0.0  ;;  %v11008_v63 = vld [vmem:[#allocation6 + $0xae0] sm:$0xff] }
 0x205   : > { %5577 = vmatmul.mubr.bf16.gmra.mrb[80].mxu1 %v10618_v25  ;;  %5182 = vmatpush1.bf16.msra.mxu0 %v8473_v36  ;;  %v1718_v24 = vmax.f32 %v1494_v7, 0.0  ;;  %v1498_v43 = vadd.f32 %v1497_v29, %v10711_v62  ;;  %v1599_v36 = vadd.f32 %v1598_v22, %v10788_v40  ;;  %v11006_v7 = vld [vmem:[#allocation6 + $0xac0] sm:$0xff]  ;;  %v1704_v29 = vmax.f32 %v1597_v52, 0.0  ;;  %v2174_v25 = vld [vmem:[#allocation6 + $0xae8] sm:$0xff] }
 0x206   : > { %5634 = vmatpush1.bf16.msra.mxu1 %v8475_v46  ;;  %5183 = vmatprep.subr.bf16.mxu0 %v8482_v60  ;;  %v1725_v37 = vmax.f32 %v1496_v33, 0.0  ;;  %v1600_v46 = vpop.f32.mrb[51].mxu1  ;;  %v8489_v22 = vcombine.low %v10977_v15, %v10979_v38  ;;  %v8498_v52 = vcombine.high %v11006_v7, %v11008_v63  ;;  %v8497_v38 = vcombine.low %v11006_v7, %v11008_v63 }
 0x207   : > { %5134 = vmatprep.mubr.bf16.mxu0 %v10685_v16  ;;  %5586 = vmatprep.mubr.bf16.mxu1 %v10685_v16  ;;  %v1726_v10 = vmax.f32 %v1498_v43, 0.0  ;;  %v1601_v60 = vadd.f32 %v1600_v46, %v10797_v13  ;;  %v1711_v33 = vmax.f32 %v1599_v36, 0.0  ;;  %v1501_v16 = vpop.f32.mrb[56].mxu0  ;;  %v1604_v46 = vpop.f32.mrb[52].mxu1 }
 0x208   : > { %5635 = vmatprep.subr.bf16.mxu1 %v8484_v0  ;;  %v11011_v4 = vpack.c.bf16 %v1725_v37, %v1717_v35  ;;  %v8491_v0 = vcombine.low %v10986_v41, %v10988_v12  ;;  %v11021_v35 = vld [vmem:[#allocation6 + $0xb00] sm:$0xff]  ;;  %v8500_v41 = vcombine.high %v2170_v17, %v2174_v25  ;;  %v11030_v12 = vld [vmem:[#allocation6 + $0xb08] sm:$0xff]  ;;  %v1605_v63 = vadd.f32 %v1604_v46, %v10788_v40 }
 0x209   : > { %5184 = vmatpush1.bf16.msra.mxu0 %v8481_v8  ;;  %v11017_v20 = vpack.c.bf16 %v1726_v10, %v1718_v24  ;;  %v1712_v43 = vmax.f32 %v1601_v60, 0.0  ;;  %v11023_v37 = vld [vmem:[#allocation6 + $0xb20] sm:$0xff]  ;;  %v1502_v8 = vadd.f32 %v1501_v16, %v10694_v11  ;;  %v11026_v15 = vpack.c.bf16 %v1711_v33, %v1703_v27  ;;  %v1606_v60 = vpop.f32.mrb[53].mxu1 }
 0x20a   : > { %5636 = vmatpush1.bf16.msra.mxu1 %v8483_v51  ;;  %5185 = vmatprep.subr.bf16.mxu0 %v8490_v48  ;;  %v1503_v51 = vpop.f32.mrb[57].mxu0  ;;  %v11032_v48 = vld [vmem:[#allocation6 + $0xb28] sm:$0xff]  ;;  %v8499_v16 = vcombine.low %v2170_v17, %v2174_v25  ;;  %v8506_v33 = vcombine.high %v11021_v35, %v11023_v37  ;;  %v1608_v45 = vpop.f32.mrb[54].mxu1 }
 0x20b   : > { %5637 = vmatprep.subr.bf16.mxu1 %v8492_v14  ;;  %v1504_v24 = vadd.f32 %v1503_v51, %v10711_v62  ;;  %v1505_v14 = vpop.f32.mrb[58].mxu0  ;;  %v11035_v36 = vpack.c.bf16 %v1712_v43, %v1704_v29  ;;  %v1733_v27 = vmax.f32 %v1502_v8, 0.0  ;;  %v1607_v51 = vadd.f32 %v1606_v60, %v10797_v13  ;;  %v2186_v60 = vld [vmem:[#allocation6 + $0xb48] sm:$0xff] }
 0x20c   : > { %5135 = vmatmul.mubr.bf16.gmra.mrb[84].mxu0 %v10678_v49  ;;  %v1506_v10 = vadd.f32 %v1505_v14, %v10694_v11  ;;  %v1507_v7 = vpop.f32.mrb[59].mxu0  ;;  %v8508_v25 = vcombine.high %v11030_v12, %v11032_v48  ;;  %v1719_v8 = vmax.f32 %v1605_v63, 0.0  ;;  %v11052_v14 = vld [vmem:[#allocation6 + $0xb60] sm:$0xff] }
 0x20d   : > { %5587 = vmatmul.mubr.bf16.gmra.mrb[84].mxu1 %v10678_v49  ;;  %5186 = vmatpush1.bf16.msra.mxu0 %v8489_v22  ;;  %v1734_v29 = vmax.f32 %v1504_v24, 0.0  ;;  %v1508_v43 = vadd.f32 %v1507_v7, %v10711_v62  ;;  %v1609_v22 = vadd.f32 %v1608_v45, %v10788_v40  ;;  %v11050_v24 = vld [vmem:[#allocation6 + $0xb40] sm:$0xff]  ;;  %v1720_v7 = vmax.f32 %v1607_v51, 0.0  ;;  %v2190_v49 = vld [vmem:[#allocation6 + $0xb68] sm:$0xff] }
 0x20e   : > { %5638 = vmatpush1.bf16.msra.mxu1 %v8491_v0  ;;  %5187 = vmatprep.subr.bf16.mxu0 %v8498_v52  ;;  %v1741_v17 = vmax.f32 %v1506_v10, 0.0  ;;  %v1610_v0 = vpop.f32.mrb[55].mxu1  ;;  %v8505_v45 = vcombine.low %v11021_v35, %v11023_v37  ;;  %v8514_v51 = vcombine.high %v11050_v24, %v11052_v14  ;;  %v8513_v37 = vcombine.low %v11050_v24, %v11052_v14 }
 0x20f   : > { %5144 = vmatprep.mubr.bf16.mxu0 %v10757_v39  ;;  %5596 = vmatprep.mubr.bf16.mxu1 %v10757_v39  ;;  %v1742_v46 = vmax.f32 %v1508_v43, 0.0  ;;  %v1611_v52 = vadd.f32 %v1610_v0, %v10797_v13  ;;  %v1727_v10 = vmax.f32 %v1609_v22, 0.0  ;;  %v1511_v39 = vpop.f32.mrb[60].mxu0  ;;  %v1614_v0 = vpop.f32.mrb[56].mxu1 }
 0x210   : > { %5639 = vmatprep.subr.bf16.mxu1 %v8500_v41  ;;  %v11055_v26 = vpack.c.bf16 %v1741_v17, %v1733_v27  ;;  %v8507_v41 = vcombine.low %v11030_v12, %v11032_v48  ;;  %v11065_v27 = vld [vmem:[#allocation6 + $0xb80] sm:$0xff]  ;;  %v8516_v12 = vcombine.high %v2186_v60, %v2190_v49  ;;  %v2194_v48 = vld [vmem:[#allocation6 + $0xb88] sm:$0xff]  ;;  %v1615_v24 = vadd.f32 %v1614_v0, %v10788_v40  ;;  %v1616_v14 = vpop.f32.mrb[57].mxu1 }
 0x211   : > { %5188 = vmatpush1.bf16.msra.mxu0 %v8497_v38  ;;  %v11061_v63 = vpack.c.bf16 %v1742_v46, %v1734_v29  ;;  %v1728_v43 = vmax.f32 %v1611_v52, 0.0  ;;  %v11067_v17 = vld [vmem:[#allocation6 + $0xba0] sm:$0xff]  ;;  %v1512_v38 = vadd.f32 %v1511_v39, %v10694_v11  ;;  %v11070_v35 = vpack.c.bf16 %v1727_v10, %v1719_v8  ;;  %v2198_v29 = vld [vmem:[#allocation6 + $0xba8] sm:$0xff]  ;;  %v1618_v9 = vpop.f32.mrb[58].mxu1 }
 0x212   : > { %5640 = vmatpush1.bf16.msra.mxu1 %v8499_v16  ;;  %5189 = vmatprep.subr.bf16.mxu0 %v8506_v33  ;;  %v1513_v16 = vpop.f32.mrb[61].mxu0  ;;  %v8515_v39 = vcombine.low %v2186_v60, %v2190_v49  ;;  %v8522_v10 = vcombine.high %v11065_v27, %v11067_v17  ;;  %v8524_v49 = vcombine.high %v2194_v48, %v2198_v29  ;;  %v1735_v60 = vmax.f32 %v1615_v24, 0.0 }
 0x213   : > { %5641 = vmatprep.subr.bf16.mxu1 %v8508_v25  ;;  %v1514_v33 = vadd.f32 %v1513_v16, %v10711_v62  ;;  %v1515_v25 = vpop.f32.mrb[62].mxu0  ;;  %v11075_v22 = vpack.c.bf16 %v1728_v43, %v1720_v7  ;;  %v1749_v46 = vmax.f32 %v1512_v38, 0.0  ;;  %v1617_v16 = vadd.f32 %v1616_v14, %v10797_v13  ;;  %v2206_v14 = vld [vmem:[#allocation6 + $0xbe8] sm:$0xff] }
 0x214   : > { %5145 = vmatmul.mubr.bf16.gmra.mrb[88].mxu0 %v10746_v19  ;;  %v1516_v8 = vadd.f32 %v1515_v25, %v10694_v11  ;;  %v1517_v52 = vpop.f32.mrb[63].mxu0  ;;  %v1619_v38 = vadd.f32 %v1618_v9, %v10788_v40  ;;  %v1620_v25 = vpop.f32.mrb[59].mxu1  ;;  %v8521_v9 = vcombine.low %v11065_v27, %v11067_v17 }
 0x215   : > { %5597 = vmatmul.mubr.bf16.gmra.mrb[88].mxu1 %v10746_v19  ;;  %5190 = vmatpush1.bf16.msra.mxu0 %v8505_v45  ;;  %v1750_v7 = vmax.f32 %v1514_v33, 0.0  ;;  %v1518_v43 = vadd.f32 %v1517_v52, %v10711_v62  ;;  %v2201_v45 = vld [vmem:[#allocation6 + $0xbc0] sm:$0xff]  ;;  %v1736_v0 = vmax.f32 %v1617_v16, 0.0  ;;  %v1621_v62 = vadd.f32 %v1620_v25, %v10797_v13  ;;  %v2202_v52 = vld [vmem:[#allocation6 + $0xbc8] sm:$0xff] }
 0x216   : > { %5642 = vmatpush1.bf16.msra.mxu1 %v8507_v41  ;;  %5191 = vmatprep.subr.bf16.mxu0 %v8514_v51  ;;  %v1757_v11 = vmax.f32 %v1516_v8, 0.0  ;;  %v2205_v41 = vld [vmem:[#allocation6 + $0xbe0] sm:$0xff]  ;;  %v1743_v19 = vmax.f32 %v1619_v38, 0.0  ;;  %v8523_v8 = vcombine.low %v2194_v48, %v2198_v29  ;;  %v8532_v25 = vcombine.high %v2202_v52, %v2206_v14 }
 0x217   : > { %5154 = vmatprep.mubr.bf16.mxu0 %v10814_v28  ;;  %5606 = vmatprep.mubr.bf16.mxu1 %v10814_v28  ;;  %v1758_v33 = vmax.f32 %v1518_v43, 0.0  ;;  %v8530_v43 = vcombine.high %v2201_v45, %v2205_v41  ;;  %v2209_v16 = vld [vmem:[#allocation6 + $0xc00] sm:$0xff]  ;;  %v8529_v48 = vcombine.low %v2201_v45, %v2205_v41  ;;  %v8531_v29 = vcombine.low %v2202_v52, %v2206_v14  ;;  %v2218_v41 = vld [vmem:[#allocation6 + $0xc48] sm:$0xff] }
 0x218   : > { %5643 = vmatprep.subr.bf16.mxu1 %v8516_v12  ;;  %v11089_v51 = vpack.c.bf16 %v1757_v11, %v1749_v46  ;;  %v1744_v12 = vmax.f32 %v1621_v62, 0.0  ;;  %v11095_v28 = vpack.c.bf16 %v1743_v19, %v1735_v60  ;;  %v2210_v46 = vld [vmem:[#allocation6 + $0xc08] sm:$0xff]  ;;  %v2221_v62 = vld [vmem:[#allocation6 + $0xc60] sm:$0xff] }
 0x219   : > { %5192 = vmatpush1.bf16.msra.mxu0 %v8513_v37  ;;  %v11093_v24 = vpack.c.bf16 %v1758_v33, %v1750_v7  ;;  %v2214_v11 = vld [vmem:[#allocation6 + $0xc28] sm:$0xff]  ;;  %v1624_v37 = vpop.f32.mrb[60].mxu1 }
 0x21a   : > { %5644 = vmatpush1.bf16.msra.mxu1 %v8515_v39  ;;  %5193 = vmatprep.subr.bf16.mxu0 %v8522_v10  ;;  %v11097_v38 = vpack.c.bf16 %v1744_v12, %v1736_v0  ;;  %v1625_v27 = vadd.f32 %v1624_v37, %v10788_v40  ;;  %v1626_v17 = vpop.f32.mrb[61].mxu1  ;;  %v8538_v10 = vcombine.high %v2209_v16, %v2213_v34  ;;  %v2217_v0 = vld [vmem:[#allocation6 + $0xc40] sm:$0xff]  ;;  %v2222_v52 = vld [vmem:[#allocation6 + $0xc68] sm:$0xff] }
 0x21b   : > { %5645 = vmatprep.subr.bf16.mxu1 %v8524_v49  ;;  %v1627_v19 = vadd.f32 %v1626_v17, %v10797_v13  ;;  %v1628_v39 = vpop.f32.mrb[62].mxu1  ;;  %v8540_v7 = vcombine.high %v2210_v46, %v2214_v11  ;;  %v8539_v12 = vcombine.low %v2210_v46, %v2214_v11  ;;  %v2225_v37 = vld [vmem:[#allocation6 + $0xc80] sm:$0xff] }
 0x21c   : > { %5155 = vmatmul.mubr.bf16.gmra.mrb[92].mxu0 %v10805_v30  ;;  %v1751_v49 = vmax.f32 %v1625_v27, 0.0  ;;  %v1629_v60 = vadd.f32 %v1628_v39, %v10788_v40  ;;  %v1630_v33 = vpop.f32.mrb[63].mxu1  ;;  %v8546_v40 = vcombine.high %v2217_v0, %v2221_v62  ;;  %v8548_v27 = vcombine.high %v2218_v41, %v2222_v52  ;;  %v2229_v17 = vld [vmem:[#allocation6 + $0xca0] sm:$0xff]  ;;  %v2226_v39 = vld [vmem:[#allocation6 + $0xc88] sm:$0xff] }
 0x21d   : > { %5607 = vmatmul.mubr.bf16.gmra.mrb[92].mxu1 %v10805_v30  ;;  %5194 = vmatpush1.bf16.msra.mxu0 %v8521_v9  ;;  %v1752_v9 = vmax.f32 %v1627_v19, 0.0  ;;  %v1631_v45 = vadd.f32 %v1630_v33, %v10797_v13  ;;  %v2230_v19 = vld [vmem:[#allocation6 + $0xca8] sm:$0xff]  ;;  %v8547_v13 = vcombine.low %v2218_v41, %v2222_v52  ;;  %v2233_v11 = vld [vmem:[#allocation6 + $0xcc0] sm:$0xff] }
 0x21e   : > { %5646 = vmatpush1.bf16.msra.mxu1 %v8523_v8  ;;  %5195 = vmatprep.subr.bf16.mxu0 %v8530_v43  ;;  %v1759_v14 = vmax.f32 %v1629_v60, 0.0  ;;  %v8537_v8 = vcombine.low %v2209_v16, %v2213_v34  ;;  %v8545_v34 = vcombine.low %v2217_v0, %v2221_v62  ;;  %v8554_v16 = vcombine.high %v2225_v37, %v2229_v17  ;;  %v2241_v33 = vld [vmem:[#allocation6 + $0xd00] sm:$0xff] }
 0x21f   : > { %5197 = vmatprep.mubr.bf16.mxu0 %v10792_v42  ;;  %5647 = vmatprep.subr.bf16.mxu1 %v8532_v25  ;;  %v1760_v43 = vmax.f32 %v1631_v45, 0.0  ;;  %v8556_v46 = vcombine.high %v2226_v39, %v2230_v19  ;;  %v2245_v62 = vld [vmem:[#allocation6 + $0xd20] sm:$0xff]  ;;  %v2246_v45 = vld [vmem:[#allocation6 + $0xd28] sm:$0xff] }
 0x220   : > { %5649 = vmatprep.mubr.bf16.mxu1 %v10792_v42  ;;  %v11107_v25 = vpack.c.bf16 %v1759_v14, %v1751_v49  ;;  %v8555_v49 = vcombine.low %v2226_v39, %v2230_v19  ;;  %v8570_v14 = vcombine.high %v2241_v33, %v2245_v62  ;;  %v2257_v19 = vld [vmem:[#allocation6 + $0xd80] sm:$0xff] }
 0x221   : > { %5196 = vmatpush1.bf16.msra.mxu0 %v8529_v48  ;;  %v11109_v42 = vpack.c.bf16 %v1760_v43, %v1752_v9  ;;  %v2237_v48 = vld [vmem:[#allocation6 + $0xce0] sm:$0xff]  ;;  %v2242_v9 = vld [vmem:[#allocation6 + $0xd08] sm:$0xff] }
 0x222   : > { %5648 = vmatpush1.bf16.msra.mxu1 %v8531_v29  ;;  %5278 = vmatprep.subr.bf16.mxu0 %v8538_v10  ;;  %v2234_v29 = vld [vmem:[#allocation6 + $0xcc8] sm:$0xff]  ;;  %v8562_v60 = vcombine.high %v2233_v11, %v2237_v48  ;;  %v8561_v41 = vcombine.low %v2233_v11, %v2237_v48  ;;  %v2253_v43 = vld [vmem:[#allocation6 + $0xd60] sm:$0xff] }
 0x223   : > { %5730 = vmatprep.subr.bf16.mxu1 %v8540_v7  ;;  %v2238_v10 = vld [vmem:[#allocation6 + $0xce8] sm:$0xff]  ;;  %v8553_v7 = vcombine.low %v2225_v37, %v2229_v17  ;;  %v8571_v17 = vcombine.low %v2242_v9, %v2246_v45 }
 0x224   : > { %5198 = vmatmul.mubr.bf16.vlgmr.msra.gmra.mrb[64].mxu0 %v10783_v2  ;;  %v8564_v0 = vcombine.high %v2234_v29, %v2238_v10  ;;  %v8563_v52 = vcombine.low %v2234_v29, %v2238_v10  ;;  %v2254_v37 = vld [vmem:[#allocation6 + $0xd68] sm:$0xff] }
 0x225   : > { %5650 = vmatmul.mubr.bf16.vlgmr.msra.gmra.mrb[64].mxu1 %v10783_v2  ;;  %5279 = vmatpush1.bf16.msra.mxu0 %v8537_v8  ;;  %v8572_v8 = vcombine.high %v2242_v9, %v2246_v45  ;;  %v2273_v45 = vld [vmem:[#allocation6 + $0xe00] sm:$0xff] }
 0x226   : > { %5731 = vmatpush1.bf16.msra.mxu1 %v8539_v12  ;;  %5280 = vmatprep.subr.bf16.mxu0 %v8546_v40  ;;  %v2249_v12 = vld [vmem:[#allocation6 + $0xd40] sm:$0xff]  ;;  %v2250_v40 = vld [vmem:[#allocation6 + $0xd48] sm:$0xff] }
 0x227   : > { %5207 = vmatprep.mubr.bf16.mxu0 %v10841_v50  ;;  %5659 = vmatprep.mubr.bf16.mxu1 %v10841_v50  ;;  %v8578_v39 = vcombine.high %v2249_v12, %v2253_v43  ;;  %v8577_v11 = vcombine.low %v2249_v12, %v2253_v43  ;;  %v8579_v48 = vcombine.low %v2250_v40, %v2254_v37 }
 0x228   : > { %5732 = vmatprep.subr.bf16.mxu1 %v8548_v27  ;;  %v8569_v27 = vcombine.low %v2241_v33, %v2245_v62  ;;  %v2270_v33 = vld [vmem:[#allocation6 + $0xde8] sm:$0xff] }
 0x229   : > { %5281 = vmatpush1.bf16.msra.mxu0 %v8545_v34  ;;  %v8580_v34 = vcombine.high %v2250_v40, %v2254_v37 }
 0x22a   : > { %5733 = vmatpush1.bf16.msra.mxu1 %v8547_v13  ;;  %5282 = vmatprep.subr.bf16.mxu0 %v8554_v16  ;;  %v2261_v13 = vld [vmem:[#allocation6 + $0xda0] sm:$0xff]  ;;  %v2258_v16 = vld [vmem:[#allocation6 + $0xd88] sm:$0xff] }
 0x22b   : > { %5734 = vmatprep.subr.bf16.mxu1 %v8556_v46  ;;  %v2262_v46 = vld [vmem:[#allocation6 + $0xda8] sm:$0xff]  ;;  %v8586_v29 = vcombine.high %v2257_v19, %v2261_v13 }
 0x22c   : > { %5208 = vmatmul.mubr.bf16.gmra.mrb[68].mxu0 %v10835_v5  ;;  %v8588_v10 = vcombine.high %v2258_v16, %v2262_v46  ;;  %v8587_v62 = vcombine.low %v2258_v16, %v2262_v46  ;;  %v2289_v46 = vld [vmem:[#allocation6 + $0xe80] sm:$0xff] }
 0x22d   : > { %5660 = vmatmul.mubr.bf16.gmra.mrb[68].mxu1 %v10835_v5  ;;  %5283 = vmatpush1.bf16.msra.mxu0 %v8553_v7  ;;  %v2265_v7 = vld [vmem:[#allocation6 + $0xdc0] sm:$0xff] }
 0x22e   : > { %5735 = vmatpush1.bf16.msra.mxu1 %v8555_v49  ;;  %5284 = vmatprep.subr.bf16.mxu0 %v8562_v60  ;;  %v2269_v49 = vld [vmem:[#allocation6 + $0xde0] sm:$0xff]  ;;  %v2266_v60 = vld [vmem:[#allocation6 + $0xdc8] sm:$0xff] }
 0x22f   : > { %5217 = vmatprep.mubr.bf16.mxu0 %v10885_v44  ;;  %5669 = vmatprep.mubr.bf16.mxu1 %v10885_v44  ;;  %v8594_v9 = vcombine.high %v2265_v7, %v2269_v49  ;;  %v8593_v12 = vcombine.low %v2265_v7, %v2269_v49  ;;  %v8595_v43 = vcombine.low %v2266_v60, %v2270_v33 }
 0x230   : > { %5736 = vmatprep.subr.bf16.mxu1 %v8564_v0  ;;  %v8585_v0 = vcombine.low %v2257_v19, %v2261_v13  ;;  %v2286_v19 = vld [vmem:[#allocation6 + $0xe68] sm:$0xff] }
 0x231   : > { %5285 = vmatpush1.bf16.msra.mxu0 %v8561_v41  ;;  %v8596_v41 = vcombine.high %v2266_v60, %v2270_v33 }
 0x232   : > { %5737 = vmatpush1.bf16.msra.mxu1 %v8563_v52  ;;  %5286 = vmatprep.subr.bf16.mxu0 %v8570_v14  ;;  %v2277_v52 = vld [vmem:[#allocation6 + $0xe20] sm:$0xff]  ;;  %v2274_v14 = vld [vmem:[#allocation6 + $0xe08] sm:$0xff] }
 0x233   : > { %5738 = vmatprep.subr.bf16.mxu1 %v8572_v8  ;;  %v2278_v8 = vld [vmem:[#allocation6 + $0xe28] sm:$0xff]  ;;  %v8602_v40 = vcombine.high %v2273_v45, %v2277_v52 }
 0x234   : > { %5218 = vmatmul.mubr.bf16.gmra.mrb[72].mxu0 %v10879_v18  ;;  %v8604_v37 = vcombine.high %v2274_v14, %v2278_v8  ;;  %v8603_v13 = vcombine.low %v2274_v14, %v2278_v8  ;;  %v2305_v8 = vld [vmem:[#allocation6 + $0xf00] sm:$0xff] }
 0x235   : > { %5670 = vmatmul.mubr.bf16.gmra.mrb[72].mxu1 %v10879_v18  ;;  %5287 = vmatpush1.bf16.msra.mxu0 %v8569_v27  ;;  %v2281_v27 = vld [vmem:[#allocation6 + $0xe40] sm:$0xff] }
 0x236   : > { %5739 = vmatpush1.bf16.msra.mxu1 %v8571_v17  ;;  %5288 = vmatprep.subr.bf16.mxu0 %v8578_v39  ;;  %v2285_v17 = vld [vmem:[#allocation6 + $0xe60] sm:$0xff]  ;;  %v2282_v39 = vld [vmem:[#allocation6 + $0xe48] sm:$0xff] }
 0x237   : > { %5227 = vmatprep.mubr.bf16.mxu0 %v10929_v32  ;;  %5679 = vmatprep.mubr.bf16.mxu1 %v10929_v32  ;;  %v8610_v16 = vcombine.high %v2281_v27, %v2285_v17  ;;  %v8609_v7 = vcombine.low %v2281_v27, %v2285_v17  ;;  %v8611_v49 = vcombine.low %v2282_v39, %v2286_v19 }
 0x238   : > { %5740 = vmatprep.subr.bf16.mxu1 %v8580_v34  ;;  %v8601_v34 = vcombine.low %v2273_v45, %v2277_v52  ;;  %v2302_v45 = vld [vmem:[#allocation6 + $0xee8] sm:$0xff] }
 0x239   : > { %5289 = vmatpush1.bf16.msra.mxu0 %v8577_v11  ;;  %v8612_v11 = vcombine.high %v2282_v39, %v2286_v19 }
 0x23a   : > { %5741 = vmatpush1.bf16.msra.mxu1 %v8579_v48  ;;  %5290 = vmatprep.subr.bf16.mxu0 %v8586_v29  ;;  %v2293_v48 = vld [vmem:[#allocation6 + $0xea0] sm:$0xff]  ;;  %v2290_v29 = vld [vmem:[#allocation6 + $0xe88] sm:$0xff] }
 0x23b   : > { %5742 = vmatprep.subr.bf16.mxu1 %v8588_v10  ;;  %v2294_v10 = vld [vmem:[#allocation6 + $0xea8] sm:$0xff]  ;;  %v8618_v60 = vcombine.high %v2289_v46, %v2293_v48 }
 0x23c   : > { %5228 = vmatmul.mubr.bf16.gmra.mrb[76].mxu0 %v10923_v54  ;;  %v8620_v33 = vcombine.high %v2290_v29, %v2294_v10  ;;  %v8619_v52 = vcombine.low %v2290_v29, %v2294_v10  ;;  %v2321_v10 = vld [vmem:[#allocation6 + $0xf80] sm:$0xff] }
 0x23d   : > { %5680 = vmatmul.mubr.bf16.gmra.mrb[76].mxu1 %v10923_v54  ;;  %5291 = vmatpush1.bf16.msra.mxu0 %v8585_v0  ;;  %v2297_v0 = vld [vmem:[#allocation6 + $0xec0] sm:$0xff] }
 0x23e   : > { %5743 = vmatpush1.bf16.msra.mxu1 %v8587_v62  ;;  %5292 = vmatprep.subr.bf16.mxu0 %v8594_v9  ;;  %v2301_v62 = vld [vmem:[#allocation6 + $0xee0] sm:$0xff]  ;;  %v2298_v9 = vld [vmem:[#allocation6 + $0xec8] sm:$0xff] }
 0x23f   : > { %5237 = vmatprep.mubr.bf16.mxu0 %v10973_v31  ;;  %5689 = vmatprep.mubr.bf16.mxu1 %v10973_v31  ;;  %v8626_v14 = vcombine.high %v2297_v0, %v2301_v62  ;;  %v8625_v27 = vcombine.low %v2297_v0, %v2301_v62  ;;  %v8627_v17 = vcombine.low %v2298_v9, %v2302_v45 }
 0x240   : > { %5744 = vmatprep.subr.bf16.mxu1 %v8596_v41  ;;  %v8617_v41 = vcombine.low %v2289_v46, %v2293_v48  ;;  %v2318_v46 = vld [vmem:[#allocation6 + $0xf68] sm:$0xff] }
 0x241   : > { %5293 = vmatpush1.bf16.msra.mxu0 %v8593_v12  ;;  %v8628_v12 = vcombine.high %v2298_v9, %v2302_v45 }
 0x242   : > { %5745 = vmatpush1.bf16.msra.mxu1 %v8595_v43  ;;  %5294 = vmatprep.subr.bf16.mxu0 %v8602_v40  ;;  %v2309_v43 = vld [vmem:[#allocation6 + $0xf20] sm:$0xff]  ;;  %v2306_v40 = vld [vmem:[#allocation6 + $0xf08] sm:$0xff] }
 0x243   : > { %5746 = vmatprep.subr.bf16.mxu1 %v8604_v37  ;;  %v2310_v37 = vld [vmem:[#allocation6 + $0xf28] sm:$0xff]  ;;  %v8634_v39 = vcombine.high %v2305_v8, %v2309_v43 }
 0x244   : > { %5238 = vmatmul.mubr.bf16.gmra.mrb[80].mxu0 %v10967_v59  ;;  %v8636_v19 = vcombine.high %v2306_v40, %v2310_v37  ;;  %v8635_v48 = vcombine.low %v2306_v40, %v2310_v37 }
 0x245   : > { %5690 = vmatmul.mubr.bf16.gmra.mrb[80].mxu1 %v10967_v59  ;;  %5295 = vmatpush1.bf16.msra.mxu0 %v8601_v34  ;;  %v2313_v34 = vld [vmem:[#allocation6 + $0xf40] sm:$0xff] }
 0x246   : > { %5747 = vmatpush1.bf16.msra.mxu1 %v8603_v13  ;;  %5296 = vmatprep.subr.bf16.mxu0 %v8610_v16  ;;  %v2317_v13 = vld [vmem:[#allocation6 + $0xf60] sm:$0xff]  ;;  %v2314_v16 = vld [vmem:[#allocation6 + $0xf48] sm:$0xff] }
 0x247   : > { %5247 = vmatprep.mubr.bf16.mxu0 %v11017_v20  ;;  %5699 = vmatprep.mubr.bf16.mxu1 %v11017_v20  ;;  %v8642_v29 = vcombine.high %v2313_v34, %v2317_v13  ;;  %v8641_v0 = vcombine.low %v2313_v34, %v2317_v13  ;;  %v8643_v62 = vcombine.low %v2314_v16, %v2318_v46 }
 0x248   : > { %5748 = vmatprep.subr.bf16.mxu1 %v8612_v11  ;;  %v8633_v11 = vcombine.low %v2305_v8, %v2309_v43  ;;  %v2334_v8 = vld [vmem:[#allocation6 + $0xfe8] sm:$0xff] }
 0x249   : > { %5297 = vmatpush1.bf16.msra.mxu0 %v8609_v7  ;;  %v8644_v7 = vcombine.high %v2314_v16, %v2318_v46 }
 0x24a   : > { %5749 = vmatpush1.bf16.msra.mxu1 %v8611_v49  ;;  %5298 = vmatprep.subr.bf16.mxu0 %v8618_v60  ;;  %v2325_v49 = vld [vmem:[#allocation6 + $0xfa0] sm:$0xff]  ;;  %v2322_v60 = vld [vmem:[#allocation6 + $0xf88] sm:$0xff] }
 0x24b   : > { %5750 = vmatprep.subr.bf16.mxu1 %v8620_v33  ;;  %v2326_v33 = vld [vmem:[#allocation6 + $0xfa8] sm:$0xff]  ;;  %v8650_v9 = vcombine.high %v2321_v10, %v2325_v49 }
 0x24c   : > { %5248 = vmatmul.mubr.bf16.gmra.mrb[84].mxu0 %v11011_v4  ;;  %v8652_v45 = vcombine.high %v2322_v60, %v2326_v33  ;;  %v8651_v43 = vcombine.low %v2322_v60, %v2326_v33  ;;  %v1843_v33 = vld [vmem:[#allocation6 + $0x90] sm:$0xff] }
 0x24d   : > { %5700 = vmatmul.mubr.bf16.gmra.mrb[84].mxu1 %v11011_v4  ;;  %5299 = vmatpush1.bf16.msra.mxu0 %v8617_v41  ;;  %v2329_v41 = vld [vmem:[#allocation6 + $0xfc0] sm:$0xff] }
 0x24e   : > { %5751 = vmatpush1.bf16.msra.mxu1 %v8619_v52  ;;  %5300 = vmatprep.subr.bf16.mxu0 %v8626_v14  ;;  %v2333_v52 = vld [vmem:[#allocation6 + $0xfe0] sm:$0xff]  ;;  %v2330_v14 = vld [vmem:[#allocation6 + $0xfc8] sm:$0xff] }
 0x24f   : > { %5257 = vmatprep.mubr.bf16.mxu0 %v11061_v63  ;;  %5709 = vmatprep.mubr.bf16.mxu1 %v11061_v63  ;;  %v8658_v40 = vcombine.high %v2329_v41, %v2333_v52  ;;  %v8660_v37 = vcombine.high %v2330_v14, %v2334_v8  ;;  %v8657_v34 = vcombine.low %v2329_v41, %v2333_v52  ;;  %v1848_v41 = vld [vmem:[#allocation6 + $0xb8] sm:$0xff] }
 0x250   : > { %5752 = vmatprep.subr.bf16.mxu1 %v8628_v12  ;;  %v8649_v12 = vcombine.low %v2321_v10, %v2325_v49  ;;  %v8659_v13 = vcombine.low %v2330_v14, %v2334_v8  ;;  %v1836_v10 = vld [vmem:[#allocation6 + $0x58] sm:$0xff] }
 0x251   : > { %5301 = vmatpush1.bf16.msra.mxu0 %v8625_v27  ;;  %v1827_v27 = vld [vmem:[#allocation6 + $0x10] sm:$0xff] }
 0x252   : > { %5753 = vmatpush1.bf16.msra.mxu1 %v8627_v17  ;;  %5302 = vmatprep.subr.bf16.mxu0 %v8634_v39  ;;  %v1831_v17 = vld [vmem:[#allocation6 + $0x30] sm:$0xff]  ;;  %v1828_v39 = vld [vmem:[#allocation6 + $0x18] sm:$0xff] }
 0x253   : > { %5754 = vmatprep.subr.bf16.mxu1 %v8636_v19  ;;  %v1832_v19 = vld [vmem:[#allocation6 + $0x38] sm:$0xff]  ;;  %v8158_v16 = vcombine.high %v1827_v27, %v1831_v17 }
 0x254   : > { %5258 = vmatmul.mubr.bf16.gmra.mrb[88].mxu0 %v11055_v26  ;;  %v8160_v46 = vcombine.high %v1828_v39, %v1832_v19  ;;  %v8159_v49 = vcombine.low %v1828_v39, %v1832_v19  ;;  %v1859_v19 = vld [vmem:[#allocation6 + $0x110] sm:$0xff] }
 0x255   : > { %5710 = vmatmul.mubr.bf16.gmra.mrb[88].mxu1 %v11055_v26  ;;  %5303 = vmatpush1.bf16.msra.mxu0 %v8633_v11  ;;  %v1835_v11 = vld [vmem:[#allocation6 + $0x50] sm:$0xff] }
 0x256   : > { %5755 = vmatpush1.bf16.msra.mxu1 %v8635_v48  ;;  %5304 = vmatprep.subr.bf16.mxu0 %v8642_v29  ;;  %v1839_v48 = vld [vmem:[#allocation6 + $0x70] sm:$0xff]  ;;  %v8157_v29 = vcombine.low %v1827_v27, %v1831_v17  ;;  %v1856_v27 = vld [vmem:[#allocation6 + $0xf8] sm:$0xff] }
 0x257   : > { %5267 = vmatprep.mubr.bf16.mxu0 %v11093_v24  ;;  %5719 = vmatprep.mubr.bf16.mxu1 %v11093_v24  ;;  %v8166_v60 = vcombine.high %v1835_v11, %v1839_v48 }
 0x258   : > { %5756 = vmatprep.subr.bf16.mxu1 %v8644_v7  ;;  %v1840_v7 = vld [vmem:[#allocation6 + $0x78] sm:$0xff] }
 0x259   : > { %5305 = vmatpush1.bf16.msra.mxu0 %v8641_v0  ;;  %v1847_v0 = vld [vmem:[#allocation6 + $0xb0] sm:$0xff]  ;;  %v8167_v14 = vcombine.low %v1836_v10, %v1840_v7 }
 0x25a   : > { %5757 = vmatpush1.bf16.msra.mxu1 %v8643_v62  ;;  %5306 = vmatprep.subr.bf16.mxu0 %v8650_v9  ;;  %v8168_v62 = vcombine.high %v1836_v10, %v1840_v7  ;;  %v8165_v9 = vcombine.low %v1835_v11, %v1839_v48  ;;  %v8174_v52 = vcombine.high %v1843_v33, %v1847_v0  ;;  %v1864_v11 = vld [vmem:[#allocation6 + $0x138] sm:$0xff]  ;;  %v1867_v7 = vld [vmem:[#allocation6 + $0x150] sm:$0xff] }
 0x25b   : > { %5758 = vmatprep.subr.bf16.mxu1 %v8652_v45  ;;  %v1844_v45 = vld [vmem:[#allocation6 + $0x98] sm:$0xff] }
 0x25c   : > { %5268 = vmatmul.mubr.bf16.gmra.mrb[92].mxu0 %v11089_v51  ;;  %v8176_v8 = vcombine.high %v1844_v45, %v1848_v41  ;;  %v8175_v17 = vcombine.low %v1844_v45, %v1848_v41  ;;  %v1875_v45 = vld [vmem:[#allocation6 + $0x190] sm:$0xff] }
 0x25d   : > { %5720 = vmatmul.mubr.bf16.gmra.mrb[92].mxu1 %v11089_v51  ;;  %5307 = vmatpush1.bf16.msra.mxu0 %v8649_v12  ;;  %v1851_v12 = vld [vmem:[#allocation6 + $0xd0] sm:$0xff] }
 0x25e   : > { %5310 = vmatprep.mubr.bf16.mxu0 %v10859_v55  ;;  %5759 = vmatpush1.bf16.msra.mxu1 %v8651_v43  ;;  %v1855_v43 = vld [vmem:[#allocation6 + $0xf0] sm:$0xff] }
 0x25f   : > { %5762 = vmatprep.mubr.bf16.mxu1 %v10859_v55  ;;  %5308 = vmatprep.subr.bf16.mxu0 %v8658_v40  ;;  %v8173_v40 = vcombine.low %v1843_v33, %v1847_v0  ;;  %v8182_v39 = vcombine.high %v1851_v12, %v1855_v43  ;;  %v1868_v33 = vld [vmem:[#allocation6 + $0x158] sm:$0xff]  ;;  %v1879_v41 = vld [vmem:[#allocation6 + $0x1b0] sm:$0xff] }
 0x260   : > { %5760 = vmatprep.subr.bf16.mxu1 %v8660_v37  ;;  %v1852_v37 = vld [vmem:[#allocation6 + $0xd8] sm:$0xff] }
 0x261   : > { %5309 = vmatpush1.bf16.msra.mxu0 %v8657_v34  ;;  %v1863_v34 = vld [vmem:[#allocation6 + $0x130] sm:$0xff]  ;;  %v1872_v0 = vld [vmem:[#allocation6 + $0x178] sm:$0xff] }
 0x262   : > { %5761 = vmatpush1.bf16.msra.mxu1 %v8659_v13  ;;  %5843 = vmatprep.subr.bf16.mxu0 %v8158_v16  ;;  %v8184_v13 = vcombine.high %v1852_v37, %v1856_v27  ;;  %v8181_v16 = vcombine.low %v1851_v12, %v1855_v43  ;;  %v8190_v48 = vcombine.high %v1859_v19, %v1863_v34  ;;  %v1880_v12 = vld [vmem:[#allocation6 + $0x1b8] sm:$0xff] }
 0x263   : > { %6295 = vmatprep.subr.bf16.mxu1 %v8160_v46  ;;  %v1860_v46 = vld [vmem:[#allocation6 + $0x118] sm:$0xff]  ;;  %v8206_v43 = vcombine.high %v1875_v45, %v1879_v41 }
 0x264   : > { %5311 = vmatmul.mubr.bf16.vlgmr.msra.gmra.mrb[64].mxu0 %v10850_v23  ;;  %v8192_v10 = vcombine.high %v1860_v46, %v1864_v11 }
 0x265   : > { %5763 = vmatmul.mubr.bf16.vlgmr.msra.gmra.mrb[64].mxu1 %v10850_v23  ;;  %5844 = vmatpush1.bf16.msra.mxu0 %v8157_v29  ;;  %v8183_v29 = vcombine.low %v1852_v37, %v1856_v27  ;;  %v1883_v27 = vld [vmem:[#allocation6 + $0x1d0] sm:$0xff] }
 0x266   : > { %5320 = vmatprep.mubr.bf16.mxu0 %v10903_v57  ;;  %5772 = vmatprep.mubr.bf16.mxu1 %v10903_v57 }
 0x267   : > { %6296 = vmatpush1.bf16.msra.mxu1 %v8159_v49  ;;  %5845 = vmatprep.subr.bf16.mxu0 %v8166_v60  ;;  %v1871_v49 = vld [vmem:[#allocation6 + $0x170] sm:$0xff]  ;;  %v8189_v60 = vcombine.low %v1859_v19, %v1863_v34  ;;  %v1884_v19 = vld [vmem:[#allocation6 + $0x1d8] sm:$0xff] }
 0x268   : > { %6297 = vmatprep.subr.bf16.mxu1 %v8168_v62  ;;  %v8191_v62 = vcombine.low %v1860_v46, %v1864_v11  ;;  %v1888_v34 = vld [vmem:[#allocation6 + $0x1f8] sm:$0xff]  ;;  %v1891_v46 = vld [vmem:[#allocation6 + $0x210] sm:$0xff] }
 0x269   : > { %5846 = vmatpush1.bf16.msra.mxu0 %v8165_v9  ;;  %v8198_v9 = vcombine.high %v1867_v7, %v1871_v49  ;;  %v1895_v11 = vld [vmem:[#allocation6 + $0x230] sm:$0xff] }
 0x26a   : > { %5847 = vmatprep.subr.bf16.mxu0 %v8174_v52  ;;  %v8200_v52 = vcombine.high %v1868_v33, %v1872_v0 }
 0x26b   : > { %6298 = vmatpush1.bf16.msra.mxu1 %v8167_v14  ;;  %v8197_v14 = vcombine.low %v1867_v7, %v1871_v49  ;;  %v1896_v7 = vld [vmem:[#allocation6 + $0x238] sm:$0xff]  ;;  %v8222_v49 = vcombine.high %v1891_v46, %v1895_v11 }
 0x26c   : > { %5321 = vmatmul.mubr.bf16.gmra.mrb[68].mxu0 %v10894_v6  ;;  %6299 = vmatprep.subr.bf16.mxu1 %v8176_v8  ;;  %v1876_v8 = vld [vmem:[#allocation6 + $0x198] sm:$0xff] }
 0x26d   : > { %5773 = vmatmul.mubr.bf16.gmra.mrb[68].mxu1 %v10894_v6  ;;  %5848 = vmatpush1.bf16.msra.mxu0 %v8173_v40  ;;  %v8199_v40 = vcombine.low %v1868_v33, %v1872_v0  ;;  %v8208_v37 = vcombine.high %v1876_v8, %v1880_v12  ;;  %v1899_v0 = vld [vmem:[#allocation6 + $0x250] sm:$0xff] }
 0x26e   : > { %5330 = vmatprep.mubr.bf16.mxu0 %v10947_v21  ;;  %5782 = vmatprep.mubr.bf16.mxu1 %v10947_v21 }
 0x26f   : > { %6300 = vmatpush1.bf16.msra.mxu1 %v8175_v17  ;;  %5849 = vmatprep.subr.bf16.mxu0 %v8182_v39  ;;  %v1887_v17 = vld [vmem:[#allocation6 + $0x1f0] sm:$0xff]  ;;  %v8205_v39 = vcombine.low %v1875_v45, %v1879_v41  ;;  %v1900_v45 = vld [vmem:[#allocation6 + $0x258] sm:$0xff] }
 0x270   : > { %6301 = vmatprep.subr.bf16.mxu1 %v8184_v13  ;;  %v8207_v13 = vcombine.low %v1876_v8, %v1880_v12  ;;  %v1904_v41 = vld [vmem:[#allocation6 + $0x278] sm:$0xff]  ;;  %v1907_v8 = vld [vmem:[#allocation6 + $0x290] sm:$0xff] }
 0x271   : > { %5850 = vmatpush1.bf16.msra.mxu0 %v8181_v16  ;;  %v8214_v16 = vcombine.high %v1883_v27, %v1887_v17  ;;  %v1911_v12 = vld [vmem:[#allocation6 + $0x2b0] sm:$0xff] }
 0x272   : > { %5851 = vmatprep.subr.bf16.mxu0 %v8190_v48  ;;  %v8216_v48 = vcombine.high %v1884_v19, %v1888_v34 }
 0x273   : > { %6302 = vmatpush1.bf16.msra.mxu1 %v8183_v29  ;;  %v8213_v29 = vcombine.low %v1883_v27, %v1887_v17  ;;  %v1912_v27 = vld [vmem:[#allocation6 + $0x2b8] sm:$0xff]  ;;  %v8238_v17 = vcombine.high %v1907_v8, %v1911_v12 }
 0x274   : > { %5331 = vmatmul.mubr.bf16.gmra.mrb[72].mxu0 %v10938_v53  ;;  %6303 = vmatprep.subr.bf16.mxu1 %v8192_v10  ;;  %v1892_v10 = vld [vmem:[#allocation6 + $0x218] sm:$0xff] }
 0x275   : > { %5783 = vmatmul.mubr.bf16.gmra.mrb[72].mxu1 %v10938_v53  ;;  %5852 = vmatpush1.bf16.msra.mxu0 %v8189_v60  ;;  %v8215_v60 = vcombine.low %v1884_v19, %v1888_v34  ;;  %v8224_v33 = vcombine.high %v1892_v10, %v1896_v7  ;;  %v1915_v34 = vld [vmem:[#allocation6 + $0x2d0] sm:$0xff] }
 0x276   : > { %5340 = vmatprep.mubr.bf16.mxu0 %v10991_v1  ;;  %5792 = vmatprep.mubr.bf16.mxu1 %v10991_v1 }
 0x277   : > { %6304 = vmatpush1.bf16.msra.mxu1 %v8191_v62  ;;  %5853 = vmatprep.subr.bf16.mxu0 %v8198_v9  ;;  %v1903_v62 = vld [vmem:[#allocation6 + $0x270] sm:$0xff]  ;;  %v8221_v9 = vcombine.low %v1891_v46, %v1895_v11  ;;  %v1916_v46 = vld [vmem:[#allocation6 + $0x2d8] sm:$0xff] }
 0x278   : > { %6305 = vmatprep.subr.bf16.mxu1 %v8200_v52  ;;  %v8223_v52 = vcombine.low %v1892_v10, %v1896_v7  ;;  %v1920_v11 = vld [vmem:[#allocation6 + $0x2f8] sm:$0xff]  ;;  %v1923_v10 = vld [vmem:[#allocation6 + $0x310] sm:$0xff] }
 0x279   : > { %5854 = vmatpush1.bf16.msra.mxu0 %v8197_v14  ;;  %v8230_v14 = vcombine.high %v1899_v0, %v1903_v62  ;;  %v1927_v7 = vld [vmem:[#allocation6 + $0x330] sm:$0xff] }
 0x27a   : > { %5855 = vmatprep.subr.bf16.mxu0 %v8206_v43  ;;  %v8232_v43 = vcombine.high %v1900_v45, %v1904_v41 }
 0x27b   : > { %6306 = vmatpush1.bf16.msra.mxu1 %v8199_v40  ;;  %v8229_v40 = vcombine.low %v1899_v0, %v1903_v62  ;;  %v1928_v0 = vld [vmem:[#allocation6 + $0x338] sm:$0xff]  ;;  %v8254_v62 = vcombine.high %v1923_v10, %v1927_v7 }
 0x27c   : > { %5341 = vmatmul.mubr.bf16.gmra.mrb[76].mxu0 %v10982_v61  ;;  %6307 = vmatprep.subr.bf16.mxu1 %v8208_v37  ;;  %v1908_v37 = vld [vmem:[#allocation6 + $0x298] sm:$0xff] }
 0x27d   : > { %5793 = vmatmul.mubr.bf16.gmra.mrb[76].mxu1 %v10982_v61  ;;  %5856 = vmatpush1.bf16.msra.mxu0 %v8205_v39  ;;  %v8231_v39 = vcombine.low %v1900_v45, %v1904_v41  ;;  %v8240_v19 = vcombine.high %v1908_v37, %v1912_v27  ;;  %v1931_v41 = vld [vmem:[#allocation6 + $0x350] sm:$0xff] }
 0x27e   : > { %5350 = vmatprep.mubr.bf16.mxu0 %v11035_v36  ;;  %5802 = vmatprep.mubr.bf16.mxu1 %v11035_v36 }
 0x27f   : > { %6308 = vmatpush1.bf16.msra.mxu1 %v8207_v13  ;;  %5857 = vmatprep.subr.bf16.mxu0 %v8214_v16  ;;  %v1919_v13 = vld [vmem:[#allocation6 + $0x2f0] sm:$0xff]  ;;  %v8237_v16 = vcombine.low %v1907_v8, %v1911_v12  ;;  %v1932_v8 = vld [vmem:[#allocation6 + $0x358] sm:$0xff] }
 0x280   : > { %6309 = vmatprep.subr.bf16.mxu1 %v8216_v48  ;;  %v8239_v48 = vcombine.low %v1908_v37, %v1912_v27  ;;  %v1936_v12 = vld [vmem:[#allocation6 + $0x378] sm:$0xff]  ;;  %v1939_v37 = vld [vmem:[#allocation6 + $0x390] sm:$0xff] }
 0x281   : > { %5858 = vmatpush1.bf16.msra.mxu0 %v8213_v29  ;;  %v8246_v29 = vcombine.high %v1915_v34, %v1919_v13  ;;  %v1943_v27 = vld [vmem:[#allocation6 + $0x3b0] sm:$0xff] }
 0x282   : > { %5859 = vmatprep.subr.bf16.mxu0 %v8222_v49  ;;  %v8248_v49 = vcombine.high %v1916_v46, %v1920_v11 }
 0x283   : > { %6310 = vmatpush1.bf16.msra.mxu1 %v8215_v60  ;;  %v8245_v60 = vcombine.low %v1915_v34, %v1919_v13  ;;  %v1944_v34 = vld [vmem:[#allocation6 + $0x3b8] sm:$0xff]  ;;  %v8270_v13 = vcombine.high %v1939_v37, %v1943_v27 }
 0x284   : > { %5351 = vmatmul.mubr.bf16.gmra.mrb[80].mxu0 %v11026_v15  ;;  %6311 = vmatprep.subr.bf16.mxu1 %v8224_v33  ;;  %v1924_v33 = vld [vmem:[#allocation6 + $0x318] sm:$0xff] }
 0x285   : > { %5803 = vmatmul.mubr.bf16.gmra.mrb[80].mxu1 %v11026_v15  ;;  %5860 = vmatpush1.bf16.msra.mxu0 %v8221_v9  ;;  %v8247_v9 = vcombine.low %v1916_v46, %v1920_v11  ;;  %v8256_v45 = vcombine.high %v1924_v33, %v1928_v0  ;;  %v1947_v11 = vld [vmem:[#allocation6 + $0x3d0] sm:$0xff] }
 0x286   : > { %5360 = vmatprep.mubr.bf16.mxu0 %v11075_v22  ;;  %5812 = vmatprep.mubr.bf16.mxu1 %v11075_v22 }
 0x287   : > { %6312 = vmatpush1.bf16.msra.mxu1 %v8223_v52  ;;  %5861 = vmatprep.subr.bf16.mxu0 %v8230_v14  ;;  %v1935_v52 = vld [vmem:[#allocation6 + $0x370] sm:$0xff]  ;;  %v8253_v14 = vcombine.low %v1923_v10, %v1927_v7  ;;  %v1948_v10 = vld [vmem:[#allocation6 + $0x3d8] sm:$0xff] }
 0x288   : > { %6313 = vmatprep.subr.bf16.mxu1 %v8232_v43  ;;  %v8255_v43 = vcombine.low %v1924_v33, %v1928_v0  ;;  %v1952_v7 = vld [vmem:[#allocation6 + $0x3f8] sm:$0xff]  ;;  %v1955_v33 = vld [vmem:[#allocation6 + $0x410] sm:$0xff] }
 0x289   : > { %5862 = vmatpush1.bf16.msra.mxu0 %v8229_v40  ;;  %v8262_v40 = vcombine.high %v1931_v41, %v1935_v52  ;;  %v1959_v0 = vld [vmem:[#allocation6 + $0x430] sm:$0xff] }
 0x28a   : > { %5863 = vmatprep.subr.bf16.mxu0 %v8238_v17  ;;  %v8264_v17 = vcombine.high %v1932_v8, %v1936_v12 }
 0x28b   : > { %6314 = vmatpush1.bf16.msra.mxu1 %v8231_v39  ;;  %v8261_v39 = vcombine.low %v1931_v41, %v1935_v52  ;;  %v1960_v41 = vld [vmem:[#allocation6 + $0x438] sm:$0xff]  ;;  %v8286_v52 = vcombine.high %v1955_v33, %v1959_v0 }
 0x28c   : > { %5361 = vmatmul.mubr.bf16.gmra.mrb[84].mxu0 %v11070_v35  ;;  %6315 = vmatprep.subr.bf16.mxu1 %v8240_v19  ;;  %v1940_v19 = vld [vmem:[#allocation6 + $0x398] sm:$0xff] }
 0x28d   : > { %5813 = vmatmul.mubr.bf16.gmra.mrb[84].mxu1 %v11070_v35  ;;  %5864 = vmatpush1.bf16.msra.mxu0 %v8237_v16  ;;  %v8263_v16 = vcombine.low %v1932_v8, %v1936_v12  ;;  %v8272_v46 = vcombine.high %v1940_v19, %v1944_v34  ;;  %v1963_v8 = vld [vmem:[#allocation6 + $0x450] sm:$0xff] }
 0x28e   : > { %5370 = vmatprep.mubr.bf16.mxu0 %v11097_v38  ;;  %5822 = vmatprep.mubr.bf16.mxu1 %v11097_v38  ;;  %v1967_v12 = vld [vmem:[#allocation6 + $0x470] sm:$0xff] }
 0x28f   : > { %6316 = vmatpush1.bf16.msra.mxu1 %v8239_v48  ;;  %5865 = vmatprep.subr.bf16.mxu0 %v8246_v29  ;;  %v1951_v48 = vld [vmem:[#allocation6 + $0x3f0] sm:$0xff]  ;;  %v8269_v29 = vcombine.low %v1939_v37, %v1943_v27  ;;  %v1964_v37 = vld [vmem:[#allocation6 + $0x458] sm:$0xff] }
 0x290   : > { %6317 = vmatprep.subr.bf16.mxu1 %v8248_v49  ;;  %v8271_v49 = vcombine.low %v1940_v19, %v1944_v34  ;;  %v1968_v27 = vld [vmem:[#allocation6 + $0x478] sm:$0xff]  ;;  %v1971_v19 = vld [vmem:[#allocation6 + $0x490] sm:$0xff] }
 0x291   : > { %5866 = vmatpush1.bf16.msra.mxu0 %v8245_v60  ;;  %v8278_v60 = vcombine.high %v1947_v11, %v1951_v48  ;;  %v1975_v34 = vld [vmem:[#allocation6 + $0x4b0] sm:$0xff] }
 0x292   : > { %5867 = vmatprep.subr.bf16.mxu0 %v8254_v62  ;;  %v8280_v62 = vcombine.high %v1948_v10, %v1952_v7 }
 0x293   : > { %6318 = vmatpush1.bf16.msra.mxu1 %v8247_v9  ;;  %v8277_v9 = vcombine.low %v1947_v11, %v1951_v48  ;;  %v8302_v11 = vcombine.high %v1971_v19, %v1975_v34  ;;  %v8295_v48 = vcombine.low %v1964_v37, %v1968_v27 }
 0x294   : > { %5371 = vmatmul.mubr.bf16.gmra.mrb[88].mxu0 %v11095_v28  ;;  %6319 = vmatprep.subr.bf16.mxu1 %v8256_v45  ;;  %v1956_v45 = vld [vmem:[#allocation6 + $0x418] sm:$0xff] }
 0x295   : > { %5823 = vmatmul.mubr.bf16.gmra.mrb[88].mxu1 %v11095_v28  ;;  %5868 = vmatpush1.bf16.msra.mxu0 %v8253_v14  ;;  %v8279_v14 = vcombine.low %v1948_v10, %v1952_v7  ;;  %v1983_v10 = vld [vmem:[#allocation6 + $0x4f0] sm:$0xff] }
 0x296   : > { %5380 = vmatprep.mubr.bf16.mxu0 %v11109_v42  ;;  %5832 = vmatprep.mubr.bf16.mxu1 %v11109_v42 }
 0x297   : > { %6320 = vmatpush1.bf16.msra.mxu1 %v8255_v43  ;;  %5869 = vmatprep.subr.bf16.mxu0 %v8262_v40  ;;  %v8288_v43 = vcombine.high %v1956_v45, %v1960_v41  ;;  %v8285_v40 = vcombine.low %v1955_v33, %v1959_v0  ;;  %v1984_v33 = vld [vmem:[#allocation6 + $0x4f8] sm:$0xff] }
 0x298   : > { %6321 = vmatprep.subr.bf16.mxu1 %v8264_v17  ;;  %v8294_v17 = vcombine.high %v1963_v8, %v1967_v12 }
 0x299   : > { %5870 = vmatpush1.bf16.msra.mxu0 %v8261_v39  ;;  %v8287_v39 = vcombine.low %v1956_v45, %v1960_v41  ;;  %v12100_v45 = vld [vmem:[#allocation17_spill] sm:$0xff] }
 0x29a   : > { %5871 = vmatprep.subr.bf16.mxu0 %v8270_v13  ;;  %v8293_v13 = vcombine.low %v1963_v8, %v1967_v12 }
 0x29b   : > { %6322 = vmatpush1.bf16.msra.mxu1 %v8263_v16  ;;  %v1972_v16 = vld [vmem:[#allocation6 + $0x498] sm:$0xff] }
 0x29c   : > { %5381 = vmatmul.mubr.bf16.gmra.mrb[92].mxu0 %v11107_v25  ;;  %6323 = vmatprep.subr.bf16.mxu1 %v8272_v46  ;;  %v1976_v46 = vld [vmem:[#allocation6 + $0x4b8] sm:$0xff] }
 0x29d   : > { %5833 = vmatmul.mubr.bf16.gmra.mrb[92].mxu1 %v11107_v25  ;;  %5872 = vmatpush1.bf16.msra.mxu0 %v8269_v29  ;;  %v1979_v29 = vld [vmem:[#allocation6 + $0x4d0] sm:$0xff]  ;;  %v8304_v7 = vcombine.high %v1972_v16, %v1976_v46 }
 0x29e   : > { %5875 = vmatprep.mubr.bf16.mxu0 %v10260_v3  ;;  %6327 = vmatprep.mubr.bf16.mxu1 %v10260_v3  ;;  %v8296_v3 = vcombine.high %v1964_v37, %v1968_v27  ;;  %v8310_v0 = vcombine.high %v1979_v29, %v1983_v10  ;;  %v8309_v41 = vcombine.low %v1979_v29, %v1983_v10  ;;  %v2008_v29 = vld [vmem:[#allocation6 + $0x5b8] sm:$0xff] }
 0x29f   : > { %6324 = vmatpush1.bf16.msra.mxu1 %v8271_v49  ;;  %5873 = vmatprep.subr.bf16.mxu0 %v8278_v60  ;;  %v8301_v49 = vcombine.low %v1971_v19, %v1975_v34  ;;  %v1980_v60 = vld [vmem:[#allocation6 + $0x4d8] sm:$0xff] }
 0x2a0   : > { %6325 = vmatprep.subr.bf16.mxu1 %v8280_v62  ;;  %v8303_v62 = vcombine.low %v1972_v16, %v1976_v46  ;;  %v8311_v12 = vcombine.low %v1980_v60, %v1984_v33  ;;  %v12102_v46 = vld [vmem:[#allocation21_spill] sm:$0xff] }
 0x2a1   : > { %5874 = vmatpush1.bf16.msra.mxu0 %v8277_v9  ;;  %v1987_v9 = vld [vmem:[#allocation6 + $0x510] sm:$0xff] }
 0x2a2   : > { %5956 = vmatprep.subr.bf16.mxu0 %v8286_v52  ;;  %v1988_v52 = vld [vmem:[#allocation6 + $0x518] sm:$0xff] }
 0x2a3   : > { %6326 = vmatpush1.bf16.msra.mxu1 %v8279_v14  ;;  %v1992_v14 = vld [vmem:[#allocation6 + $0x538] sm:$0xff] }
 0x2a4   : > { %5876 = vmatmul.mubr.bf16.vlgmr.msra.gmra.mrb[96].mxu0 %v10245_v58  ;;  %6408 = vmatprep.subr.bf16.mxu1 %v8288_v43  ;;  %v1995_v43 = vld [vmem:[#allocation6 + $0x550] sm:$0xff]  ;;  %v8320_v37 = vcombine.high %v1988_v52, %v1992_v14  ;;  %v8319_v34 = vcombine.low %v1988_v52, %v1992_v14  ;;  %v12103_v52 = vld [vmem:[#allocation20_spill] sm:$0xff] }
 0x2a5   : > { %5957 = vmatpush1.bf16.msra.mxu0 %v8285_v40  ;;  %5885 = vmatprep.mubr.bf16.mxu0 %v10325_v56  ;;  %v1999_v40 = vld [vmem:[#allocation6 + $0x570] sm:$0xff] }
 0x2a6   : > { %6328 = vmatmul.mubr.bf16.vlgmr.msra.gmra.mrb[96].mxu1 %v10245_v58  ;;  %5958 = vmatprep.subr.bf16.mxu0 %v8294_v17  ;;  %v1991_v58 = vld [vmem:[#allocation6 + $0x530] sm:$0xff]  ;;  %v1996_v17 = vld [vmem:[#allocation6 + $0x558] sm:$0xff]  ;;  %v8326_v19 = vcombine.high %v1995_v43, %v1999_v40 }
 0x2a7   : > { %6337 = vmatprep.mubr.bf16.mxu1 %v10325_v56  ;;  %6409 = vmatpush1.bf16.msra.mxu1 %v8287_v39  ;;  %v8312_v56 = vcombine.high %v1980_v60, %v1984_v33  ;;  %v8318_v8 = vcombine.high %v1987_v9, %v1991_v58  ;;  %v8317_v27 = vcombine.low %v1987_v9, %v1991_v58  ;;  %v2000_v39 = vld [vmem:[#allocation6 + $0x578] sm:$0xff]  ;;  %v2015_v60 = vld [vmem:[#allocation6 + $0x5f0] sm:$0xff] }
 0x2a8   : > { %6410 = vmatprep.subr.bf16.mxu1 %v8296_v3  ;;  %v2003_v3 = vld [vmem:[#allocation6 + $0x590] sm:$0xff]  ;;  %v8328_v16 = vcombine.high %v1996_v17, %v2000_v39  ;;  %v2016_v9 = vld [vmem:[#allocation6 + $0x5f8] sm:$0xff] }
 0x2a9   : > { %5959 = vmatpush1.bf16.msra.mxu0 %v8293_v13  ;;  %v12101_v13 = vld [vmem:[#allocation16_spill] sm:$0xff] }
 0x2aa   : > { %5960 = vmatprep.subr.bf16.mxu0 %v8302_v11  ;;  %v8325_v11 = vcombine.low %v1995_v43, %v1999_v40  ;;  %v2020_v43 = vld [vmem:[#allocation6 + $0x618] sm:$0xff] }
 0x2ab   : > { %6411 = vmatpush1.bf16.msra.mxu1 %v8295_v48  ;;  %v2004_v48 = vld [vmem:[#allocation6 + $0x598] sm:$0xff] }
 0x2ac   : > { %5886 = vmatmul.mubr.bf16.gmra.mrb[100].mxu0 %v10315_v47  ;;  %6412 = vmatprep.subr.bf16.mxu1 %v8304_v7  ;;  %v8327_v7 = vcombine.low %v1996_v17, %v2000_v39  ;;  %v8336_v33 = vcombine.high %v2004_v48, %v2008_v29  ;;  %v2024_v40 = vld [vmem:[#allocation6 + $0x638] sm:$0xff]  ;;  %v2027_v17 = vld [vmem:[#allocation6 + $0x650] sm:$0xff] }
 0x2ad   : > { %5961 = vmatpush1.bf16.msra.mxu0 %v8301_v49  ;;  %5895 = vmatprep.mubr.bf16.mxu0 %v12100_v45  ;;  %v2011_v49 = vld [vmem:[#allocation6 + $0x5d0] sm:$0xff] }
 0x2ae   : > { %6338 = vmatmul.mubr.bf16.gmra.mrb[100].mxu1 %v10315_v47  ;;  %5962 = vmatprep.subr.bf16.mxu0 %v8310_v0  ;;  %v2007_v47 = vld [vmem:[#allocation6 + $0x5b0] sm:$0xff]  ;;  %v8342_v58 = vcombine.high %v2011_v49, %v2015_v60 }
 0x2af   : > { %6347 = vmatprep.mubr.bf16.mxu1 %v12100_v45  ;;  %6413 = vmatpush1.bf16.msra.mxu1 %v8303_v62  ;;  %v8334_v10 = vcombine.high %v2003_v3, %v2007_v47  ;;  %v8333_v0 = vcombine.low %v2003_v3, %v2007_v47  ;;  %v2012_v62 = vld [vmem:[#allocation6 + $0x5d8] sm:$0xff]  ;;  %v2019_v45 = vld [vmem:[#allocation6 + $0x610] sm:$0xff] }
 0x2b0   : > { %6414 = vmatprep.subr.bf16.mxu1 %v8312_v56  ;;  %v8335_v56 = vcombine.low %v2004_v48, %v2008_v29  ;;  %v8344_v14 = vcombine.high %v2012_v62, %v2016_v9  ;;  %v2031_v39 = vld [vmem:[#allocation6 + $0x670] sm:$0xff]  ;;  %v2028_v3 = vld [vmem:[#allocation6 + $0x658] sm:$0xff]  ;;  %v12105_v48 = vld [vmem:[#allocation24_spill] sm:$0xff] }
 0x2b1   : > { %5963 = vmatpush1.bf16.msra.mxu0 %v8309_v41  ;;  %v2023_v41 = vld [vmem:[#allocation6 + $0x630] sm:$0xff]  ;;  %v2032_v47 = vld [vmem:[#allocation6 + $0x678] sm:$0xff] }
 0x2b2   : > { %5964 = vmatprep.subr.bf16.mxu0 %v8318_v8  ;;  %v12104_v8 = vld [vmem:[#allocation25_spill] sm:$0xff]  ;;  %v8360_v29 = vcombine.high %v2028_v3, %v2032_v47 }
 0x2b3   : > { %6415 = vmatpush1.bf16.msra.mxu1 %v8311_v12  ;;  %v8341_v12 = vcombine.low %v2011_v49, %v2015_v60  ;;  %v2036_v49 = vld [vmem:[#allocation6 + $0x698] sm:$0xff] }
 0x2b4   : > { %5896 = vmatmul.mubr.bf16.gmra.mrb[104].mxu0 %v12101_v13  ;;  %6416 = vmatprep.subr.bf16.mxu1 %v8320_v37  ;;  %v8350_v37 = vcombine.high %v2019_v45, %v2023_v41  ;;  %v2040_v60 = vld [vmem:[#allocation6 + $0x6b8] sm:$0xff] }
 0x2b5   : > { %5965 = vmatpush1.bf16.msra.mxu0 %v8317_v27  ;;  %5905 = vmatprep.mubr.bf16.mxu0 %v12102_v46  ;;  %v8343_v27 = vcombine.low %v2012_v62, %v2016_v9  ;;  %v2043_v62 = vld [vmem:[#allocation6 + $0x6d0] sm:$0xff] }
 0x2b6   : > { %6348 = vmatmul.mubr.bf16.gmra.mrb[104].mxu1 %v12101_v13  ;;  %5966 = vmatprep.subr.bf16.mxu0 %v8326_v19  ;;  %v8352_v19 = vcombine.high %v2020_v43, %v2024_v40  ;;  %v8358_v13 = vcombine.high %v2027_v17, %v2031_v39  ;;  %v2047_v9 = vld [vmem:[#allocation6 + $0x6f0] sm:$0xff] }
 0x2b7   : > { %6357 = vmatprep.mubr.bf16.mxu1 %v12102_v46  ;;  %6417 = vmatpush1.bf16.msra.mxu1 %v8319_v34  ;;  %v8349_v34 = vcombine.low %v2019_v45, %v2023_v41  ;;  %v2035_v46 = vld [vmem:[#allocation6 + $0x690] sm:$0xff]  ;;  %v2044_v45 = vld [vmem:[#allocation6 + $0x6d8] sm:$0xff] }
 0x2b8   : > { %6418 = vmatprep.subr.bf16.mxu1 %v8328_v16  ;;  %v8351_v16 = vcombine.low %v2020_v43, %v2024_v40  ;;  %v2048_v41 = vld [vmem:[#allocation6 + $0x6f8] sm:$0xff]  ;;  %v12107_v43 = vld [vmem:[#allocation28_spill] sm:$0xff] }
 0x2b9   : > { %5967 = vmatpush1.bf16.msra.mxu0 %v8325_v11  ;;  %v2039_v11 = vld [vmem:[#allocation6 + $0x6b0] sm:$0xff]  ;;  %v8376_v40 = vcombine.high %v2044_v45, %v2048_v41 }
 0x2ba   : > { %5968 = vmatprep.subr.bf16.mxu0 %v8334_v10  ;;  %v12106_v10 = vld [vmem:[#allocation29_spill] sm:$0xff] }
 0x2bb   : > { %6419 = vmatpush1.bf16.msra.mxu1 %v8327_v7  ;;  %v8357_v7 = vcombine.low %v2027_v17, %v2031_v39  ;;  %v2052_v17 = vld [vmem:[#allocation6 + $0x718] sm:$0xff] }
 0x2bc   : > { %5906 = vmatmul.mubr.bf16.gmra.mrb[108].mxu0 %v12103_v52  ;;  %6420 = vmatprep.subr.bf16.mxu1 %v8336_v33  ;;  %v8366_v33 = vcombine.high %v2035_v46, %v2039_v11  ;;  %v2056_v39 = vld [vmem:[#allocation6 + $0x738] sm:$0xff] }
 0x2bd   : > { %5969 = vmatpush1.bf16.msra.mxu0 %v8333_v0  ;;  %5915 = vmatprep.mubr.bf16.mxu0 %v12104_v8  ;;  %v8359_v0 = vcombine.low %v2028_v3, %v2032_v47  ;;  %v2059_v3 = vld [vmem:[#allocation6 + $0x750] sm:$0xff] }
 0x2be   : > { %6358 = vmatmul.mubr.bf16.gmra.mrb[108].mxu1 %v12103_v52  ;;  %5970 = vmatprep.subr.bf16.mxu0 %v8342_v58  ;;  %v8368_v58 = vcombine.high %v2036_v49, %v2040_v60  ;;  %v8374_v52 = vcombine.high %v2043_v62, %v2047_v9  ;;  %v2063_v47 = vld [vmem:[#allocation6 + $0x770] sm:$0xff] }
 0x2bf   : > { %6367 = vmatprep.mubr.bf16.mxu1 %v12104_v8  ;;  %6421 = vmatpush1.bf16.msra.mxu1 %v8335_v56  ;;  %v8365_v56 = vcombine.low %v2035_v46, %v2039_v11  ;;  %v2051_v8 = vld [vmem:[#allocation6 + $0x710] sm:$0xff]  ;;  %v2060_v46 = vld [vmem:[#allocation6 + $0x758] sm:$0xff] }
 0x2c0   : > { %6422 = vmatprep.subr.bf16.mxu1 %v8344_v14  ;;  %v8367_v14 = vcombine.low %v2036_v49, %v2040_v60  ;;  %v2064_v11 = vld [vmem:[#allocation6 + $0x778] sm:$0xff]  ;;  %v12109_v49 = vld [vmem:[#allocation32_spill] sm:$0xff] }
 0x2c1   : > { %5971 = vmatpush1.bf16.msra.mxu0 %v8341_v12  ;;  %v2055_v12 = vld [vmem:[#allocation6 + $0x730] sm:$0xff]  ;;  %v8392_v60 = vcombine.high %v2060_v46, %v2064_v11 }
 0x2c2   : > { %5972 = vmatprep.subr.bf16.mxu0 %v8350_v37  ;;  %v12108_v37 = vld [vmem:[#allocation33_spill] sm:$0xff] }
 0x2c3   : > { %6423 = vmatpush1.bf16.msra.mxu1 %v8343_v27  ;;  %v8373_v27 = vcombine.low %v2043_v62, %v2047_v9  ;;  %v2068_v62 = vld [vmem:[#allocation6 + $0x798] sm:$0xff] }
 0x2c4   : > { %5916 = vmatmul.mubr.bf16.gmra.mrb[112].mxu0 %v12105_v48  ;;  %6424 = vmatprep.subr.bf16.mxu1 %v8352_v19  ;;  %v8382_v19 = vcombine.high %v2051_v8, %v2055_v12  ;;  %v2072_v9 = vld [vmem:[#allocation6 + $0x7b8] sm:$0xff] }
 0x2c5   : > { %5973 = vmatpush1.bf16.msra.mxu0 %v8349_v34  ;;  %5925 = vmatprep.mubr.bf16.mxu0 %v12106_v10  ;;  %v8375_v34 = vcombine.low %v2044_v45, %v2048_v41  ;;  %v2075_v45 = vld [vmem:[#allocation6 + $0x7d0] sm:$0xff] }
 0x2c6   : > { %6368 = vmatmul.mubr.bf16.gmra.mrb[112].mxu1 %v12105_v48  ;;  %5974 = vmatprep.subr.bf16.mxu0 %v8358_v13  ;;  %v8384_v13 = vcombine.high %v2052_v17, %v2056_v39  ;;  %v8390_v48 = vcombine.high %v2059_v3, %v2063_v47  ;;  %v2079_v41 = vld [vmem:[#allocation6 + $0x7f0] sm:$0xff] }
 0x2c7   : > { %6377 = vmatprep.mubr.bf16.mxu1 %v12106_v10  ;;  %6425 = vmatpush1.bf16.msra.mxu1 %v8351_v16  ;;  %v8381_v16 = vcombine.low %v2051_v8, %v2055_v12  ;;  %v2067_v10 = vld [vmem:[#allocation6 + $0x790] sm:$0xff]  ;;  %v2076_v8 = vld [vmem:[#allocation6 + $0x7d8] sm:$0xff] }
 0x2c8   : > { %6426 = vmatprep.subr.bf16.mxu1 %v8360_v29  ;;  %v8383_v29 = vcombine.low %v2052_v17, %v2056_v39  ;;  %v2080_v12 = vld [vmem:[#allocation6 + $0x7f8] sm:$0xff]  ;;  %v12111_v17 = vld [vmem:[#allocation36_spill] sm:$0xff] }
 0x2c9   : > { %5975 = vmatpush1.bf16.msra.mxu0 %v8357_v7  ;;  %v2071_v7 = vld [vmem:[#allocation6 + $0x7b0] sm:$0xff]  ;;  %v8408_v39 = vcombine.high %v2076_v8, %v2080_v12 }
 0x2ca   : > { %5976 = vmatprep.subr.bf16.mxu0 %v8366_v33  ;;  %v12110_v33 = vld [vmem:[#allocation37_spill] sm:$0xff] }
 0x2cb   : > { %6427 = vmatpush1.bf16.msra.mxu1 %v8359_v0  ;;  %v8389_v0 = vcombine.low %v2059_v3, %v2063_v47  ;;  %v2084_v3 = vld [vmem:[#allocation6 + $0x818] sm:$0xff] }
 0x2cc   : > { %5926 = vmatmul.mubr.bf16.gmra.mrb[116].mxu0 %v12107_v43  ;;  %6428 = vmatprep.subr.bf16.mxu1 %v8368_v58  ;;  %v8398_v58 = vcombine.high %v2067_v10, %v2071_v7  ;;  %v2088_v47 = vld [vmem:[#allocation6 + $0x838] sm:$0xff] }
 0x2cd   : > { %5977 = vmatpush1.bf16.msra.mxu0 %v8365_v56  ;;  %5935 = vmatprep.mubr.bf16.mxu0 %v12108_v37  ;;  %v8391_v56 = vcombine.low %v2060_v46, %v2064_v11  ;;  %v2091_v46 = vld [vmem:[#allocation6 + $0x850] sm:$0xff] }
 0x2ce   : > { %6378 = vmatmul.mubr.bf16.gmra.mrb[116].mxu1 %v12107_v43  ;;  %5978 = vmatprep.subr.bf16.mxu0 %v8374_v52  ;;  %v8400_v52 = vcombine.high %v2068_v62, %v2072_v9  ;;  %v8406_v43 = vcombine.high %v2075_v45, %v2079_v41  ;;  %v2095_v11 = vld [vmem:[#allocation6 + $0x870] sm:$0xff] }
 0x2cf   : > { %6387 = vmatprep.mubr.bf16.mxu1 %v12108_v37  ;;  %6429 = vmatpush1.bf16.msra.mxu1 %v8367_v14  ;;  %v8397_v14 = vcombine.low %v2067_v10, %v2071_v7  ;;  %v2083_v37 = vld [vmem:[#allocation6 + $0x810] sm:$0xff]  ;;  %v2092_v10 = vld [vmem:[#allocation6 + $0x858] sm:$0xff] }
 0x2d0   : > { %6430 = vmatprep.subr.bf16.mxu1 %v8376_v40  ;;  %v8399_v40 = vcombine.low %v2068_v62, %v2072_v9  ;;  %v2096_v7 = vld [vmem:[#allocation6 + $0x878] sm:$0xff] }
 0x2d1   : > { %5979 = vmatpush1.bf16.msra.mxu0 %v8373_v27  ;;  %v2087_v27 = vld [vmem:[#allocation6 + $0x830] sm:$0xff]  ;;  %v8424_v9 = vcombine.high %v2092_v10, %v2096_v7 }
 0x2d2   : > { %5980 = vmatprep.subr.bf16.mxu0 %v8382_v19  ;;  %v12112_v19 = vld [vmem:[#allocation15_spill] sm:$0xff]  ;;  %v12113_v62 = vld [vmem:[#allocation14_spill] sm:$0xff] }
 0x2d3   : > { %6431 = vmatpush1.bf16.msra.mxu1 %v8375_v34  ;;  %v8405_v34 = vcombine.low %v2075_v45, %v2079_v41  ;;  %v2100_v45 = vld [vmem:[#allocation6 + $0x898] sm:$0xff] }
 0x2d4   : > { %5936 = vmatmul.mubr.bf16.gmra.mrb[120].mxu0 %v12109_v49  ;;  %6432 = vmatprep.subr.bf16.mxu1 %v8384_v13  ;;  %v8414_v13 = vcombine.high %v2083_v37, %v2087_v27  ;;  %v2104_v41 = vld [vmem:[#allocation6 + $0x8b8] sm:$0xff] }
 0x2d5   : > { %5981 = vmatpush1.bf16.msra.mxu0 %v8381_v16  ;;  %5945 = vmatprep.mubr.bf16.mxu0 %v12110_v33  ;;  %v8407_v16 = vcombine.low %v2076_v8, %v2080_v12  ;;  %v2107_v8 = vld [vmem:[#allocation6 + $0x8d0] sm:$0xff] }
 0x2d6   : > { %6388 = vmatmul.mubr.bf16.gmra.mrb[120].mxu1 %v12109_v49  ;;  %5982 = vmatprep.subr.bf16.mxu0 %v8390_v48  ;;  %v8416_v48 = vcombine.high %v2084_v3, %v2088_v47  ;;  %v8422_v49 = vcombine.high %v2091_v46, %v2095_v11  ;;  %v2111_v12 = vld [vmem:[#allocation6 + $0x8f0] sm:$0xff] }
 0x2d7   : > { %6397 = vmatprep.mubr.bf16.mxu1 %v12110_v33  ;;  %6433 = vmatpush1.bf16.msra.mxu1 %v8383_v29  ;;  %v8413_v29 = vcombine.low %v2083_v37, %v2087_v27  ;;  %v2099_v33 = vld [vmem:[#allocation6 + $0x890] sm:$0xff]  ;;  %v2108_v37 = vld [vmem:[#allocation6 + $0x8d8] sm:$0xff] }
 0x2d8   : > { %6434 = vmatprep.subr.bf16.mxu1 %v8392_v60  ;;  %v8415_v60 = vcombine.low %v2084_v3, %v2088_v47  ;;  %v2112_v27 = vld [vmem:[#allocation6 + $0x8f8] sm:$0xff] }
 0x2d9   : > { %5983 = vmatpush1.bf16.msra.mxu0 %v8389_v0  ;;  %v2103_v0 = vld [vmem:[#allocation6 + $0x8b0] sm:$0xff]  ;;  %v8440_v47 = vcombine.high %v2108_v37, %v2112_v27 }
 0x2da   : > { %5984 = vmatprep.subr.bf16.mxu0 %v8398_v58  ;;  %v12114_v58 = vld [vmem:[#allocation19_spill] sm:$0xff]  ;;  %v12115_v3 = vld [vmem:[#allocation18_spill] sm:$0xff] }
 0x2db   : > { %6435 = vmatpush1.bf16.msra.mxu1 %v8391_v56  ;;  %v8421_v56 = vcombine.low %v2091_v46, %v2095_v11  ;;  %v2116_v46 = vld [vmem:[#allocation6 + $0x918] sm:$0xff] }
 0x2dc   : > { %5946 = vmatmul.mubr.bf16.gmra.mrb[124].mxu0 %v12111_v17  ;;  %6436 = vmatprep.subr.bf16.mxu1 %v8400_v52  ;;  %v8430_v52 = vcombine.high %v2099_v33, %v2103_v0  ;;  %v2120_v11 = vld [vmem:[#allocation6 + $0x938] sm:$0xff] }
 0x2dd   : > { %5985 = vmatpush1.bf16.msra.mxu0 %v8397_v14  ;;  %5988 = vmatprep.mubr.bf16.mxu0 %v12112_v19  ;;  %v8423_v14 = vcombine.low %v2092_v10, %v2096_v7  ;;  %v2123_v10 = vld [vmem:[#allocation6 + $0x950] sm:$0xff] }
 0x2de   : > { %6398 = vmatmul.mubr.bf16.gmra.mrb[124].mxu1 %v12111_v17  ;;  %5986 = vmatprep.subr.bf16.mxu0 %v8406_v43  ;;  %v8432_v43 = vcombine.high %v2100_v45, %v2104_v41  ;;  %v8438_v17 = vcombine.high %v2107_v8, %v2111_v12  ;;  %v2127_v7 = vld [vmem:[#allocation6 + $0x970] sm:$0xff] }
 0x2df   : > { %6437 = vmatpush1.bf16.msra.mxu1 %v8399_v40  ;;  %6440 = vmatprep.mubr.bf16.mxu1 %v12112_v19  ;;  %v8429_v40 = vcombine.low %v2099_v33, %v2103_v0  ;;  %v2115_v19 = vld [vmem:[#allocation6 + $0x910] sm:$0xff]  ;;  %v2124_v33 = vld [vmem:[#allocation6 + $0x958] sm:$0xff] }
 0x2e0   : > { %6438 = vmatprep.subr.bf16.mxu1 %v8408_v39  ;;  %v8431_v39 = vcombine.low %v2100_v45, %v2104_v41  ;;  %v2128_v0 = vld [vmem:[#allocation6 + $0x978] sm:$0xff] }
 0x2e1   : > { %5987 = vmatpush1.bf16.msra.mxu0 %v8405_v34  ;;  %v2119_v34 = vld [vmem:[#allocation6 + $0x930] sm:$0xff]  ;;  %v8456_v41 = vcombine.high %v2124_v33, %v2128_v0 }
 0x2e2   : > { %6069 = vmatprep.subr.bf16.mxu0 %v8414_v13  ;;  %v12116_v13 = vld [vmem:[#allocation23_spill] sm:$0xff]  ;;  %v12117_v45 = vld [vmem:[#allocation22_spill] sm:$0xff] }
 0x2e3   : > { %6439 = vmatpush1.bf16.msra.mxu1 %v8407_v16  ;;  %v8437_v16 = vcombine.low %v2107_v8, %v2111_v12  ;;  %v2132_v8 = vld [vmem:[#allocation6 + $0x998] sm:$0xff] }
 0x2e4   : > { %5989 = vmatmul.mubr.bf16.vlgmr.msra.gmra.mrb[96].mxu0 %v12113_v62  ;;  %6521 = vmatprep.subr.bf16.mxu1 %v8416_v48  ;;  %v8446_v48 = vcombine.high %v2115_v19, %v2119_v34  ;;  %v2136_v12 = vld [vmem:[#allocation6 + $0x9b8] sm:$0xff] }
 0x2e5   : > { %6070 = vmatpush1.bf16.msra.mxu0 %v8413_v29  ;;  %5998 = vmatprep.mubr.bf16.mxu0 %v12114_v58  ;;  %v8439_v29 = vcombine.low %v2108_v37, %v2112_v27  ;;  %v2139_v37 = vld [vmem:[#allocation6 + $0x9d0] sm:$0xff] }
 0x2e6   : > { %6441 = vmatmul.mubr.bf16.vlgmr.msra.gmra.mrb[96].mxu1 %v12113_v62  ;;  %6071 = vmatprep.subr.bf16.mxu0 %v8422_v49  ;;  %v8448_v49 = vcombine.high %v2116_v46, %v2120_v11  ;;  %v8454_v62 = vcombine.high %v2123_v10, %v2127_v7  ;;  %v2143_v27 = vld [vmem:[#allocation6 + $0x9f0] sm:$0xff] }
 0x2e7   : > { %6450 = vmatprep.mubr.bf16.mxu1 %v12114_v58  ;;  %6522 = vmatpush1.bf16.msra.mxu1 %v8415_v60  ;;  %v8445_v60 = vcombine.low %v2115_v19, %v2119_v34  ;;  %v2131_v58 = vld [vmem:[#allocation6 + $0x990] sm:$0xff]  ;;  %v2140_v19 = vld [vmem:[#allocation6 + $0x9d8] sm:$0xff] }
 0x2e8   : > { %6523 = vmatprep.subr.bf16.mxu1 %v8424_v9  ;;  %v8447_v9 = vcombine.low %v2116_v46, %v2120_v11  ;;  %v2144_v34 = vld [vmem:[#allocation6 + $0x9f8] sm:$0xff] }
 0x2e9   : > { %6072 = vmatpush1.bf16.msra.mxu0 %v8421_v56  ;;  %v2135_v56 = vld [vmem:[#allocation6 + $0x9b0] sm:$0xff]  ;;  %v8472_v11 = vcombine.high %v2140_v19, %v2144_v34 }
 0x2ea   : > { %6073 = vmatprep.subr.bf16.mxu0 %v8430_v52  ;;  %v12118_v52 = vld [vmem:[#allocation27_spill] sm:$0xff]  ;;  %v12119_v46 = vld [vmem:[#allocation26_spill] sm:$0xff] }
 0x2eb   : > { %6524 = vmatpush1.bf16.msra.mxu1 %v8423_v14  ;;  %v8453_v14 = vcombine.low %v2123_v10, %v2127_v7  ;;  %v2148_v10 = vld [vmem:[#allocation6 + $0xa18] sm:$0xff] }
 0x2ec   : > { %5999 = vmatmul.mubr.bf16.gmra.mrb[100].mxu0 %v12115_v3  ;;  %6525 = vmatprep.subr.bf16.mxu1 %v8432_v43  ;;  %v8462_v43 = vcombine.high %v2131_v58, %v2135_v56  ;;  %v2152_v7 = vld [vmem:[#allocation6 + $0xa38] sm:$0xff] }
 0x2ed   : > { %6074 = vmatpush1.bf16.msra.mxu0 %v8429_v40  ;;  %6008 = vmatprep.mubr.bf16.mxu0 %v12116_v13  ;;  %v8455_v40 = vcombine.low %v2124_v33, %v2128_v0  ;;  %v2155_v33 = vld [vmem:[#allocation6 + $0xa50] sm:$0xff] }
 0x2ee   : > { %6451 = vmatmul.mubr.bf16.gmra.mrb[100].mxu1 %v12115_v3  ;;  %6075 = vmatprep.subr.bf16.mxu0 %v8438_v17  ;;  %v8464_v17 = vcombine.high %v2132_v8, %v2136_v12  ;;  %v8470_v3 = vcombine.high %v2139_v37, %v2143_v27  ;;  %v2159_v0 = vld [vmem:[#allocation6 + $0xa70] sm:$0xff] }
 0x2ef   : > { %6460 = vmatprep.mubr.bf16.mxu1 %v12116_v13  ;;  %6526 = vmatpush1.bf16.msra.mxu1 %v8431_v39  ;;  %v8461_v39 = vcombine.low %v2131_v58, %v2135_v56  ;;  %v2147_v13 = vld [vmem:[#allocation6 + $0xa10] sm:$0xff]  ;;  %v2156_v58 = vld [vmem:[#allocation6 + $0xa58] sm:$0xff] }
 0x2f0   : > { %6527 = vmatprep.subr.bf16.mxu1 %v8440_v47  ;;  %v8463_v47 = vcombine.low %v2132_v8, %v2136_v12  ;;  %v2160_v56 = vld [vmem:[#allocation6 + $0xa78] sm:$0xff] }
 0x2f1   : > { %6076 = vmatpush1.bf16.msra.mxu0 %v8437_v16  ;;  %v2151_v16 = vld [vmem:[#allocation6 + $0xa30] sm:$0xff]  ;;  %v8488_v12 = vcombine.high %v2156_v58, %v2160_v56 }
 0x2f2   : > { %6077 = vmatprep.subr.bf16.mxu0 %v8446_v48  ;;  %v12120_v48 = vld [vmem:[#allocation31_spill] sm:$0xff]  ;;  %v12121_v8 = vld [vmem:[#allocation30_spill] sm:$0xff] }
 0x2f3   : > { %6528 = vmatpush1.bf16.msra.mxu1 %v8439_v29  ;;  %v8469_v29 = vcombine.low %v2139_v37, %v2143_v27  ;;  %v2164_v37 = vld [vmem:[#allocation6 + $0xa98] sm:$0xff] }
 0x2f4   : > { %6009 = vmatmul.mubr.bf16.gmra.mrb[104].mxu0 %v12117_v45  ;;  %6529 = vmatprep.subr.bf16.mxu1 %v8448_v49  ;;  %v8478_v49 = vcombine.high %v2147_v13, %v2151_v16  ;;  %v2168_v27 = vld [vmem:[#allocation6 + $0xab8] sm:$0xff] }
 0x2f5   : > { %6078 = vmatpush1.bf16.msra.mxu0 %v8445_v60  ;;  %6018 = vmatprep.mubr.bf16.mxu0 %v12118_v52  ;;  %v8471_v60 = vcombine.low %v2140_v19, %v2144_v34  ;;  %v2171_v19 = vld [vmem:[#allocation6 + $0xad0] sm:$0xff] }
 0x2f6   : > { %6461 = vmatmul.mubr.bf16.gmra.mrb[104].mxu1 %v12117_v45  ;;  %6079 = vmatprep.subr.bf16.mxu0 %v8454_v62  ;;  %v8480_v62 = vcombine.high %v2148_v10, %v2152_v7  ;;  %v8486_v45 = vcombine.high %v2155_v33, %v2159_v0  ;;  %v2175_v34 = vld [vmem:[#allocation6 + $0xaf0] sm:$0xff] }
 0x2f7   : > { %6470 = vmatprep.mubr.bf16.mxu1 %v12118_v52  ;;  %6530 = vmatpush1.bf16.msra.mxu1 %v8447_v9  ;;  %v8477_v9 = vcombine.low %v2147_v13, %v2151_v16  ;;  %v2163_v52 = vld [vmem:[#allocation6 + $0xa90] sm:$0xff]  ;;  %v2172_v13 = vld [vmem:[#allocation6 + $0xad8] sm:$0xff] }
 0x2f8   : > { %6531 = vmatprep.subr.bf16.mxu1 %v8456_v41  ;;  %v8479_v41 = vcombine.low %v2148_v10, %v2152_v7  ;;  %v2176_v16 = vld [vmem:[#allocation6 + $0xaf8] sm:$0xff] }
 0x2f9   : > { %6080 = vmatpush1.bf16.msra.mxu0 %v8453_v14  ;;  %v2167_v14 = vld [vmem:[#allocation6 + $0xab0] sm:$0xff]  ;;  %v8504_v7 = vcombine.high %v2172_v13, %v2176_v16 }
 0x2fa   : > { %6081 = vmatprep.subr.bf16.mxu0 %v8462_v43  ;;  %v12122_v43 = vld [vmem:[#allocation35_spill] sm:$0xff]  ;;  %v12123_v10 = vld [vmem:[#allocation34_spill] sm:$0xff] }
 0x2fb   : > { %6532 = vmatpush1.bf16.msra.mxu1 %v8455_v40  ;;  %v8485_v40 = vcombine.low %v2155_v33, %v2159_v0  ;;  %v2180_v33 = vld [vmem:[#allocation6 + $0xb18] sm:$0xff] }
 0x2fc   : > { %6019 = vmatmul.mubr.bf16.gmra.mrb[108].mxu0 %v12119_v46  ;;  %6533 = vmatprep.subr.bf16.mxu1 %v8464_v17  ;;  %v8494_v17 = vcombine.high %v2163_v52, %v2167_v14  ;;  %v2184_v0 = vld [vmem:[#allocation6 + $0xb38] sm:$0xff] }
 0x2fd   : > { %6082 = vmatpush1.bf16.msra.mxu0 %v8461_v39  ;;  %6028 = vmatprep.mubr.bf16.mxu0 %v12120_v48  ;;  %v8487_v39 = vcombine.low %v2156_v58, %v2160_v56  ;;  %v2187_v58 = vld [vmem:[#allocation6 + $0xb50] sm:$0xff] }
 0x2fe   : > { %6471 = vmatmul.mubr.bf16.gmra.mrb[108].mxu1 %v12119_v46  ;;  %6083 = vmatprep.subr.bf16.mxu0 %v8470_v3  ;;  %v8496_v3 = vcombine.high %v2164_v37, %v2168_v27  ;;  %v8502_v46 = vcombine.high %v2171_v19, %v2175_v34  ;;  %v2191_v56 = vld [vmem:[#allocation6 + $0xb70] sm:$0xff] }
 0x2ff   : > { %6480 = vmatprep.mubr.bf16.mxu1 %v12120_v48  ;;  %6534 = vmatpush1.bf16.msra.mxu1 %v8463_v47  ;;  %v8493_v47 = vcombine.low %v2163_v52, %v2167_v14  ;;  %v2179_v48 = vld [vmem:[#allocation6 + $0xb10] sm:$0xff]  ;;  %v2188_v52 = vld [vmem:[#allocation6 + $0xb58] sm:$0xff] }
 0x300   : > { %6535 = vmatprep.subr.bf16.mxu1 %v8472_v11  ;;  %v8495_v11 = vcombine.low %v2164_v37, %v2168_v27  ;;  %v2192_v14 = vld [vmem:[#allocation6 + $0xb78] sm:$0xff] }
 0x301   : > { %6084 = vmatpush1.bf16.msra.mxu0 %v8469_v29  ;;  %v2183_v29 = vld [vmem:[#allocation6 + $0xb30] sm:$0xff]  ;;  %v8520_v27 = vcombine.high %v2188_v52, %v2192_v14 }
 0x302   : > { %6085 = vmatprep.subr.bf16.mxu0 %v8478_v49  ;;  %v12124_v49 = vld [vmem:[#allocation39_spill] sm:$0xff]  ;;  %v12125_v37 = vld [vmem:[#allocation38_spill] sm:$0xff] }
 0x303   : > { %6536 = vmatpush1.bf16.msra.mxu1 %v8471_v60  ;;  %v8501_v60 = vcombine.low %v2171_v19, %v2175_v34  ;;  %v2196_v19 = vld [vmem:[#allocation6 + $0xb98] sm:$0xff] }
 0x304   : > { %6029 = vmatmul.mubr.bf16.gmra.mrb[112].mxu0 %v12121_v8  ;;  %6537 = vmatprep.subr.bf16.mxu1 %v8480_v62  ;;  %v8510_v62 = vcombine.high %v2179_v48, %v2183_v29  ;;  %v2200_v34 = vld [vmem:[#allocation6 + $0xbb8] sm:$0xff] }
 0x305   : > { %6086 = vmatpush1.bf16.msra.mxu0 %v8477_v9  ;;  %6038 = vmatprep.mubr.bf16.mxu0 %v12122_v43  ;;  %v8503_v9 = vcombine.low %v2172_v13, %v2176_v16  ;;  %v2203_v13 = vld [vmem:[#allocation6 + $0xbd0] sm:$0xff] }
 0x306   : > { %6481 = vmatmul.mubr.bf16.gmra.mrb[112].mxu1 %v12121_v8  ;;  %6087 = vmatprep.subr.bf16.mxu0 %v8486_v45  ;;  %v8512_v45 = vcombine.high %v2180_v33, %v2184_v0  ;;  %v8518_v8 = vcombine.high %v2187_v58, %v2191_v56  ;;  %v2207_v16 = vld [vmem:[#allocation6 + $0xbf0] sm:$0xff] }
 0x307   : > { %6490 = vmatprep.mubr.bf16.mxu1 %v12122_v43  ;;  %6538 = vmatpush1.bf16.msra.mxu1 %v8479_v41  ;;  %v8509_v41 = vcombine.low %v2179_v48, %v2183_v29  ;;  %v2195_v43 = vld [vmem:[#allocation6 + $0xb90] sm:$0xff]  ;;  %v2204_v48 = vld [vmem:[#allocation6 + $0xbd8] sm:$0xff] }
 0x308   : > { %6539 = vmatprep.subr.bf16.mxu1 %v8488_v12  ;;  %v8511_v12 = vcombine.low %v2180_v33, %v2184_v0  ;;  %v2208_v29 = vld [vmem:[#allocation6 + $0xbf8] sm:$0xff]  ;;  %v12127_v0 = vld [vmem:[#allocation40_spill] sm:$0xff] }
 0x309   : > { %6088 = vmatpush1.bf16.msra.mxu0 %v8485_v40  ;;  %v2199_v40 = vld [vmem:[#allocation6 + $0xbb0] sm:$0xff]  ;;  %v8536_v33 = vcombine.high %v2204_v48, %v2208_v29 }
 0x30a   : > { %6089 = vmatprep.subr.bf16.mxu0 %v8494_v17  ;;  %v12126_v17 = vld [vmem:[#allocation41_spill] sm:$0xff] }
 0x30b   : > { %6540 = vmatpush1.bf16.msra.mxu1 %v8487_v39  ;;  %v8517_v39 = vcombine.low %v2187_v58, %v2191_v56  ;;  %v2216_v58 = vld [vmem:[#allocation6 + $0xc38] sm:$0xff] }
 0x30c   : > { %6039 = vmatmul.mubr.bf16.gmra.mrb[116].mxu0 %v12123_v10  ;;  %6541 = vmatprep.subr.bf16.mxu1 %v8496_v3  ;;  %v8526_v3 = vcombine.high %v2195_v43, %v2199_v40 }
 0x30d   : > { %6090 = vmatpush1.bf16.msra.mxu0 %v8493_v47  ;;  %6048 = vmatprep.mubr.bf16.mxu0 %v12124_v49  ;;  %v8519_v47 = vcombine.low %v2188_v52, %v2192_v14  ;;  %v2223_v52 = vld [vmem:[#allocation6 + $0xc70] sm:$0xff] }
 0x30e   : > { %6491 = vmatmul.mubr.bf16.gmra.mrb[116].mxu1 %v12123_v10  ;;  %6091 = vmatprep.subr.bf16.mxu0 %v8502_v46  ;;  %v8528_v46 = vcombine.high %v2196_v19, %v2200_v34  ;;  %v8534_v10 = vcombine.high %v2203_v13, %v2207_v16 }
 0x30f   : > { %6500 = vmatprep.mubr.bf16.mxu1 %v12124_v49  ;;  %6542 = vmatpush1.bf16.msra.mxu1 %v8495_v11  ;;  %v8525_v11 = vcombine.low %v2195_v43, %v2199_v40  ;;  %v2211_v49 = vld [vmem:[#allocation6 + $0xc10] sm:$0xff]  ;;  %v2224_v43 = vld [vmem:[#allocation6 + $0xc78] sm:$0xff] }
 0x310   : > { %6543 = vmatprep.subr.bf16.mxu1 %v8504_v7  ;;  %v8527_v7 = vcombine.low %v2196_v19, %v2200_v34  ;;  %v2228_v19 = vld [vmem:[#allocation6 + $0xc98] sm:$0xff] }
 0x311   : > { %6092 = vmatpush1.bf16.msra.mxu0 %v8501_v60  ;;  %v2215_v60 = vld [vmem:[#allocation6 + $0xc30] sm:$0xff]  ;;  %v2232_v34 = vld [vmem:[#allocation6 + $0xcb8] sm:$0xff] }
 0x312   : > { %6093 = vmatprep.subr.bf16.mxu0 %v8510_v62  ;;  %v8533_v62 = vcombine.low %v2203_v13, %v2207_v16  ;;  %v8542_v56 = vcombine.high %v2211_v49, %v2215_v60  ;;  %v2235_v13 = vld [vmem:[#allocation6 + $0xcd0] sm:$0xff] }
 0x313   : > { %6544 = vmatpush1.bf16.msra.mxu1 %v8503_v9  ;;  %v2212_v9 = vld [vmem:[#allocation6 + $0xc18] sm:$0xff]  ;;  %v2239_v16 = vld [vmem:[#allocation6 + $0xcf0] sm:$0xff] }
 0x314   : > { %6049 = vmatmul.mubr.bf16.gmra.mrb[120].mxu0 %v12125_v37  ;;  %6545 = vmatprep.subr.bf16.mxu1 %v8512_v45  ;;  %v8535_v45 = vcombine.low %v2204_v48, %v2208_v29  ;;  %v8544_v14 = vcombine.high %v2212_v9, %v2216_v58  ;;  %v2236_v48 = vld [vmem:[#allocation6 + $0xcd8] sm:$0xff] }
 0x315   : > { %6094 = vmatpush1.bf16.msra.mxu0 %v8509_v41  ;;  %6058 = vmatprep.mubr.bf16.mxu0 %v12126_v17  ;;  %v2219_v41 = vld [vmem:[#allocation6 + $0xc50] sm:$0xff]  ;;  %v2240_v29 = vld [vmem:[#allocation6 + $0xcf8] sm:$0xff] }
 0x316   : > { %6501 = vmatmul.mubr.bf16.gmra.mrb[120].mxu1 %v12125_v37  ;;  %6095 = vmatprep.subr.bf16.mxu0 %v8518_v8  ;;  %v8541_v8 = vcombine.low %v2211_v49, %v2215_v60  ;;  %v8550_v40 = vcombine.high %v2219_v41, %v2223_v52  ;;  %v8543_v37 = vcombine.low %v2212_v9, %v2216_v58  ;;  %v2243_v49 = vld [vmem:[#allocation6 + $0xd10] sm:$0xff] }
 0x317   : > { %6510 = vmatprep.mubr.bf16.mxu1 %v12126_v17  ;;  %6546 = vmatpush1.bf16.msra.mxu1 %v8511_v12  ;;  %v2220_v12 = vld [vmem:[#allocation6 + $0xc58] sm:$0xff]  ;;  %v8565_v60 = vcombine.low %v2235_v13, %v2239_v16  ;;  %v8567_v9 = vcombine.low %v2236_v48, %v2240_v29  ;;  %v2251_v58 = vld [vmem:[#allocation6 + $0xd50] sm:$0xff] }
 0x318   : > { %6547 = vmatprep.subr.bf16.mxu1 %v8520_v27  ;;  %v2227_v27 = vld [vmem:[#allocation6 + $0xc90] sm:$0xff]  ;;  %v8552_v17 = vcombine.high %v2220_v12, %v2224_v43 }
 0x319   : > { %6096 = vmatpush1.bf16.msra.mxu0 %v8517_v39  ;;  %v8549_v39 = vcombine.low %v2219_v41, %v2223_v52  ;;  %v2337_v52 = vld [vmem:[#allocation7] sm:$0xff] }
 0x31a   : > { %6097 = vmatprep.subr.bf16.mxu0 %v8526_v3 }
 0x31b   : > { %6548 = vmatpush1.bf16.msra.mxu1 %v8519_v47  ;;  %v8551_v47 = vcombine.low %v2220_v12, %v2224_v43 }
 0x31c   : > { %6059 = vmatmul.mubr.bf16.gmra.mrb[124].mxu0 %v10805_v30  ;;  %6549 = vmatprep.subr.bf16.mxu1 %v8528_v46  ;;  %v8560_v46 = vcombine.high %v2228_v19, %v2232_v34 }
 0x31d   : > { %6098 = vmatpush1.bf16.msra.mxu0 %v8525_v11  ;;  %6101 = vmatprep.mubr.bf16.mxu0 %v12127_v0 }
 0x31e   : > { %6511 = vmatmul.mubr.bf16.gmra.mrb[124].mxu1 %v10805_v30  ;;  %6099 = vmatprep.subr.bf16.mxu0 %v8534_v10  ;;  %v2231_v30 = vld [vmem:[#allocation6 + $0xcb0] sm:$0xff]  ;;  %v8566_v10 = vcombine.high %v2235_v13, %v2239_v16  ;;  %v2264_v13 = vld [vmem:[#allocation6 + $0xdb8] sm:$0xff] }
 0x31f   : > { %6550 = vmatpush1.bf16.msra.mxu1 %v8527_v7  ;;  %6553 = vmatprep.mubr.bf16.mxu1 %v12127_v0  ;;  %v8558_v3 = vcombine.high %v2227_v27, %v2231_v30  ;;  %v8557_v11 = vcombine.low %v2227_v27, %v2231_v30  ;;  %v8559_v7 = vcombine.low %v2228_v19, %v2232_v34  ;;  %v2248_v0 = vld [vmem:[#allocation6 + $0xd38] sm:$0xff] }
 0x320   : > { %6551 = vmatprep.subr.bf16.mxu1 %v8536_v33  ;;  %v2244_v33 = vld [vmem:[#allocation6 + $0xd18] sm:$0xff] }
 0x321   : > { %6100 = vmatpush1.bf16.msra.mxu0 %v8533_v62  ;;  %v8575_v43 = vcombine.low %v2244_v33, %v2248_v0 }
 0x322   : > { %6182 = vmatprep.subr.bf16.mxu0 %v8542_v56  ;;  %v2255_v56 = vld [vmem:[#allocation6 + $0xd70] sm:$0xff] }
 0x323   : > { %6552 = vmatpush1.bf16.msra.mxu1 %v8535_v45  ;;  %v8576_v45 = vcombine.high %v2244_v33, %v2248_v0  ;;  %v8582_v12 = vcombine.high %v2251_v58, %v2255_v56  ;;  %v8581_v19 = vcombine.low %v2251_v58, %v2255_v56  ;;  %v11276_v58 = vld [vmem:[#allocation6 + $0xdf8] sm:$0xff] }
 0x324   : > { %6102 = vmatmul.mubr.bf16.vlgmr.msra.gmra.mrb[96].mxu0 %v10783_v2  ;;  %6634 = vmatprep.subr.bf16.mxu1 %v8544_v14  ;;  %v2252_v14 = vld [vmem:[#allocation6 + $0xd58] sm:$0xff] }
 0x325   : > { %6183 = vmatpush1.bf16.msra.mxu0 %v8541_v8  ;;  %6111 = vmatprep.mubr.bf16.mxu0 %v10841_v50  ;;  %v2256_v8 = vld [vmem:[#allocation6 + $0xd78] sm:$0xff] }
 0x326   : > { %6554 = vmatmul.mubr.bf16.vlgmr.msra.gmra.mrb[96].mxu1 %v10783_v2  ;;  %6184 = vmatprep.subr.bf16.mxu0 %v8550_v40  ;;  %v2247_v2 = vld [vmem:[#allocation6 + $0xd30] sm:$0xff]  ;;  %v8584_v30 = vcombine.high %v2252_v14, %v2256_v8 }
 0x327   : > { %6563 = vmatprep.mubr.bf16.mxu1 %v10841_v50  ;;  %6635 = vmatpush1.bf16.msra.mxu1 %v8543_v37  ;;  %v8568_v50 = vcombine.high %v2236_v48, %v2240_v29  ;;  %v8574_v62 = vcombine.high %v2243_v49, %v2247_v2  ;;  %v8573_v41 = vcombine.low %v2243_v49, %v2247_v2  ;;  %v2263_v40 = vld [vmem:[#allocation6 + $0xdb0] sm:$0xff] }
 0x328   : > { %6636 = vmatprep.subr.bf16.mxu1 %v8552_v17  ;;  %v8583_v29 = vcombine.low %v2252_v14, %v2256_v8 }
 0x329   : > { %6185 = vmatpush1.bf16.msra.mxu0 %v8549_v39 }
 0x32a   : > { %6186 = vmatprep.subr.bf16.mxu0 %v8558_v3 }
 0x32b   : > { %6637 = vmatpush1.bf16.msra.mxu1 %v8551_v47  ;;  %v2260_v47 = vld [vmem:[#allocation6 + $0xd98] sm:$0xff] }
 0x32c   : > { %6112 = vmatmul.mubr.bf16.gmra.mrb[100].mxu0 %v10835_v5  ;;  %6638 = vmatprep.subr.bf16.mxu1 %v8560_v46 }
 0x32d   : > { %6187 = vmatpush1.bf16.msra.mxu0 %v8557_v11  ;;  %6121 = vmatprep.mubr.bf16.mxu0 %v10885_v44 }
 0x32e   : > { %6564 = vmatmul.mubr.bf16.gmra.mrb[100].mxu1 %v10835_v5  ;;  %6188 = vmatprep.subr.bf16.mxu0 %v8566_v10  ;;  %v2259_v5 = vld [vmem:[#allocation6 + $0xd90] sm:$0xff] }
 0x32f   : > { %6573 = vmatprep.mubr.bf16.mxu1 %v10885_v44  ;;  %6639 = vmatpush1.bf16.msra.mxu1 %v8559_v7  ;;  %v12128_v44 = vld [vmem:[#allocation13_spill] sm:$0xff]  ;;  %v8590_v11 = vcombine.high %v2259_v5, %v2263_v40 }
 0x330   : > { %6640 = vmatprep.subr.bf16.mxu1 %v8568_v50  ;;  %v12129_v37 = vsub.s32 0, %v12128_v44  ;;  %v12130_v17 = vsub.s32 2, %v12128_v44  ;;  %v12131_v34 = vsub.s32 1, %v12128_v44  ;;  %v12132_v16 = vsub.s32 3, %v12128_v44  ;;  %v11267_v10 = vld [vmem:[#allocation6 + $0xdd0] sm:$0xff] }
 0x331   : > { %6189 = vmatpush1.bf16.msra.mxu0 %v8565_v60  ;;  %v11269_v7 = vld [vmem:[#allocation6 + $0xdf0] sm:$0xff] }
 0x332   : > { %6190 = vmatprep.subr.bf16.mxu0 %v8574_v62  ;;  %v11250_v27 = vrot.slane %v2337_v52, %v12129_v37  ;;  %v11255_v39 = vrot.slane %v2337_v52, %v12130_v17  ;;  %v11259_v3 = vrot.slane %v2337_v52, %v12131_v34  ;;  %v11264_v46 = vrot.slane %v2337_v52, %v12132_v16  ;;  %v11286_v37 = vld [vmem:[#allocation6 + $0xe10] sm:$0xff] }
 0x333   : > { %6641 = vmatpush1.bf16.msra.mxu1 %v8567_v9  ;;  %v8589_v62 = vcombine.low %v2259_v5, %v2263_v40  ;;  %v11274_v9 = vld [vmem:[#allocation6 + $0xdd8] sm:$0xff]  ;;  %v8598_v14 = vcombine.high %v11267_v10, %v11269_v7  ;;  %v8591_v5 = vcombine.low %v2260_v47, %v2264_v13  ;;  %v8597_v40 = vcombine.low %v11267_v10, %v11269_v7 }
 0x334   : > { %6122 = vmatmul.mubr.bf16.gmra.mrb[104].mxu0 %v10879_v18  ;;  %6642 = vmatprep.subr.bf16.mxu1 %v8576_v45  ;;  %v8600_v16 = vcombine.high %v11274_v9, %v11276_v58  ;;  %v11297_v10 = vld [vmem:[#allocation6 + $0xe38] sm:$0xff] }
 0x335   : > { %6191 = vmatpush1.bf16.msra.mxu0 %v8573_v41  ;;  %6131 = vmatprep.mubr.bf16.mxu0 %v10929_v32 }
 0x336   : > { %6574 = vmatmul.mubr.bf16.gmra.mrb[104].mxu1 %v10879_v18  ;;  %6192 = vmatprep.subr.bf16.mxu0 %v8582_v12  ;;  %v8592_v18 = vcombine.high %v2260_v47, %v2264_v13 }
 0x337   : > { %6583 = vmatprep.mubr.bf16.mxu1 %v10929_v32  ;;  %6643 = vmatpush1.bf16.msra.mxu1 %v8575_v43  ;;  %v5312_v48 = vpop.f32.mrb[64].mxu0 }
 0x338   : > { %v8989_v49 = vadd.f32 %v5312_v48, %v11250_v27  ;;  %v5764_v2 = vpop.f32.mrb[64].mxu1  ;;  %v5314_v50 = vpop.f32.mrb[65].mxu0  ;;  %6644 = vmatprep.subr.bf16.mxu1 %v8584_v30  ;;  %v11288_v30 = vld [vmem:[#allocation6 + $0xe30] sm:$0xff] }
 0x339   : > { %v9021_v60 = vadd.f32 %v5764_v2, %v11255_v39  ;;  %v8990_v33 = vadd.f32 %v5314_v50, %v11259_v3  ;;  %v5766_v0 = vpop.f32.mrb[65].mxu1  ;;  %6193 = vmatpush1.bf16.msra.mxu0 %v8581_v19  ;;  %v5316_v32 = vpop.f32.mrb[66].mxu0  ;;  %v8606_v50 = vcombine.high %v11286_v37, %v11288_v30 }
 0x33a   : > { %v9022_v56 = vadd.f32 %v5766_v0, %v11264_v46  ;;  %v8991_v45 = vadd.f32 %v5316_v32, %v11250_v27  ;;  %v5768_v41 = vpop.f32.mrb[66].mxu1  ;;  %v5318_v52 = vpop.f32.mrb[67].mxu0  ;;  %6194 = vmatprep.subr.bf16.mxu0 %v8590_v11  ;;  %v6747_v17 = vmax.f32 %v8989_v49, 0.0  ;;  %v8599_v0 = vcombine.low %v11274_v9, %v11276_v58  ;;  %v11311_v32 = vld [vmem:[#allocation6 + $0xe50] sm:$0xff] }
 0x33b   : > { %v9023_v8 = vadd.f32 %v5768_v41, %v11255_v39  ;;  %6645 = vmatpush1.bf16.msra.mxu1 %v8583_v29  ;;  %v8992_v12 = vadd.f32 %v5318_v52, %v11259_v3  ;;  %v5770_v43 = vpop.f32.mrb[67].mxu1  ;;  %v6749_v11 = vmax.f32 %v9021_v60, 0.0  ;;  %v6748_v48 = vmax.f32 %v8990_v33, 0.0  ;;  %v11295_v29 = vld [vmem:[#allocation6 + $0xe18] sm:$0xff] }
 0x33c   : > { %v6755_v19 = vmax.f32 %v8991_v45, 0.0  ;;  %v9024_v34 = vadd.f32 %v5770_v43, %v11264_v46  ;;  %6132 = vmatmul.mubr.bf16.gmra.mrb[108].mxu0 %v10923_v54  ;;  %6646 = vmatprep.subr.bf16.mxu1 %v8592_v18  ;;  %v6750_v7 = vmax.f32 %v9022_v56, 0.0  ;;  %v8608_v52 = vcombine.high %v11295_v29, %v11297_v10  ;;  %v11326_v43 = vld [vmem:[#allocation6 + $0xe78] sm:$0xff] }
 0x33d   : > { %v6757_v47 = vmax.f32 %v9023_v8, 0.0  ;;  %v6756_v13 = vmax.f32 %v8992_v12, 0.0  ;;  %6195 = vmatpush1.bf16.msra.mxu0 %v8589_v62  ;;  %6141 = vmatprep.mubr.bf16.mxu0 %v10973_v31  ;;  %v11313_v62 = vld [vmem:[#allocation6 + $0xe70] sm:$0xff]  ;;  %v8605_v58 = vcombine.low %v11286_v37, %v11288_v30  ;;  %v11324_v12 = vld [vmem:[#allocation6 + $0xe58] sm:$0xff]  ;;  %v8607_v30 = vcombine.low %v11295_v29, %v11297_v10 }
 0x33e   : > { %v11299_v49 = vpack.c.bf16 %v6755_v19, %v6747_v17  ;;  %v6758_v2 = vmax.f32 %v9024_v34, 0.0  ;;  %6584 = vmatmul.mubr.bf16.gmra.mrb[108].mxu1 %v10923_v54  ;;  %6196 = vmatprep.subr.bf16.mxu0 %v8598_v14 }
 0x33f   : > { %v11304_v18 = vpack.c.bf16 %v6757_v47, %v6749_v11  ;;  %v11306_v60 = vpack.c.bf16 %v6756_v13, %v6748_v48  ;;  %6593 = vmatprep.mubr.bf16.mxu1 %v10973_v31  ;;  %6647 = vmatpush1.bf16.msra.mxu1 %v8591_v5  ;;  %v5322_v33 = vpop.f32.mrb[68].mxu0  ;;  %v8613_v48 = vcombine.low %v11311_v32, %v11313_v62  ;;  %v11338_v47 = vld [vmem:[#allocation6 + $0xe90] sm:$0xff] }
 0x340   : > { %v11315_v54 = vpack.c.bf16 %v6758_v2, %v6750_v7  ;;  %v8993_v56 = vadd.f32 %v5322_v33, %v11250_v27  ;;  %v5774_v45 = vpop.f32.mrb[68].mxu1  ;;  %v5324_v41 = vpop.f32.mrb[69].mxu0  ;;  %6648 = vmatprep.subr.bf16.mxu1 %v8600_v16  ;;  %v8614_v16 = vcombine.high %v11311_v32, %v11313_v62  ;;  %v11340_v13 = vld [vmem:[#allocation6 + $0xeb0] sm:$0xff]  ;;  %v8616_v33 = vcombine.high %v11324_v12, %v11326_v43  ;;  %v11347_v32 = vld [vmem:[#allocation6 + $0xe98] sm:$0xff] }
 0x341   : > { %v9025_v31 = vadd.f32 %v5774_v45, %v11255_v39  ;;  %v8994_v14 = vadd.f32 %v5324_v41, %v11259_v3  ;;  %v5776_v8 = vpop.f32.mrb[69].mxu1  ;;  %6197 = vmatpush1.bf16.msra.mxu0 %v8597_v40  ;;  %v5326_v9 = vpop.f32.mrb[70].mxu0  ;;  %v11349_v62 = vld [vmem:[#allocation6 + $0xeb8] sm:$0xff] }
 0x342   : > { %v9026_v5 = vadd.f32 %v5776_v8, %v11264_v46  ;;  %v8995_v17 = vadd.f32 %v5326_v9, %v11250_v27  ;;  %v5778_v19 = vpop.f32.mrb[70].mxu1  ;;  %v5328_v34 = vpop.f32.mrb[71].mxu0  ;;  %6198 = vmatprep.subr.bf16.mxu0 %v8606_v50  ;;  %v6763_v7 = vmax.f32 %v8993_v56, 0.0 }
 0x343   : > { %v9027_v40 = vadd.f32 %v5778_v19, %v11255_v39  ;;  %6649 = vmatpush1.bf16.msra.mxu1 %v8599_v0  ;;  %v8996_v11 = vadd.f32 %v5328_v34, %v11259_v3  ;;  %v5780_v37 = vpop.f32.mrb[71].mxu1  ;;  %v6765_v0 = vmax.f32 %v9025_v31, 0.0  ;;  %v6764_v45 = vmax.f32 %v8994_v14, 0.0 }
 0x344   : > { %v6771_v2 = vmax.f32 %v8995_v17, 0.0  ;;  %v9028_v50 = vadd.f32 %v5780_v37, %v11264_v46  ;;  %6142 = vmatmul.mubr.bf16.gmra.mrb[112].mxu0 %v10967_v59  ;;  %6650 = vmatprep.subr.bf16.mxu1 %v8608_v52  ;;  %v6766_v56 = vmax.f32 %v9026_v5, 0.0  ;;  %v8622_v52 = vcombine.high %v11338_v47, %v11340_v13  ;;  %v11363_v5 = vld [vmem:[#allocation6 + $0xed0] sm:$0xff] }
 0x345   : > { %v6773_v29 = vmax.f32 %v9027_v40, 0.0  ;;  %v6772_v10 = vmax.f32 %v8996_v11, 0.0  ;;  %6199 = vmatpush1.bf16.msra.mxu0 %v8605_v58  ;;  %6151 = vmatprep.mubr.bf16.mxu0 %v11017_v20  ;;  %v8615_v58 = vcombine.low %v11324_v12, %v11326_v43  ;;  %v11365_v17 = vld [vmem:[#allocation6 + $0xef0] sm:$0xff]  ;;  %v8624_v40 = vcombine.high %v11347_v32, %v11349_v62 }
 0x346   : > { %v11351_v41 = vpack.c.bf16 %v6771_v2, %v6763_v7  ;;  %v6774_v8 = vmax.f32 %v9028_v50, 0.0  ;;  %6594 = vmatmul.mubr.bf16.gmra.mrb[112].mxu1 %v10967_v59  ;;  %6200 = vmatprep.subr.bf16.mxu0 %v8614_v16  ;;  %v8621_v43 = vcombine.low %v11338_v47, %v11340_v13  ;;  %v11378_v7 = vld [vmem:[#allocation6 + $0xef8] sm:$0xff]  ;;  %v8623_v13 = vcombine.low %v11347_v32, %v11349_v62 }
 0x347   : > { %v11356_v31 = vpack.c.bf16 %v6773_v29, %v6765_v0  ;;  %v11358_v14 = vpack.c.bf16 %v6772_v10, %v6764_v45  ;;  %6603 = vmatprep.mubr.bf16.mxu1 %v11017_v20  ;;  %6651 = vmatpush1.bf16.msra.mxu1 %v8607_v30  ;;  %v5332_v9 = vpop.f32.mrb[72].mxu0  ;;  %v11376_v30 = vld [vmem:[#allocation6 + $0xed8] sm:$0xff]  ;;  %v8630_v45 = vcombine.high %v11363_v5, %v11365_v17 }
 0x348   : > { %v11367_v59 = vpack.c.bf16 %v6774_v8, %v6766_v56  ;;  %v8997_v19 = vadd.f32 %v5332_v9, %v11250_v27  ;;  %v5784_v34 = vpop.f32.mrb[72].mxu1  ;;  %v5334_v16 = vpop.f32.mrb[73].mxu0  ;;  %6652 = vmatprep.subr.bf16.mxu1 %v8616_v33  ;;  %v8629_v10 = vcombine.low %v11363_v5, %v11365_v17  ;;  %v11390_v56 = vld [vmem:[#allocation6 + $0xf10] sm:$0xff]  ;;  %v11399_v5 = vld [vmem:[#allocation6 + $0xf18] sm:$0xff] }
 0x349   : > { %v9029_v20 = vadd.f32 %v5784_v34, %v11255_v39  ;;  %v8998_v11 = vadd.f32 %v5334_v16, %v11259_v3  ;;  %v5786_v37 = vpop.f32.mrb[73].mxu1  ;;  %6201 = vmatpush1.bf16.msra.mxu0 %v8613_v48  ;;  %v5336_v12 = vpop.f32.mrb[74].mxu0  ;;  %v11392_v8 = vld [vmem:[#allocation6 + $0xf30] sm:$0xff]  ;;  %v11401_v17 = vld [vmem:[#allocation6 + $0xf38] sm:$0xff] }
 0x34a   : > { %v9030_v2 = vadd.f32 %v5786_v37, %v11264_v46  ;;  %v8999_v50 = vadd.f32 %v5336_v12, %v11250_v27  ;;  %v5788_v33 = vpop.f32.mrb[74].mxu1  ;;  %v5338_v0 = vpop.f32.mrb[75].mxu0  ;;  %6202 = vmatprep.subr.bf16.mxu0 %v8622_v52  ;;  %v6779_v52 = vmax.f32 %v8997_v19, 0.0 }
 0x34b   : > { %v9031_v48 = vadd.f32 %v5788_v33, %v11255_v39  ;;  %6653 = vmatpush1.bf16.msra.mxu1 %v8615_v58  ;;  %v9000_v29 = vadd.f32 %v5338_v0, %v11259_v3  ;;  %v5790_v47 = vpop.f32.mrb[75].mxu1  ;;  %v8632_v58 = vcombine.high %v11376_v30, %v11378_v7  ;;  %v6781_v16 = vmax.f32 %v9029_v20, 0.0  ;;  %v11415_v33 = vld [vmem:[#allocation6 + $0xf50] sm:$0xff] }
 0x34c   : > { %v6787_v9 = vmax.f32 %v8999_v50, 0.0  ;;  %v9032_v34 = vadd.f32 %v5790_v47, %v11264_v46  ;;  %6152 = vmatmul.mubr.bf16.gmra.mrb[116].mxu0 %v11011_v4  ;;  %6654 = vmatprep.subr.bf16.mxu1 %v8624_v40  ;;  %v6780_v37 = vmax.f32 %v8998_v11, 0.0  ;;  %v6782_v19 = vmax.f32 %v9030_v2, 0.0  ;;  %v11417_v0 = vld [vmem:[#allocation6 + $0xf70] sm:$0xff] }
 0x34d   : > { %v6789_v32 = vmax.f32 %v9031_v48, 0.0  ;;  %v6788_v62 = vmax.f32 %v9000_v29, 0.0  ;;  %6203 = vmatpush1.bf16.msra.mxu0 %v8621_v43  ;;  %6161 = vmatprep.mubr.bf16.mxu0 %v11061_v63  ;;  %v8638_v40 = vcombine.high %v11390_v56, %v11392_v8  ;;  %v8631_v2 = vcombine.low %v11376_v30, %v11378_v7 }
 0x34e   : > { %v11403_v12 = vpack.c.bf16 %v6787_v9, %v6779_v52  ;;  %v6790_v50 = vmax.f32 %v9032_v34, 0.0  ;;  %6604 = vmatmul.mubr.bf16.gmra.mrb[116].mxu1 %v11011_v4  ;;  %6204 = vmatprep.subr.bf16.mxu0 %v8630_v45  ;;  %v8640_v47 = vcombine.high %v11399_v5, %v11401_v17  ;;  %v8637_v7 = vcombine.low %v11390_v56, %v11392_v8  ;;  %v11428_v9 = vld [vmem:[#allocation6 + $0xf58] sm:$0xff] }
 0x34f   : > { %v11408_v20 = vpack.c.bf16 %v6789_v32, %v6781_v16  ;;  %v11410_v11 = vpack.c.bf16 %v6788_v62, %v6780_v37  ;;  %6613 = vmatprep.mubr.bf16.mxu1 %v11061_v63  ;;  %6655 = vmatpush1.bf16.msra.mxu1 %v8623_v13  ;;  %v5342_v43 = vpop.f32.mrb[76].mxu0  ;;  %v11430_v34 = vld [vmem:[#allocation6 + $0xf78] sm:$0xff]  ;;  %v8646_v62 = vcombine.high %v11415_v33, %v11417_v0 }
 0x350   : > { %v11419_v4 = vpack.c.bf16 %v6790_v50, %v6782_v19  ;;  %v9001_v45 = vadd.f32 %v5342_v43, %v11250_v27  ;;  %v5794_v48 = vpop.f32.mrb[76].mxu1  ;;  %v5344_v29 = vpop.f32.mrb[77].mxu0  ;;  %6656 = vmatprep.subr.bf16.mxu1 %v8632_v58  ;;  %v8639_v8 = vcombine.low %v11399_v5, %v11401_v17  ;;  %v8645_v50 = vcombine.low %v11415_v33, %v11417_v0  ;;  %v11442_v43 = vld [vmem:[#allocation6 + $0xf90] sm:$0xff]  ;;  %v2324_v33 = vld [vmem:[#allocation6 + $0xf98] sm:$0xff] }
 0x351   : > { %v9033_v63 = vadd.f32 %v5794_v48, %v11255_v39  ;;  %v9002_v13 = vadd.f32 %v5344_v29, %v11259_v3  ;;  %v5796_v52 = vpop.f32.mrb[77].mxu1  ;;  %6205 = vmatpush1.bf16.msra.mxu0 %v8629_v10  ;;  %v5346_v30 = vpop.f32.mrb[78].mxu0  ;;  %v11444_v48 = vld [vmem:[#allocation6 + $0xfb0] sm:$0xff]  ;;  %v2328_v0 = vld [vmem:[#allocation6 + $0xfb8] sm:$0xff] }
 0x352   : > { %v9034_v16 = vadd.f32 %v5796_v52, %v11264_v46  ;;  %v9003_v58 = vadd.f32 %v5346_v30, %v11250_v27  ;;  %v5798_v37 = vpop.f32.mrb[78].mxu1  ;;  %v5348_v32 = vpop.f32.mrb[79].mxu0  ;;  %6206 = vmatprep.subr.bf16.mxu0 %v8638_v40  ;;  %v6795_v40 = vmax.f32 %v9001_v45, 0.0 }
 0x353   : > { %v9035_v10 = vadd.f32 %v5798_v37, %v11255_v39  ;;  %6657 = vmatpush1.bf16.msra.mxu1 %v8631_v2  ;;  %v9004_v19 = vadd.f32 %v5348_v32, %v11259_v3  ;;  %v5800_v56 = vpop.f32.mrb[79].mxu1  ;;  %v8648_v2 = vcombine.high %v11428_v9, %v11430_v34  ;;  %v6797_v30 = vmax.f32 %v9033_v63, 0.0 }
 0x354   : > { %v6803_v29 = vmax.f32 %v9003_v58, 0.0  ;;  %v9036_v52 = vadd.f32 %v5800_v56, %v11264_v46  ;;  %6162 = vmatmul.mubr.bf16.gmra.mrb[120].mxu0 %v11055_v26  ;;  %6658 = vmatprep.subr.bf16.mxu1 %v8640_v47  ;;  %v6796_v37 = vmax.f32 %v9002_v13, 0.0  ;;  %v6798_v32 = vmax.f32 %v9034_v16, 0.0  ;;  %v2331_v16 = vld [vmem:[#allocation6 + $0xfd0] sm:$0xff] }
 0x355   : > { %v6805_v5 = vmax.f32 %v9035_v10, 0.0  ;;  %v6804_v17 = vmax.f32 %v9004_v19, 0.0  ;;  %6207 = vmatpush1.bf16.msra.mxu0 %v8637_v7  ;;  %6171 = vmatprep.mubr.bf16.mxu0 %v11093_v24  ;;  %v8654_v47 = vcombine.high %v11442_v43, %v11444_v48  ;;  %v8647_v7 = vcombine.low %v11428_v9, %v11430_v34  ;;  %v2335_v10 = vld [vmem:[#allocation6 + $0xff0] sm:$0xff]  ;;  %v2332_v34 = vld [vmem:[#allocation6 + $0xfd8] sm:$0xff] }
 0x356   : > { %v11451_v45 = vpack.c.bf16 %v6803_v29, %v6795_v40  ;;  %v6806_v58 = vmax.f32 %v9036_v52, 0.0  ;;  %6614 = vmatmul.mubr.bf16.gmra.mrb[120].mxu1 %v11055_v26  ;;  %6208 = vmatprep.subr.bf16.mxu0 %v8646_v62  ;;  %v8656_v29 = vcombine.high %v2324_v33, %v2328_v0  ;;  %v8653_v9 = vcombine.low %v11442_v43, %v11444_v48 }
 0x357   : > { %v11456_v56 = vpack.c.bf16 %v6805_v5, %v6797_v30  ;;  %v11458_v63 = vpack.c.bf16 %v6804_v17, %v6796_v37  ;;  %6623 = vmatprep.mubr.bf16.mxu1 %v11093_v24  ;;  %6659 = vmatpush1.bf16.msra.mxu1 %v8639_v8  ;;  %v5352_v13 = vpop.f32.mrb[80].mxu0  ;;  %v2336_v37 = vld [vmem:[#allocation6 + $0xff8] sm:$0xff]  ;;  %v8661_v44 = vcombine.low %v2331_v16, %v2335_v10 }
 0x358   : > { %12133 = vst [vmem:[#allocation17_spill] sm:$0xff] %v11451_v45  ;;  %v11463_v19 = vpack.c.bf16 %v6806_v58, %v6798_v32  ;;  %v9005_v26 = vadd.f32 %v5352_v13, %v11250_v27  ;;  %v5804_v62 = vpop.f32.mrb[80].mxu1  ;;  %v5354_v40 = vpop.f32.mrb[81].mxu0  ;;  %6660 = vmatprep.subr.bf16.mxu1 %v8648_v2  ;;  %v8662_v2 = vcombine.high %v2331_v16, %v2335_v10 }
 0x359   : > { %12134 = vst [vmem:[#allocation16_spill] sm:$0xff] %v11456_v56  ;;  %v9037_v52 = vadd.f32 %v5804_v62, %v11255_v39  ;;  %v9006_v30 = vadd.f32 %v5354_v40, %v11259_v3  ;;  %v5806_v24 = vpop.f32.mrb[81].mxu1  ;;  %6209 = vmatpush1.bf16.msra.mxu0 %v8645_v50  ;;  %v5356_v8 = vpop.f32.mrb[82].mxu0  ;;  %v8655_v40 = vcombine.low %v2324_v33, %v2328_v0  ;;  %v9594_v0 = vld [vmem:[%s11982_s5 + $0x40] sm:$0xff]  }
 0x35a   : > { %12135 = vst [vmem:[#allocation21_spill] sm:$0xff] %v11463_v19  ;;  %v9038_v5 = vadd.f32 %v5806_v24, %v11264_v46  ;;  %v9007_v17 = vadd.f32 %v5356_v8, %v11250_v27  ;;  %v5808_v32 = vpop.f32.mrb[82].mxu1  ;;  %v5358_v58 = vpop.f32.mrb[83].mxu0  ;;  %6210 = vmatprep.subr.bf16.mxu0 %v8654_v47  ;;  %v6811_v56 = vmax.f32 %v9005_v26, 0.0  ;;  %v8664_v24 = vcombine.high %v2332_v34, %v2336_v37 }
 0x35b   : > { %v9039_v13 = vadd.f32 %v5808_v32, %v11255_v39  ;;  %6661 = vmatpush1.bf16.msra.mxu1 %v8647_v7  ;;  %v9008_v62 = vadd.f32 %v5358_v58, %v11259_v3  ;;  %v5810_v50 = vpop.f32.mrb[83].mxu1  ;;  %v6813_v8 = vmax.f32 %v9037_v52, 0.0  ;;  %v6812_v45 = vmax.f32 %v9006_v30, 0.0 }
 0x35c   : > { %v6819_v43 = vmax.f32 %v9007_v17, 0.0  ;;  %v9040_v48 = vadd.f32 %v5810_v50, %v11264_v46  ;;  %6172 = vmatmul.mubr.bf16.gmra.mrb[124].mxu0 %v11089_v51  ;;  %6662 = vmatprep.subr.bf16.mxu1 %v8656_v29  ;;  %v6814_v7 = vmax.f32 %v9038_v5, 0.0  ;;  %v8663_v29 = vcombine.low %v2332_v34, %v2336_v37  ;;  %v9596_v34 = vld [vmem:[%s11982_s5] sm:$0xff]  }
 0x35d   : > { %v6821_v47 = vmax.f32 %v9039_v13, 0.0  ;;  %v6820_v19 = vmax.f32 %v9008_v62, 0.0  ;;  %6211 = vmatpush1.bf16.msra.mxu0 %v8653_v9  ;;  %6214 = vmatprep.mubr.bf16.mxu0 %v10859_v55  ;;  %v9595_v9 = vld [vmem:[%s11982_s5 + $0xc0] sm:$0xff]   ;;  %v9598_v13 = vld [vmem:[%s11982_s5 + $0x48] sm:$0xff]  }
 0x35e   : > { %v11477_v32 = vpack.c.bf16 %v6819_v43, %v6811_v56  ;;  %v6822_v33 = vmax.f32 %v9040_v48, 0.0  ;;  %6624 = vmatmul.mubr.bf16.gmra.mrb[124].mxu1 %v11089_v51  ;;  %6212 = vmatprep.subr.bf16.mxu0 %v8662_v2 }
 0x35f   : > { %v11483_v16 = vpack.c.bf16 %v6821_v47, %v6813_v8  ;;  %v11485_v10 = vpack.c.bf16 %v6820_v19, %v6812_v45  ;;  %6663 = vmatpush1.bf16.msra.mxu1 %v8655_v40  ;;  %6666 = vmatprep.mubr.bf16.mxu1 %v10859_v55  ;;  %v5362_v26 = vpop.f32.mrb[84].mxu0  ;;  %v9597_v40 = vld [vmem:[%s11982_s5 + $0x80] sm:$0xff]   ;;  %v9599_v8 = vld [vmem:[%s11982_s5 + $0xc8] sm:$0xff]  }
 0x360   : > { %v11488_v52 = vpack.c.bf16 %v6822_v33, %v6814_v7  ;;  %v9009_v56 = vadd.f32 %v5362_v26, %v11250_v27  ;;  %v5814_v30 = vpop.f32.mrb[84].mxu1  ;;  %v5364_v51 = vpop.f32.mrb[85].mxu0  ;;  %6664 = vmatprep.subr.bf16.mxu1 %v8664_v24  ;;  %v9600_v26 = vld [vmem:[%s11982_s5 + $0x8] sm:$0xff]  }
 0x361   : > { %v9041_v5 = vadd.f32 %v5814_v30, %v11255_v39  ;;  %v9010_v45 = vadd.f32 %v5364_v51, %v11259_v3  ;;  %v5816_v19 = vpop.f32.mrb[85].mxu1  ;;  %6213 = vmatpush1.bf16.msra.mxu0 %v8661_v44  ;;  %v5366_v55 = vpop.f32.mrb[86].mxu0  ;;  %v9602_v51 = vld [vmem:[%s11982_s5 + $0x50] sm:$0xff]  }
 0x362   : > { %v9042_v37 = vadd.f32 %v5816_v19, %v11264_v46  ;;  %v9011_v17 = vadd.f32 %v5366_v55, %v11250_v27  ;;  %v5818_v58 = vpop.f32.mrb[86].mxu1  ;;  %v5368_v2 = vpop.f32.mrb[87].mxu0  ;;  %8733 = vmatprep.subr.bf16.mxu0 %v9594_v0  ;;  %v6827_v43 = vmax.f32 %v9009_v56, 0.0  ;;  %v9601_v19 = vld [vmem:[%s11982_s5 + $0x88] sm:$0xff]  }
 0x363   : > { %v9043_v62 = vadd.f32 %v5818_v58, %v11255_v39  ;;  %6665 = vmatpush1.bf16.msra.mxu1 %v8663_v29  ;;  %v9012_v44 = vadd.f32 %v5368_v2, %v11259_v3  ;;  %v5820_v50 = vpop.f32.mrb[87].mxu1  ;;  %v6829_v47 = vmax.f32 %v9041_v5, 0.0  ;;  %v6828_v7 = vmax.f32 %v9010_v45, 0.0 }
 0x364   : > { %v6835_v48 = vmax.f32 %v9011_v17, 0.0  ;;  %v9044_v24 = vadd.f32 %v5820_v50, %v11264_v46  ;;  %6215 = vmatmul.mubr.bf16.vlgmr.msra.gmra.mrb[96].mxu0 %v10850_v23  ;;  %8797 = vmatprep.subr.bf16.mxu1 %v9595_v9  ;;  %v6830_v29 = vmax.f32 %v9042_v37, 0.0  ;;  %v9603_v17 = vld [vmem:[%s11982_s5 + $0xd0] sm:$0xff]  }
 0x365   : > { %v6837_v33 = vmax.f32 %v9043_v62, 0.0  ;;  %v6836_v0 = vmax.f32 %v9012_v44, 0.0  ;;  %6224 = vmatprep.mubr.bf16.mxu0 %v10903_v57  ;;  %8734 = vmatpush3.bf16.msra.mxu0 %v9596_v34  ;;  %v9604_v62 = vld [vmem:[%s11982_s5 + $0x10] sm:$0xff]  }
 0x366   : > { %v11518_v56 = vpack.c.bf16 %v6835_v48, %v6827_v43  ;;  %v6838_v30 = vmax.f32 %v9044_v24, 0.0  ;;  %6667 = vmatmul.mubr.bf16.vlgmr.msra.gmra.mrb[96].mxu1 %v10850_v23  ;;  %8735 = vmatprep.subr.bf16.mxu0 %v9598_v13  ;;  %v9606_v48 = vld [vmem:[%s11982_s5 + $0x58] sm:$0xff]  }
 0x367   : > { %v11524_v9 = vpack.c.bf16 %v6837_v33, %v6829_v47  ;;  %v11526_v5 = vpack.c.bf16 %v6836_v0, %v6828_v7  ;;  %6676 = vmatprep.mubr.bf16.mxu1 %v10903_v57  ;;  %v5372_v45 = vpop.f32.mrb[88].mxu0  ;;  %8798 = vmatpush3.bf16.msra.mxu1 %v9597_v40  ;;  %v9605_v7 = vld [vmem:[%s11982_s5 + $0x90] sm:$0xff]  }
 0x368   : > { %v11532_v55 = vpack.c.bf16 %v6838_v30, %v6830_v29  ;;  %v9013_v23 = vadd.f32 %v5372_v45, %v11250_v27  ;;  %v5824_v34 = vpop.f32.mrb[88].mxu1  ;;  %v5374_v37 = vpop.f32.mrb[89].mxu0  ;;  %8799 = vmatprep.subr.bf16.mxu1 %v9599_v8  ;;  %v9607_v29 = vld [vmem:[%s11982_s5 + $0xd8] sm:$0xff]  }
 0x369   : > { %v9045_v58 = vadd.f32 %v5824_v34, %v11255_v39  ;;  %v9014_v57 = vadd.f32 %v5374_v37, %v11259_v3  ;;  %v5826_v2 = vpop.f32.mrb[89].mxu1  ;;  %v5376_v13 = vpop.f32.mrb[90].mxu0  ;;  %8736 = vmatpush3.bf16.msra.mxu0 %v9600_v26 }
 0x36a   : > { %v9046_v44 = vadd.f32 %v5826_v2, %v11264_v46  ;;  %v9015_v50 = vadd.f32 %v5376_v13, %v11250_v27  ;;  %v5828_v40 = vpop.f32.mrb[90].mxu1  ;;  %v5378_v43 = vpop.f32.mrb[91].mxu0  ;;  %8737 = vmatprep.subr.bf16.mxu0 %v9602_v51  ;;  %v6843_v33 = vmax.f32 %v9013_v23, 0.0 }
 0x36b   : > { %v9047_v24 = vadd.f32 %v5828_v40, %v11255_v39  ;;  %v9016_v8 = vadd.f32 %v5378_v43, %v11259_v3  ;;  %v5830_v47 = vpop.f32.mrb[91].mxu1  ;;  %8800 = vmatpush3.bf16.msra.mxu1 %v9601_v19  ;;  %v6845_v30 = vmax.f32 %v9045_v58, 0.0  ;;  %v6844_v51 = vmax.f32 %v9014_v57, 0.0  ;;  %v9608_v19 = vld [vmem:[%s11982_s5 + $0x18] sm:$0xff]   ;;  %v9611_v43 = vld [vmem:[%s11982_s5 + $0xe0] sm:$0xff]  }
 0x36c   : > { %v6851_v0 = vmax.f32 %v9015_v50, 0.0  ;;  %v9048_v26 = vadd.f32 %v5830_v47, %v11264_v46  ;;  %6225 = vmatmul.mubr.bf16.gmra.mrb[100].mxu0 %v10894_v6  ;;  %8801 = vmatprep.subr.bf16.mxu1 %v9603_v17  ;;  %v6846_v23 = vmax.f32 %v9046_v44, 0.0  ;;  %v9610_v17 = vld [vmem:[%s11982_s5 + $0x60] sm:$0xff]  }
 0x36d   : > { %v6853_v45 = vmax.f32 %v9047_v24, 0.0  ;;  %v6852_v34 = vmax.f32 %v9016_v8, 0.0  ;;  %6234 = vmatprep.mubr.bf16.mxu0 %v10947_v21  ;;  %8738 = vmatpush3.bf16.msra.mxu0 %v9604_v62  ;;  %v9609_v62 = vld [vmem:[%s11982_s5 + $0x98] sm:$0xff]   ;;  %v9612_v47 = vld [vmem:[%s11982_s5 + $0x20] sm:$0xff]  }
 0x36e   : > { %v11562_v37 = vpack.c.bf16 %v6851_v0, %v6843_v33  ;;  %v6854_v2 = vmax.f32 %v9048_v26, 0.0  ;;  %6677 = vmatmul.mubr.bf16.gmra.mrb[100].mxu1 %v10894_v6  ;;  %8739 = vmatprep.subr.bf16.mxu0 %v9606_v48 }
 0x36f   : > { %v11568_v58 = vpack.c.bf16 %v6853_v45, %v6845_v30  ;;  %v11570_v57 = vpack.c.bf16 %v6852_v34, %v6844_v51  ;;  %6686 = vmatprep.mubr.bf16.mxu1 %v10947_v21  ;;  %v5382_v13 = vpop.f32.mrb[92].mxu0  ;;  %8802 = vmatpush3.bf16.msra.mxu1 %v9605_v7  ;;  %v9613_v34 = vld [vmem:[%s11982_s5 + $0xa0] sm:$0xff]  }
 0x370   : > { %v11576_v44 = vpack.c.bf16 %v6854_v2, %v6846_v23  ;;  %v9017_v6 = vadd.f32 %v5382_v13, %v11250_v27  ;;  %v5834_v50 = vpop.f32.mrb[92].mxu1  ;;  %v5384_v40 = vpop.f32.mrb[93].mxu0  ;;  %8803 = vmatprep.subr.bf16.mxu1 %v9607_v29  ;;  %v9614_v29 = vld [vmem:[%s11982_s5 + $0x68] sm:$0xff]  }
 0x371   : > { %v9049_v48 = vadd.f32 %v5834_v50, %v11255_v39  ;;  %v9018_v21 = vadd.f32 %v5384_v40, %v11259_v3  ;;  %v5836_v24 = vpop.f32.mrb[93].mxu1  ;;  %v5386_v8 = vpop.f32.mrb[94].mxu0  ;;  %8740 = vmatpush3.bf16.msra.mxu0 %v9608_v19  ;;  %v9615_v2 = vld [vmem:[%s11982_s5 + $0xe8] sm:$0xff]   ;;  %v9618_v40 = vld [vmem:[%s11982_s5 + $0x70] sm:$0xff]  }
 0x372   : > { %v9050_v7 = vadd.f32 %v5836_v24, %v11264_v46  ;;  %v9019_v33 = vadd.f32 %v5386_v8, %v11250_v27  ;;  %v5838_v0 = vpop.f32.mrb[94].mxu1  ;;  %v5388_v26 = vpop.f32.mrb[95].mxu0  ;;  %8741 = vmatprep.subr.bf16.mxu0 %v9610_v17  ;;  %v6859_v19 = vmax.f32 %v9017_v6, 0.0  ;;  %v9620_v8 = vld [vmem:[%s11982_s5 + $0x30] sm:$0xff]  }
 0x373   : > { %v9051_v30 = vadd.f32 %v5838_v0, %v11255_v39  ;;  %v9020_v51 = vadd.f32 %v5388_v26, %v11259_v3  ;;  %v5840_v45 = vpop.f32.mrb[95].mxu1  ;;  %8804 = vmatpush3.bf16.msra.mxu1 %v9609_v62  ;;  %v6861_v39 = vmax.f32 %v9049_v48, 0.0  ;;  %v6860_v17 = vmax.f32 %v9018_v21, 0.0  ;;  %v9616_v62 = vld [vmem:[%s11982_s5 + $0x28] sm:$0xff]   ;;  %v9626_v0 = vld [vmem:[%s11982_s5 + $0x140] sm:$0xff]   ;;  %v9625_v26 = vld [vmem:[%s11982_s5 + $0xb8] sm:$0xff]  }
 0x374   : > { %v6867_v23 = vmax.f32 %v9019_v33, 0.0  ;;  %v9052_v27 = vadd.f32 %v5840_v45, %v11264_v46  ;;  %6235 = vmatmul.mubr.bf16.gmra.mrb[104].mxu0 %v10938_v53  ;;  %8805 = vmatprep.subr.bf16.mxu1 %v9611_v43  ;;  %v6862_v6 = vmax.f32 %v9050_v7, 0.0  ;;  %v9617_v21 = vld [vmem:[%s11982_s5 + $0xa8] sm:$0xff]   ;;  %v9623_v7 = vld [vmem:[%s11982_s5 + $0xf8] sm:$0xff]   ;;  %v9650_v45 = vld [vmem:[%s11982_s5 + $0x170] sm:$0xff]  }
 0x375   : > { %v6869_v3 = vmax.f32 %v9051_v30, 0.0  ;;  %v6868_v13 = vmax.f32 %v9020_v51, 0.0  ;;  %6244 = vmatprep.mubr.bf16.mxu0 %v10991_v1  ;;  %8742 = vmatpush3.bf16.msra.mxu0 %v9612_v47  ;;  %v9621_v47 = vld [vmem:[%s11982_s5 + $0xb0] sm:$0xff]   ;;  %v9624_v33 = vld [vmem:[%s11982_s5 + $0x38] sm:$0xff]   ;;  %v9648_v30 = vld [vmem:[%s11982_s5 + $0x1e8] sm:$0xff]  }
 0x376   : > { %v11606_v46 = vpack.c.bf16 %v6867_v23, %v6859_v19  ;;  %v6870_v50 = vmax.f32 %v9052_v27, 0.0  ;;  %6687 = vmatmul.mubr.bf16.gmra.mrb[104].mxu1 %v10938_v53  ;;  %8743 = vmatprep.subr.bf16.mxu0 %v9614_v29  ;;  %v9619_v53 = vld [vmem:[%s11982_s5 + $0xf0] sm:$0xff]   ;;  %v9628_v29 = vld [vmem:[%s11982_s5 + $0x1c0] sm:$0xff]   ;;  %v9647_v51 = vld [vmem:[%s11982_s5 + $0x128] sm:$0xff]  }
 0x377   : > { %v11612_v43 = vpack.c.bf16 %v6869_v3, %v6861_v39  ;;  %v11614_v48 = vpack.c.bf16 %v6868_v13, %v6860_v17  ;;  %6696 = vmatprep.mubr.bf16.mxu1 %v10991_v1  ;;  %8806 = vmatpush3.bf16.msra.mxu1 %v9613_v34  ;;  %v9622_v1 = vld [vmem:[%s11982_s5 + $0x78] sm:$0xff]   ;;  %v9649_v34 = vld [vmem:[%s11982_s5 + $0x1a8] sm:$0xff]   ;;  %v9653_v19 = vld [vmem:[%s11982_s5 + $0x1b0] sm:$0xff]  }
 0x378   : > { %v11620_v24 = vpack.c.bf16 %v6870_v50, %v6862_v6  ;;  %8807 = vmatprep.subr.bf16.mxu1 %v9615_v2  ;;  %v12137_v23 = vld [vmem:[#allocation17_spill] sm:$0xff]  ;;  %v12138_v27 = vld [vmem:[#allocation16_spill] sm:$0xff] }
 0x379   : > { %8744 = vmatpush3.bf16.msra.mxu0 %v9616_v62  ;;  %v9654_v2 = vld [vmem:[%s11982_s5 + $0x178] sm:$0xff]  }
 0x37a   : > { %8745 = vmatprep.subr.bf16.mxu0 %v9618_v40  ;;  %v9656_v39 = vld [vmem:[%s11982_s5 + $0x1f8] sm:$0xff]  }
 0x37b   : > { %8808 = vmatpush3.bf16.msra.mxu1 %v9617_v21  ;;  %v9655_v17 = vld [vmem:[%s11982_s5 + $0x138] sm:$0xff]  }
 0x37c   : > { %6245 = vmatmul.mubr.bf16.gmra.mrb[108].mxu0 %v10982_v61  ;;  %8809 = vmatprep.subr.bf16.mxu1 %v9619_v53 }
 0x37d   : > { %6254 = vmatprep.mubr.bf16.mxu0 %v11035_v36  ;;  %8746 = vmatpush3.bf16.msra.mxu0 %v9620_v8 }
 0x37e   : > { %6697 = vmatmul.mubr.bf16.gmra.mrb[108].mxu1 %v10982_v61  ;;  %8747 = vmatprep.subr.bf16.mxu0 %v9622_v1  ;;  %v9627_v61 = vld [vmem:[%s11982_s5 + $0x100] sm:$0xff]  }
 0x37f   : > { %6706 = vmatprep.mubr.bf16.mxu1 %v11035_v36  ;;  %8810 = vmatpush3.bf16.msra.mxu1 %v9621_v47  ;;  %v9631_v36 = vld [vmem:[%s11982_s5 + $0x108] sm:$0xff]  }
 0x380   : > { %8811 = vmatprep.subr.bf16.mxu1 %v9623_v7 }
 0x381   : > { %8748 = vmatpush3.bf16.msra.mxu0 %v9624_v33 }
 0x382   : > { %8861 = vmatprep.subr.bf16.mxu0 %v9626_v0 }
 0x383   : > { %8812 = vmatpush3.bf16.msra.mxu1 %v9625_v26 }
 0x384   : > { %6255 = vmatmul.mubr.bf16.gmra.mrb[112].mxu0 %v11026_v15  ;;  %8925 = vmatprep.subr.bf16.mxu1 %v9628_v29 }
 0x385   : > { %6264 = vmatprep.mubr.bf16.mxu0 %v11075_v22 }
 0x386   : > { %6707 = vmatmul.mubr.bf16.gmra.mrb[112].mxu1 %v11026_v15  ;;  %v9630_v15 = vld [vmem:[%s11982_s5 + $0x148] sm:$0xff]  }
 0x387   : > { %6716 = vmatprep.mubr.bf16.mxu1 %v11075_v22  ;;  %v9633_v22 = vld [vmem:[%s11982_s5 + $0x188] sm:$0xff]  }
 0x38c   : > { %6265 = vmatmul.mubr.bf16.gmra.mrb[116].mxu0 %v11070_v35 }
 0x38d   : > { %6274 = vmatprep.mubr.bf16.mxu0 %v11097_v38 }
 0x38e   : > { %6717 = vmatmul.mubr.bf16.gmra.mrb[116].mxu1 %v11070_v35  ;;  %v9634_v35 = vld [vmem:[%s11982_s5 + $0x150] sm:$0xff]  }
 0x38f   : > { %6726 = vmatprep.mubr.bf16.mxu1 %v11097_v38  ;;  %v9636_v38 = vld [vmem:[%s11982_s5 + $0x1d0] sm:$0xff]  }
 0x394   : > { %6275 = vmatmul.mubr.bf16.gmra.mrb[120].mxu0 %v11095_v28 }
 0x395   : > { %6284 = vmatprep.mubr.bf16.mxu0 %v11109_v42 }
 0x396   : > { %6727 = vmatmul.mubr.bf16.gmra.mrb[120].mxu1 %v11095_v28  ;;  %v9632_v28 = vld [vmem:[%s11982_s5 + $0x1c8] sm:$0xff]  }
 0x397   : > { %6736 = vmatprep.mubr.bf16.mxu1 %v11109_v42  ;;  %v9629_v42 = vld [vmem:[%s11982_s5 + $0x180] sm:$0xff]  }
 0x39c   : > { %6285 = vmatmul.mubr.bf16.gmra.mrb[124].mxu0 %v11107_v25 }
 0x39d   : > { %7490 = vmatprep.mubr.bf16.mxu0 %v11306_v60  ;;  %v9640_v60 = vld [vmem:[%s11982_s5 + $0x1d8] sm:$0xff]  }
 0x39e   : > { %6737 = vmatmul.mubr.bf16.gmra.mrb[124].mxu1 %v11107_v25  ;;  %v9635_v25 = vld [vmem:[%s11982_s5 + $0x110] sm:$0xff]  }
 0x39f   : > { %7587 = vmatprep.mubr.bf16.mxu1 %v11315_v54  ;;  %v9639_v54 = vld [vmem:[%s11982_s5 + $0x118] sm:$0xff]  }
 0x3a4   : > { %7491 = vmatmul.mubr.bf16.vlgmr.msra.gmra.mrb[128].mxu0 %v11299_v49  ;;  %v9638_v49 = vld [vmem:[%s11982_s5 + $0x158] sm:$0xff]  }
 0x3a5   : > { %7498 = vmatprep.mubr.bf16.mxu0 %v11358_v14  ;;  %8862 = vmatpush3.bf16.msra.mxu0 %v9627_v61  ;;  %v9642_v14 = vld [vmem:[%s11982_s5 + $0x160] sm:$0xff]  }
 0x3a6   : > { %7588 = vmatmul.mubr.bf16.vlgmr.msra.gmra.mrb[128].mxu1 %v11304_v18  ;;  %8863 = vmatprep.subr.bf16.mxu0 %v9630_v15  ;;  %v9637_v18 = vld [vmem:[%s11982_s5 + $0x190] sm:$0xff]  }
 0x3a7   : > { %7595 = vmatprep.mubr.bf16.mxu1 %v11367_v59  ;;  %8926 = vmatpush3.bf16.msra.mxu1 %v9629_v42  ;;  %v9644_v59 = vld [vmem:[%s11982_s5 + $0x1e0] sm:$0xff]  }
 0x3a8   : > { %8927 = vmatprep.subr.bf16.mxu1 %v9632_v28 }
 0x3a9   : > { %8864 = vmatpush3.bf16.msra.mxu0 %v9631_v36 }
 0x3aa   : > { %8865 = vmatprep.subr.bf16.mxu0 %v9634_v35 }
 0x3ab   : > { %8928 = vmatpush3.bf16.msra.mxu1 %v9633_v22 }
 0x3ac   : > { %7499 = vmatmul.mubr.bf16.gmra.mrb[132].mxu0 %v11351_v41  ;;  %8929 = vmatprep.subr.bf16.mxu1 %v9636_v38  ;;  %v9641_v41 = vld [vmem:[%s11982_s5 + $0x198] sm:$0xff]  }
 0x3ad   : > { %7506 = vmatprep.mubr.bf16.mxu0 %v11410_v11  ;;  %8866 = vmatpush3.bf16.msra.mxu0 %v9635_v25  ;;  %v9646_v11 = vld [vmem:[%s11982_s5 + $0x168] sm:$0xff]  }
 0x3ae   : > { %7596 = vmatmul.mubr.bf16.gmra.mrb[132].mxu1 %v11356_v31  ;;  %8867 = vmatprep.subr.bf16.mxu0 %v9638_v49  ;;  %v9643_v31 = vld [vmem:[%s11982_s5 + $0x120] sm:$0xff]  }
 0x3af   : > { %7603 = vmatprep.mubr.bf16.mxu1 %v11419_v4  ;;  %8930 = vmatpush3.bf16.msra.mxu1 %v9637_v18  ;;  %v9645_v4 = vld [vmem:[%s11982_s5 + $0x1a0] sm:$0xff]  }
 0x3b0   : > { %8931 = vmatprep.subr.bf16.mxu1 %v9640_v60 }
 0x3b1   : > { %8868 = vmatpush3.bf16.msra.mxu0 %v9639_v54 }
 0x3b2   : > { %8869 = vmatprep.subr.bf16.mxu0 %v9642_v14 }
 0x3b3   : > { %8932 = vmatpush3.bf16.msra.mxu1 %v9641_v41 }
 0x3b4   : > { %7507 = vmatmul.mubr.bf16.gmra.mrb[136].mxu0 %v11403_v12  ;;  %8933 = vmatprep.subr.bf16.mxu1 %v9644_v59  ;;  %v12136_v12 = vld [vmem:[#allocation21_spill] sm:$0xff] }
 0x3b5   : > { %7514 = vmatprep.mubr.bf16.mxu0 %v11458_v63  ;;  %8870 = vmatpush3.bf16.msra.mxu0 %v9643_v31  ;;  %v9652_v63 = vld [vmem:[%s11982_s5 + $0x1f0] sm:$0xff]  }
 0x3b6   : > { %7604 = vmatmul.mubr.bf16.gmra.mrb[136].mxu1 %v11408_v20  ;;  %8871 = vmatprep.subr.bf16.mxu0 %v9646_v11  ;;  %v9651_v20 = vld [vmem:[%s11982_s5 + $0x130] sm:$0xff]  }
 0x3b7   : > { %7611 = vmatprep.mubr.bf16.mxu1 %v12136_v12  ;;  %8934 = vmatpush3.bf16.msra.mxu1 %v9645_v4 }
 0x3b8   : > { %8935 = vmatprep.subr.bf16.mxu1 %v9648_v30 }
 0x3b9   : > { %8872 = vmatpush3.bf16.msra.mxu0 %v9647_v51 }
 0x3ba   : > { %8873 = vmatprep.subr.bf16.mxu0 %v9650_v45 }
 0x3bb   : > { %8936 = vmatpush3.bf16.msra.mxu1 %v9649_v34 }
 0x3bc   : > { %7515 = vmatmul.mubr.bf16.gmra.mrb[140].mxu0 %v12137_v23  ;;  %8937 = vmatprep.subr.bf16.mxu1 %v9652_v63 }
 0x3bd   : > { %7522 = vmatprep.mubr.bf16.mxu0 %v11485_v10  ;;  %8874 = vmatpush3.bf16.msra.mxu0 %v9651_v20  ;;  %v9657_v10 = vld [vmem:[%s11982_s5 + $0x1b8] sm:$0xff]  }
 0x3be   : > { %7612 = vmatmul.mubr.bf16.gmra.mrb[140].mxu1 %v12138_v27  ;;  %8875 = vmatprep.subr.bf16.mxu0 %v9654_v2 }
 0x3bf   : > { %7619 = vmatprep.mubr.bf16.mxu1 %v11488_v52  ;;  %8938 = vmatpush3.bf16.msra.mxu1 %v9653_v19 }
 0x3c0   : > { %8939 = vmatprep.subr.bf16.mxu1 %v9656_v39 }
 0x3c1   : > { %8876 = vmatpush3.bf16.msra.mxu0 %v9655_v17 }
 0x3c3   : > { %8940 = vmatpush3.bf16.msra.mxu1 %v9657_v10 }
 0x3c4   : > { %7523 = vmatmul.mubr.bf16.gmra.mrb[144].mxu0 %v11477_v32  ;;  %v9659_v32 = vld [vmem:[#allocation7] sm:$0xff] }
 0x3c5   : > { %7530 = vmatprep.mubr.bf16.mxu0 %v11526_v5 }
 0x3c6   : > { %7620 = vmatmul.mubr.bf16.gmra.mrb[144].mxu1 %v11483_v16  ;;  %v12139_v16 = vld [vmem:[#allocation13_spill] sm:$0xff] }
 0x3c7   : > { %7627 = vmatprep.mubr.bf16.mxu1 %v11532_v55  ;;  %v12140_v52 = vsub.s32 4, %v12139_v16  ;;  %v12142_v55 = vsub.s32 6, %v12139_v16 }
 0x3cc   : > { %7531 = vmatmul.mubr.bf16.gmra.mrb[148].mxu0 %v11518_v56  ;;  %v11791_v56 = vrot.slane %v9659_v32, %v12140_v52 }
 0x3cd   : > { %7538 = vmatprep.mubr.bf16.mxu0 %v11570_v57  ;;  %v12143_v57 = vsub.s32 7, %v12139_v16 }
 0x3ce   : > { %7628 = vmatmul.mubr.bf16.gmra.mrb[148].mxu1 %v11524_v9  ;;  %v12141_v9 = vsub.s32 5, %v12139_v16 }
 0x3cf   : > { %7635 = vmatprep.mubr.bf16.mxu1 %v11576_v44  ;;  %v11803_v44 = vrot.slane %v9659_v32, %v12143_v57 }
 0x3d0   : > { %v11795_v5 = vrot.slane %v9659_v32, %v12141_v9 }
 0x3d4   : > { %7539 = vmatmul.mubr.bf16.gmra.mrb[152].mxu0 %v11562_v37  ;;  %v11799_v37 = vrot.slane %v9659_v32, %v12142_v55 }
 0x3d5   : > { %7546 = vmatprep.mubr.bf16.mxu0 %v11614_v48 }
 0x3d6   : > { %7636 = vmatmul.mubr.bf16.gmra.mrb[152].mxu1 %v11568_v58 }
 0x3d7   : > { %7643 = vmatprep.mubr.bf16.mxu1 %v11620_v24 }
 0x3dc   : > { %7547 = vmatmul.mubr.bf16.gmra.mrb[156].mxu0 %v11606_v46 }
 0x3de   : > { %7644 = vmatmul.mubr.bf16.gmra.mrb[156].mxu1 %v11612_v43 }
 0x437   : > { %v6216_v58 = vpop.f32.mrb[96].mxu0 }
 0x438   : > { %v9053_v3 = vadd.f32 %v6216_v58, %v11791_v56  ;;  %v6218_v13 = vpop.f32.mrb[97].mxu0 }
 0x439   : > { %v6668_v62 = vpop.f32.mrb[96].mxu1  ;;  %v9054_v6 = vadd.f32 %v6218_v13, %v11795_v5  ;;  %v6220_v46 = vpop.f32.mrb[98].mxu0 }
 0x43a   : > { %v9085_v50 = vadd.f32 %v6668_v62, %v11799_v37  ;;  %v6670_v40 = vpop.f32.mrb[97].mxu1  ;;  %v9055_v43 = vadd.f32 %v6220_v46, %v11791_v56  ;;  %v6222_v48 = vpop.f32.mrb[99].mxu0  ;;  %v6751_v8 = vmax.f32 %v9053_v3, 0.0 }
 0x43b   : > { %v9086_v21 = vadd.f32 %v6670_v40, %v11803_v44  ;;  %v6672_v24 = vpop.f32.mrb[98].mxu1  ;;  %v9056_v53 = vadd.f32 %v6222_v48, %v11795_v5  ;;  %v6752_v33 = vmax.f32 %v9054_v6, 0.0 }
 0x43c   : > { %v6759_v1 = vmax.f32 %v9055_v43, 0.0  ;;  %v9087_v47 = vadd.f32 %v6672_v24, %v11799_v37  ;;  %v6674_v7 = vpop.f32.mrb[99].mxu1  ;;  %v6753_v29 = vmax.f32 %v9085_v50, 0.0 }
 0x43d   : > { %v6760_v0 = vmax.f32 %v9056_v53, 0.0  ;;  %v9088_v26 = vadd.f32 %v6674_v7, %v11803_v44  ;;  %v6754_v42 = vmax.f32 %v9086_v21, 0.0 }
 0x43e   : > { %v6879_v61 = vpack.c.bf16 %v6759_v1, %v6751_v8  ;;  %v6761_v15 = vmax.f32 %v9087_v47, 0.0 }
 0x43f   : > { %v6880_v28 = vpack.c.bf16 %v6760_v0, %v6752_v33  ;;  %v6762_v36 = vmax.f32 %v9088_v26, 0.0  ;;  %v6226_v35 = vpop.f32.mrb[100].mxu0 }
 0x440   : > { %v6881_v22 = vpack.c.bf16 %v6761_v15, %v6753_v29  ;;  %v9057_v38 = vadd.f32 %v6226_v35, %v11791_v56  ;;  %v6228_v25 = vpop.f32.mrb[101].mxu0 }
 0x441   : > { %v6882_v49 = vpack.c.bf16 %v6762_v36, %v6754_v42  ;;  %v6678_v18 = vpop.f32.mrb[100].mxu1  ;;  %v9058_v60 = vadd.f32 %v6228_v25, %v11795_v5  ;;  %v6230_v54 = vpop.f32.mrb[102].mxu0  ;;  %7684 = vmatprep.mubr.bf16.mxu0 %v6880_v28 }
 0x442   : > { %v9089_v14 = vadd.f32 %v6678_v18, %v11799_v37  ;;  %v6680_v41 = vpop.f32.mrb[101].mxu1  ;;  %v9059_v59 = vadd.f32 %v6230_v54, %v11791_v56  ;;  %v6232_v31 = vpop.f32.mrb[103].mxu0  ;;  %7685 = vmatmul.mubr.bf16.vlgmr.msra.gmra.mrb[160].mxu0 %v6879_v61  ;;  %v6767_v51 = vmax.f32 %v9057_v38, 0.0 }
 0x443   : > { %v9090_v11 = vadd.f32 %v6680_v41, %v11803_v44  ;;  %v6682_v4 = vpop.f32.mrb[102].mxu1  ;;  %7781 = vmatprep.mubr.bf16.mxu1 %v6882_v49  ;;  %v9060_v30 = vadd.f32 %v6232_v31, %v11795_v5  ;;  %v6768_v63 = vmax.f32 %v9058_v60, 0.0 }
 0x444   : > { %v6775_v45 = vmax.f32 %v9059_v59, 0.0  ;;  %v9091_v12 = vadd.f32 %v6682_v4, %v11799_v37  ;;  %v6684_v34 = vpop.f32.mrb[103].mxu1  ;;  %7782 = vmatmul.mubr.bf16.vlgmr.msra.gmra.mrb[160].mxu1 %v6881_v22  ;;  %v6769_v23 = vmax.f32 %v9089_v14, 0.0 }
 0x445   : > { %v6776_v20 = vmax.f32 %v9060_v30, 0.0  ;;  %v9092_v19 = vadd.f32 %v6684_v34, %v11803_v44  ;;  %v6770_v39 = vmax.f32 %v9090_v11, 0.0 }
 0x446   : > { %v6887_v27 = vpack.c.bf16 %v6775_v45, %v6767_v51  ;;  %v6777_v2 = vmax.f32 %v9091_v12, 0.0 }
 0x447   : > { %v6888_v17 = vpack.c.bf16 %v6776_v20, %v6768_v63  ;;  %v6778_v10 = vmax.f32 %v9092_v19, 0.0  ;;  %v6236_v32 = vpop.f32.mrb[104].mxu0 }
 0x448   : > { %v6889_v16 = vpack.c.bf16 %v6777_v2, %v6769_v23  ;;  %v9061_v52 = vadd.f32 %v6236_v32, %v11791_v56  ;;  %v6238_v9 = vpop.f32.mrb[105].mxu0 }
 0x449   : > { %v6890_v55 = vpack.c.bf16 %v6778_v10, %v6770_v39  ;;  %v6688_v58 = vpop.f32.mrb[104].mxu1  ;;  %v9062_v57 = vadd.f32 %v6238_v9, %v11795_v5  ;;  %v6240_v3 = vpop.f32.mrb[106].mxu0  ;;  %7692 = vmatprep.mubr.bf16.mxu0 %v6888_v17 }
 0x44a   : > { %v9093_v13 = vadd.f32 %v6688_v58, %v11799_v37  ;;  %v6690_v62 = vpop.f32.mrb[105].mxu1  ;;  %v9063_v6 = vadd.f32 %v6240_v3, %v11791_v56  ;;  %v6242_v46 = vpop.f32.mrb[107].mxu0  ;;  %7693 = vmatmul.mubr.bf16.gmra.mrb[164].mxu0 %v6887_v27  ;;  %v6783_v48 = vmax.f32 %v9061_v52, 0.0 }
 0x44b   : > { %v9094_v50 = vadd.f32 %v6690_v62, %v11803_v44  ;;  %v6692_v40 = vpop.f32.mrb[106].mxu1  ;;  %7789 = vmatprep.mubr.bf16.mxu1 %v6890_v55  ;;  %v9064_v43 = vadd.f32 %v6242_v46, %v11795_v5  ;;  %v6784_v8 = vmax.f32 %v9062_v57, 0.0 }
 0x44c   : > { %v6791_v21 = vmax.f32 %v9063_v6, 0.0  ;;  %v9095_v24 = vadd.f32 %v6692_v40, %v11799_v37  ;;  %v6694_v53 = vpop.f32.mrb[107].mxu1  ;;  %7790 = vmatmul.mubr.bf16.gmra.mrb[164].mxu1 %v6889_v16  ;;  %v6785_v7 = vmax.f32 %v9093_v13, 0.0 }
 0x44d   : > { %v6792_v1 = vmax.f32 %v9064_v43, 0.0  ;;  %v9096_v47 = vadd.f32 %v6694_v53, %v11803_v44  ;;  %v6786_v26 = vmax.f32 %v9094_v50, 0.0 }
 0x44e   : > { %v6895_v33 = vpack.c.bf16 %v6791_v21, %v6783_v48  ;;  %v6793_v0 = vmax.f32 %v9095_v24, 0.0 }
 0x44f   : > { %v6896_v29 = vpack.c.bf16 %v6792_v1, %v6784_v8  ;;  %v6794_v61 = vmax.f32 %v9096_v47, 0.0  ;;  %v6246_v15 = vpop.f32.mrb[108].mxu0 }
 0x450   : > { %v6897_v42 = vpack.c.bf16 %v6793_v0, %v6785_v7  ;;  %v9065_v28 = vadd.f32 %v6246_v15, %v11791_v56  ;;  %v6248_v36 = vpop.f32.mrb[109].mxu0 }
 0x451   : > { %v6898_v35 = vpack.c.bf16 %v6794_v61, %v6786_v26  ;;  %v6698_v22 = vpop.f32.mrb[108].mxu1  ;;  %v9066_v38 = vadd.f32 %v6248_v36, %v11795_v5  ;;  %v6250_v25 = vpop.f32.mrb[110].mxu0  ;;  %7700 = vmatprep.mubr.bf16.mxu0 %v6896_v29 }
 0x452   : > { %v9097_v49 = vadd.f32 %v6698_v22, %v11799_v37  ;;  %v6700_v18 = vpop.f32.mrb[109].mxu1  ;;  %v9067_v60 = vadd.f32 %v6250_v25, %v11791_v56  ;;  %v6252_v54 = vpop.f32.mrb[111].mxu0  ;;  %7701 = vmatmul.mubr.bf16.gmra.mrb[168].mxu0 %v6895_v33  ;;  %v6799_v31 = vmax.f32 %v9065_v28, 0.0 }
 0x453   : > { %v9098_v14 = vadd.f32 %v6700_v18, %v11803_v44  ;;  %v6702_v41 = vpop.f32.mrb[110].mxu1  ;;  %7797 = vmatprep.mubr.bf16.mxu1 %v6898_v35  ;;  %v9068_v59 = vadd.f32 %v6252_v54, %v11795_v5  ;;  %v6800_v51 = vmax.f32 %v9066_v38, 0.0 }
 0x454   : > { %v6807_v11 = vmax.f32 %v9067_v60, 0.0  ;;  %v9099_v4 = vadd.f32 %v6702_v41, %v11799_v37  ;;  %v6704_v30 = vpop.f32.mrb[111].mxu1  ;;  %7798 = vmatmul.mubr.bf16.gmra.mrb[168].mxu1 %v6897_v42  ;;  %v6801_v34 = vmax.f32 %v9097_v49, 0.0 }
 0x455   : > { %v6808_v45 = vmax.f32 %v9068_v59, 0.0  ;;  %v9100_v12 = vadd.f32 %v6704_v30, %v11803_v44  ;;  %v6802_v19 = vmax.f32 %v9098_v14, 0.0 }
 0x456   : > { %v6903_v63 = vpack.c.bf16 %v6807_v11, %v6799_v31  ;;  %v6809_v20 = vmax.f32 %v9099_v4, 0.0 }
 0x457   : > { %v6904_v23 = vpack.c.bf16 %v6808_v45, %v6800_v51  ;;  %v6810_v27 = vmax.f32 %v9100_v12, 0.0  ;;  %v6256_v2 = vpop.f32.mrb[112].mxu0 }
 0x458   : > { %v6905_v39 = vpack.c.bf16 %v6809_v20, %v6801_v34  ;;  %v9069_v17 = vadd.f32 %v6256_v2, %v11791_v56  ;;  %v6258_v10 = vpop.f32.mrb[113].mxu0 }
 0x459   : > { %v6906_v32 = vpack.c.bf16 %v6810_v27, %v6802_v19  ;;  %v6708_v16 = vpop.f32.mrb[112].mxu1  ;;  %v9070_v52 = vadd.f32 %v6258_v10, %v11795_v5  ;;  %v6260_v9 = vpop.f32.mrb[114].mxu0  ;;  %7708 = vmatprep.mubr.bf16.mxu0 %v6904_v23 }
 0x45a   : > { %v9101_v55 = vadd.f32 %v6708_v16, %v11799_v37  ;;  %v6710_v58 = vpop.f32.mrb[113].mxu1  ;;  %v9071_v57 = vadd.f32 %v6260_v9, %v11791_v56  ;;  %v6262_v3 = vpop.f32.mrb[115].mxu0  ;;  %7709 = vmatmul.mubr.bf16.gmra.mrb[172].mxu0 %v6903_v63  ;;  %v6815_v46 = vmax.f32 %v9069_v17, 0.0 }
 0x45b   : > { %v9102_v13 = vadd.f32 %v6710_v58, %v11803_v44  ;;  %v6712_v62 = vpop.f32.mrb[114].mxu1  ;;  %7805 = vmatprep.mubr.bf16.mxu1 %v6906_v32  ;;  %v9072_v6 = vadd.f32 %v6262_v3, %v11795_v5  ;;  %v6816_v48 = vmax.f32 %v9070_v52, 0.0 }
 0x45c   : > { %v6823_v50 = vmax.f32 %v9071_v57, 0.0  ;;  %v9103_v40 = vadd.f32 %v6712_v62, %v11799_v37  ;;  %v6714_v43 = vpop.f32.mrb[115].mxu1  ;;  %7806 = vmatmul.mubr.bf16.gmra.mrb[172].mxu1 %v6905_v39  ;;  %v6817_v53 = vmax.f32 %v9101_v55, 0.0 }
 0x45d   : > { %v6824_v21 = vmax.f32 %v9072_v6, 0.0  ;;  %v9104_v24 = vadd.f32 %v6714_v43, %v11803_v44  ;;  %v6818_v47 = vmax.f32 %v9102_v13, 0.0 }
 0x45e   : > { %v6911_v8 = vpack.c.bf16 %v6823_v50, %v6815_v46  ;;  %v6825_v1 = vmax.f32 %v9103_v40, 0.0 }
 0x45f   : > { %v6912_v7 = vpack.c.bf16 %v6824_v21, %v6816_v48  ;;  %v6826_v33 = vmax.f32 %v9104_v24, 0.0  ;;  %v6266_v0 = vpop.f32.mrb[116].mxu0 }
 0x460   : > { %v6913_v26 = vpack.c.bf16 %v6825_v1, %v6817_v53  ;;  %v9073_v29 = vadd.f32 %v6266_v0, %v11791_v56  ;;  %v6268_v61 = vpop.f32.mrb[117].mxu0 }
 0x461   : > { %v6914_v15 = vpack.c.bf16 %v6826_v33, %v6818_v47  ;;  %v6718_v42 = vpop.f32.mrb[116].mxu1  ;;  %v9074_v28 = vadd.f32 %v6268_v61, %v11795_v5  ;;  %v6270_v36 = vpop.f32.mrb[118].mxu0  ;;  %7716 = vmatprep.mubr.bf16.mxu0 %v6912_v7 }
 0x462   : > { %v9105_v35 = vadd.f32 %v6718_v42, %v11799_v37  ;;  %v6720_v22 = vpop.f32.mrb[117].mxu1  ;;  %v9075_v38 = vadd.f32 %v6270_v36, %v11791_v56  ;;  %v6272_v25 = vpop.f32.mrb[119].mxu0  ;;  %7717 = vmatmul.mubr.bf16.gmra.mrb[176].mxu0 %v6911_v8  ;;  %v6831_v54 = vmax.f32 %v9073_v29, 0.0 }
 0x463   : > { %v9106_v49 = vadd.f32 %v6720_v22, %v11803_v44  ;;  %v6722_v18 = vpop.f32.mrb[118].mxu1  ;;  %7813 = vmatprep.mubr.bf16.mxu1 %v6914_v15  ;;  %v9076_v60 = vadd.f32 %v6272_v25, %v11795_v5  ;;  %v6832_v31 = vmax.f32 %v9074_v28, 0.0 }
 0x464   : > { %v6839_v14 = vmax.f32 %v9075_v38, 0.0  ;;  %v9107_v41 = vadd.f32 %v6722_v18, %v11799_v37  ;;  %v6724_v59 = vpop.f32.mrb[119].mxu1  ;;  %7814 = vmatmul.mubr.bf16.gmra.mrb[176].mxu1 %v6913_v26  ;;  %v6833_v30 = vmax.f32 %v9105_v35, 0.0 }
 0x465   : > { %v6840_v11 = vmax.f32 %v9076_v60, 0.0  ;;  %v9108_v4 = vadd.f32 %v6724_v59, %v11803_v44  ;;  %v6834_v12 = vmax.f32 %v9106_v49, 0.0 }
 0x466   : > { %v6919_v51 = vpack.c.bf16 %v6839_v14, %v6831_v54  ;;  %v6841_v45 = vmax.f32 %v9107_v41, 0.0 }
 0x467   : > { %v6920_v34 = vpack.c.bf16 %v6840_v11, %v6832_v31  ;;  %v6842_v63 = vmax.f32 %v9108_v4, 0.0  ;;  %v6276_v20 = vpop.f32.mrb[120].mxu0 }
 0x468   : > { %v6921_v19 = vpack.c.bf16 %v6841_v45, %v6833_v30  ;;  %v9077_v23 = vadd.f32 %v6276_v20, %v11791_v56  ;;  %v6278_v27 = vpop.f32.mrb[121].mxu0 }
 0x469   : > { %v6922_v2 = vpack.c.bf16 %v6842_v63, %v6834_v12  ;;  %v6728_v39 = vpop.f32.mrb[120].mxu1  ;;  %v9078_v17 = vadd.f32 %v6278_v27, %v11795_v5  ;;  %v6280_v10 = vpop.f32.mrb[122].mxu0  ;;  %7724 = vmatprep.mubr.bf16.mxu0 %v6920_v34  ;;  %v11869_v12 = vld [vmem:[#allocation9] ss:$0 sm:$0xff] }
 0x46a   : > { %v9109_v32 = vadd.f32 %v6728_v39, %v11799_v37  ;;  %v6730_v16 = vpop.f32.mrb[121].mxu1  ;;  %v9079_v52 = vadd.f32 %v6280_v10, %v11791_v56  ;;  %v6282_v9 = vpop.f32.mrb[123].mxu0  ;;  %7725 = vmatmul.mubr.bf16.gmra.mrb[180].mxu0 %v6919_v51  ;;  %v6847_v3 = vmax.f32 %v9077_v23, 0.0 }
 0x46b   : > { %v9110_v55 = vadd.f32 %v6730_v16, %v11803_v44  ;;  %v6732_v58 = vpop.f32.mrb[122].mxu1  ;;  %7821 = vmatprep.mubr.bf16.mxu1 %v6922_v2  ;;  %v9080_v57 = vadd.f32 %v6282_v9, %v11795_v5  ;;  %v6848_v46 = vmax.f32 %v9078_v17, 0.0 }
 0x46c   : > { %v6855_v13 = vmax.f32 %v9079_v52, 0.0  ;;  %v9111_v62 = vadd.f32 %v6732_v58, %v11799_v37  ;;  %v6734_v6 = vpop.f32.mrb[123].mxu1  ;;  %7822 = vmatmul.mubr.bf16.gmra.mrb[180].mxu1 %v6921_v19  ;;  %v6849_v43 = vmax.f32 %v9109_v32, 0.0 }
 0x46d   : > { %v6856_v50 = vmax.f32 %v9080_v57, 0.0  ;;  %v9112_v40 = vadd.f32 %v6734_v6, %v11803_v44  ;;  %v6850_v24 = vmax.f32 %v9110_v55, 0.0 }
 0x46e   : > { %v6927_v48 = vpack.c.bf16 %v6855_v13, %v6847_v3  ;;  %v6857_v21 = vmax.f32 %v9111_v62, 0.0 }
 0x46f   : > { %v6928_v53 = vpack.c.bf16 %v6856_v50, %v6848_v46  ;;  %v6858_v8 = vmax.f32 %v9112_v40, 0.0  ;;  %v6286_v1 = vpop.f32.mrb[124].mxu0 }
 0x470   : > { %v6929_v47 = vpack.c.bf16 %v6857_v21, %v6849_v43  ;;  %v9081_v7 = vadd.f32 %v6286_v1, %v11791_v56  ;;  %v6288_v33 = vpop.f32.mrb[125].mxu0 }
 0x471   : > { %v6930_v0 = vpack.c.bf16 %v6858_v8, %v6850_v24  ;;  %v6738_v26 = vpop.f32.mrb[124].mxu1  ;;  %v9082_v29 = vadd.f32 %v6288_v33, %v11795_v5  ;;  %v6290_v61 = vpop.f32.mrb[126].mxu0  ;;  %7732 = vmatprep.mubr.bf16.mxu0 %v6928_v53 }
 0x472   : > { %v9113_v15 = vadd.f32 %v6738_v26, %v11799_v37  ;;  %v6740_v42 = vpop.f32.mrb[125].mxu1  ;;  %v9083_v28 = vadd.f32 %v6290_v61, %v11791_v56  ;;  %v6292_v36 = vpop.f32.mrb[127].mxu0  ;;  %7733 = vmatmul.mubr.bf16.gmra.mrb[184].mxu0 %v6927_v48  ;;  %v6863_v25 = vmax.f32 %v9081_v7, 0.0 }
 0x473   : > { %v9114_v35 = vadd.f32 %v6740_v42, %v11803_v44  ;;  %v6742_v22 = vpop.f32.mrb[126].mxu1  ;;  %7829 = vmatprep.mubr.bf16.mxu1 %v6930_v0  ;;  %v9084_v38 = vadd.f32 %v6292_v36, %v11795_v5  ;;  %v6864_v54 = vmax.f32 %v9082_v29, 0.0 }
 0x474   : > { %v6871_v49 = vmax.f32 %v9083_v28, 0.0  ;;  %v9115_v18 = vadd.f32 %v6742_v22, %v11799_v37  ;;  %v6744_v60 = vpop.f32.mrb[127].mxu1  ;;  %7830 = vmatmul.mubr.bf16.gmra.mrb[184].mxu1 %v6929_v47  ;;  %v6865_v59 = vmax.f32 %v9113_v15, 0.0 }
 0x475   : > { %v6872_v14 = vmax.f32 %v9084_v38, 0.0  ;;  %v9116_v41 = vadd.f32 %v6744_v60, %v11803_v44  ;;  %v6866_v11 = vmax.f32 %v9114_v35, 0.0 }
 0x476   : > { %v6935_v56 = vpack.c.bf16 %v6871_v49, %v6863_v25  ;;  %v6873_v31 = vmax.f32 %v9115_v18, 0.0 }
 0x477   : > { %v6936_v4 = vpack.c.bf16 %v6872_v14, %v6864_v54  ;;  %v6874_v30 = vmax.f32 %v9116_v41, 0.0  ;;  %v8749_v51 = vpop.f32.mrb[128].mxu0 }
 0x478   : > { %v6937_v45 = vpack.c.bf16 %v6873_v31, %v6865_v59  ;;  %v8750_v5 = vpop.f32.mrb[129].mxu0 }
 0x479   : > { %v6938_v34 = vpack.c.bf16 %v6874_v30, %v6866_v11  ;;  %v8813_v63 = vpop.f32.mrb[128].mxu1  ;;  %v8751_v37 = vadd.f32 %v8750_v5, %v8749_v51  ;;  %v8752_v20 = vpop.f32.mrb[130].mxu0  ;;  %7740 = vmatprep.mubr.bf16.mxu0 %v6936_v4 }
 0x47a   : > { %v8814_v19 = vpop.f32.mrb[129].mxu1  ;;  %v8753_v23 = vpop.f32.mrb[131].mxu0  ;;  %7741 = vmatmul.mubr.bf16.gmra.mrb[188].mxu0 %v6935_v56 }
 0x47b   : > { %v7493_v44 = vadd.f32 %v8751_v37, %v11869_v12  ;;  %v8815_v27 = vadd.f32 %v8814_v19, %v8813_v63  ;;  %v8816_v2 = vpop.f32.mrb[130].mxu1  ;;  %7837 = vmatprep.mubr.bf16.mxu1 %v6938_v34  ;;  %v8754_v39 = vadd.f32 %v8753_v23, %v8752_v20 }
 0x47c   : > { %v8817_v17 = vpop.f32.mrb[131].mxu1  ;;  %7838 = vmatmul.mubr.bf16.gmra.mrb[188].mxu1 %v6937_v45 }
 0x47d   : > { %v11872_v10 = vadd.f32 %v8815_v27, %v7493_v44  ;;  %v7496_v32 = vadd.f32 %v8754_v39, %v11869_v12  ;;  %v8818_v16 = vadd.f32 %v8817_v17, %v8816_v2 }
 0x47f   : > { %v11875_v52 = vadd.f32 %v8818_v16, %v7496_v32  ;;  %v8755_v9 = vpop.f32.mrb[132].mxu0 }
 0x480   : > { %v8756_v55 = vpop.f32.mrb[133].mxu0 }
 0x481   : > { %v8819_v58 = vpop.f32.mrb[132].mxu1  ;;  %v8757_v57 = vadd.f32 %v8756_v55, %v8755_v9  ;;  %v8758_v3 = vpop.f32.mrb[134].mxu0 }
 0x482   : > { %v8820_v13 = vpop.f32.mrb[133].mxu1  ;;  %v8759_v62 = vpop.f32.mrb[135].mxu0 }
 0x483   : > { %v7501_v6 = vadd.f32 %v8757_v57, %v11869_v12  ;;  %v8821_v46 = vadd.f32 %v8820_v13, %v8819_v58  ;;  %v8822_v50 = vpop.f32.mrb[134].mxu1  ;;  %v8760_v40 = vadd.f32 %v8759_v62, %v8758_v3 }
 0x484   : > { %v8823_v43 = vpop.f32.mrb[135].mxu1 }
 0x485   : > { %v11878_v48 = vadd.f32 %v8821_v46, %v7501_v6  ;;  %v7504_v21 = vadd.f32 %v8760_v40, %v11869_v12  ;;  %v8824_v24 = vadd.f32 %v8823_v43, %v8822_v50 }
 0x487   : > { %v11881_v53 = vadd.f32 %v8824_v24, %v7504_v21  ;;  %v8761_v8 = vpop.f32.mrb[136].mxu0 }
 0x488   : > { %v8762_v1 = vpop.f32.mrb[137].mxu0 }
 0x489   : > { %v8825_v47 = vpop.f32.mrb[136].mxu1  ;;  %v8763_v7 = vadd.f32 %v8762_v1, %v8761_v8  ;;  %v8764_v33 = vpop.f32.mrb[138].mxu0 }
 0x48a   : > { %v8826_v0 = vpop.f32.mrb[137].mxu1  ;;  %v8765_v26 = vpop.f32.mrb[139].mxu0 }
 0x48b   : > { %v7509_v29 = vadd.f32 %v8763_v7, %v11869_v12  ;;  %v8827_v61 = vadd.f32 %v8826_v0, %v8825_v47  ;;  %v8828_v15 = vpop.f32.mrb[138].mxu1  ;;  %v8766_v42 = vadd.f32 %v8765_v26, %v8764_v33 }
 0x48c   : > { %v8829_v28 = vpop.f32.mrb[139].mxu1 }
 0x48d   : > { %v11884_v36 = vadd.f32 %v8827_v61, %v7509_v29  ;;  %v7512_v35 = vadd.f32 %v8766_v42, %v11869_v12  ;;  %v8830_v22 = vadd.f32 %v8829_v28, %v8828_v15 }
 0x48f   : > { %v11887_v38 = vadd.f32 %v8830_v22, %v7512_v35  ;;  %v8767_v25 = vpop.f32.mrb[140].mxu0 }
 0x490   : > { %v8768_v49 = vpop.f32.mrb[141].mxu0 }
 0x491   : > { %v8831_v18 = vpop.f32.mrb[140].mxu1  ;;  %v8769_v60 = vadd.f32 %v8768_v49, %v8767_v25  ;;  %v8770_v54 = vpop.f32.mrb[142].mxu0 }
 0x492   : > { %v8832_v14 = vpop.f32.mrb[141].mxu1  ;;  %v8771_v41 = vpop.f32.mrb[143].mxu0 }
 0x493   : > { %v7517_v59 = vadd.f32 %v8769_v60, %v11869_v12  ;;  %v8833_v56 = vadd.f32 %v8832_v14, %v8831_v18  ;;  %v8834_v31 = vpop.f32.mrb[142].mxu1  ;;  %v8772_v11 = vadd.f32 %v8771_v41, %v8770_v54 }
 0x494   : > { %v8835_v4 = vpop.f32.mrb[143].mxu1 }
 0x495   : > { %v11890_v30 = vadd.f32 %v8833_v56, %v7517_v59  ;;  %v7520_v51 = vadd.f32 %v8772_v11, %v11869_v12  ;;  %v8836_v45 = vadd.f32 %v8835_v4, %v8834_v31 }
 0x497   : > { %v11893_v5 = vadd.f32 %v8836_v45, %v7520_v51  ;;  %v8773_v34 = vpop.f32.mrb[144].mxu0 }
 0x498   : > { %v8774_v63 = vpop.f32.mrb[145].mxu0 }
 0x499   : > { %v8837_v37 = vpop.f32.mrb[144].mxu1  ;;  %v8775_v20 = vadd.f32 %v8774_v63, %v8773_v34  ;;  %v8776_v19 = vpop.f32.mrb[146].mxu0 }
 0x49a   : > { %v8838_v23 = vpop.f32.mrb[145].mxu1  ;;  %v8777_v44 = vpop.f32.mrb[147].mxu0 }
 0x49b   : > { %v7525_v27 = vadd.f32 %v8775_v20, %v11869_v12  ;;  %v8839_v2 = vadd.f32 %v8838_v23, %v8837_v37  ;;  %v8840_v39 = vpop.f32.mrb[146].mxu1  ;;  %v8778_v17 = vadd.f32 %v8777_v44, %v8776_v19 }
 0x49c   : > { %v8841_v32 = vpop.f32.mrb[147].mxu1 }
 0x49d   : > { %v11896_v16 = vadd.f32 %v8839_v2, %v7525_v27  ;;  %v7528_v9 = vadd.f32 %v8778_v17, %v11869_v12  ;;  %v8842_v55 = vadd.f32 %v8841_v32, %v8840_v39 }
 0x49f   : > { %v11899_v58 = vadd.f32 %v8842_v55, %v7528_v9  ;;  %v8779_v57 = vpop.f32.mrb[148].mxu0 }
 0x4a0   : > { %v8780_v3 = vpop.f32.mrb[149].mxu0 }
 0x4a1   : > { %v8843_v13 = vpop.f32.mrb[148].mxu1  ;;  %v8781_v62 = vadd.f32 %v8780_v3, %v8779_v57  ;;  %v8782_v6 = vpop.f32.mrb[150].mxu0 }
 0x4a2   : > { %v8844_v46 = vpop.f32.mrb[149].mxu1  ;;  %v8783_v50 = vpop.f32.mrb[151].mxu0 }
 0x4a3   : > { %v7533_v40 = vadd.f32 %v8781_v62, %v11869_v12  ;;  %v8845_v43 = vadd.f32 %v8844_v46, %v8843_v13  ;;  %v8846_v21 = vpop.f32.mrb[150].mxu1  ;;  %v8784_v24 = vadd.f32 %v8783_v50, %v8782_v6 }
 0x4a4   : > { %v8847_v8 = vpop.f32.mrb[151].mxu1 }
 0x4a5   : > { %v11902_v1 = vadd.f32 %v8845_v43, %v7533_v40  ;;  %v7536_v47 = vadd.f32 %v8784_v24, %v11869_v12  ;;  %v8848_v7 = vadd.f32 %v8847_v8, %v8846_v21 }
 0x4a7   : > { %v11905_v33 = vadd.f32 %v8848_v7, %v7536_v47  ;;  %v8785_v0 = vpop.f32.mrb[152].mxu0 }
 0x4a8   : > { %v8786_v26 = vpop.f32.mrb[153].mxu0 }
 0x4a9   : > { %v8849_v29 = vpop.f32.mrb[152].mxu1  ;;  %v8787_v61 = vadd.f32 %v8786_v26, %v8785_v0  ;;  %v8788_v15 = vpop.f32.mrb[154].mxu0 }
 0x4aa   : > { %v8850_v42 = vpop.f32.mrb[153].mxu1  ;;  %v8789_v28 = vpop.f32.mrb[155].mxu0 }
 0x4ab   : > { %v7541_v35 = vadd.f32 %v8787_v61, %v11869_v12  ;;  %v8851_v22 = vadd.f32 %v8850_v42, %v8849_v29  ;;  %v8852_v25 = vpop.f32.mrb[154].mxu1  ;;  %v8790_v49 = vadd.f32 %v8789_v28, %v8788_v15 }
 0x4ac   : > { %v8853_v18 = vpop.f32.mrb[155].mxu1 }
 0x4ad   : > { %v11908_v60 = vadd.f32 %v8851_v22, %v7541_v35  ;;  %v7544_v54 = vadd.f32 %v8790_v49, %v11869_v12  ;;  %v8854_v14 = vadd.f32 %v8853_v18, %v8852_v25 }
 0x4af   : > { %v11911_v41 = vadd.f32 %v8854_v14, %v7544_v54  ;;  %v8791_v59 = vpop.f32.mrb[156].mxu0 }
 0x4b0   : > { %v8792_v56 = vpop.f32.mrb[157].mxu0 }
 0x4b1   : > { %v8855_v31 = vpop.f32.mrb[156].mxu1  ;;  %v8793_v11 = vadd.f32 %v8792_v56, %v8791_v59  ;;  %v8794_v4 = vpop.f32.mrb[158].mxu0 }
 0x4b2   : > { %v8856_v51 = vpop.f32.mrb[157].mxu1  ;;  %v8795_v45 = vpop.f32.mrb[159].mxu0 }
 0x4b3   : > { %v7549_v34 = vadd.f32 %v8793_v11, %v11869_v12  ;;  %v8857_v63 = vadd.f32 %v8856_v51, %v8855_v31  ;;  %v8858_v37 = vpop.f32.mrb[158].mxu1  ;;  %v8796_v20 = vadd.f32 %v8795_v45, %v8794_v4 }
 0x4b4   : > { %v8859_v19 = vpop.f32.mrb[159].mxu1 }
 0x4b5   : > { %v11914_v23 = vadd.f32 %v8857_v63, %v7549_v34  ;;  %v7552_v44 = vadd.f32 %v8796_v20, %v11869_v12  ;;  %v8860_v27 = vadd.f32 %v8859_v19, %v8858_v37 }
 0x4b7   : > { %v11917_v2 = vadd.f32 %v8860_v27, %v7552_v44 }
 0x515   : > { %v8877_v39 = vpop.f32.mrb[160].mxu0 }
 0x516   : > { %v8878_v17 = vpop.f32.mrb[161].mxu0 }
 0x517   : > { %v8941_v32 = vpop.f32.mrb[160].mxu1  ;;  %v8879_v9 = vadd.f32 %v8878_v17, %v8877_v39  ;;  %v8880_v55 = vpop.f32.mrb[162].mxu0 }
 0x518   : > { %v8942_v57 = vpop.f32.mrb[161].mxu1  ;;  %v8881_v3 = vpop.f32.mrb[163].mxu0 }
 0x519   : > { %v7687_v13 = vadd.f32 %v8879_v9, %v11872_v10  ;;  %v8943_v62 = vadd.f32 %v8942_v57, %v8941_v32  ;;  %v8944_v6 = vpop.f32.mrb[162].mxu1  ;;  %v8882_v46 = vadd.f32 %v8881_v3, %v8880_v55 }
 0x51a   : > { %v8945_v12 = vpop.f32.mrb[163].mxu1 }
 0x51b   : > { %v7784_v50 = vadd.f32 %v8943_v62, %v7687_v13  ;;  %v7690_v40 = vadd.f32 %v8882_v46, %v11875_v52  ;;  %v8946_v43 = vadd.f32 %v8945_v12, %v8944_v6 }
 0x51d   : > { %7847 = vst.msk [vmem:[%s11925_s20] sm:$0xff] %vm7846_vm2, %v7784_v50  ;;  %v7787_v10 = vadd.f32 %v8946_v43, %v7690_v40  ;;  %v8883_v21 = vpop.f32.mrb[164].mxu0 }
 0x51e   : > { %v8884_v24 = vpop.f32.mrb[165].mxu0 }
 0x51f   : > { %7848 = vst.msk [vmem:[%s11925_s20 + $0x8] sm:$0xff] %vm7846_vm2, %v7787_v10  ;;  %v8947_v8 = vpop.f32.mrb[164].mxu1  ;;  %v8885_v47 = vadd.f32 %v8884_v24, %v8883_v21  ;;  %v8886_v7 = vpop.f32.mrb[166].mxu0 }
 0x520   : > { %v8948_v0 = vpop.f32.mrb[165].mxu1  ;;  %v8887_v26 = vpop.f32.mrb[167].mxu0 }
 0x521   : > { %v7695_v29 = vadd.f32 %v8885_v47, %v11878_v48  ;;  %v8949_v61 = vadd.f32 %v8948_v0, %v8947_v8  ;;  %v8950_v15 = vpop.f32.mrb[166].mxu1  ;;  %v8888_v52 = vadd.f32 %v8887_v26, %v8886_v7 }
 0x522   : > { %v8951_v42 = vpop.f32.mrb[167].mxu1 }
 0x523   : > { %v7792_v28 = vadd.f32 %v8949_v61, %v7695_v29  ;;  %v7698_v35 = vadd.f32 %v8888_v52, %v11881_v53  ;;  %v8952_v22 = vadd.f32 %v8951_v42, %v8950_v15 }
 0x525   : > { %7849 = vst.msk [vmem:[%s11925_s20 + $0x10] sm:$0xff] %vm7846_vm2, %v7792_v28  ;;  %v7795_v25 = vadd.f32 %v8952_v22, %v7698_v35  ;;  %v8889_v49 = vpop.f32.mrb[168].mxu0 }
 0x526   : > { %v8890_v18 = vpop.f32.mrb[169].mxu0 }
 0x527   : > { %7850 = vst.msk [vmem:[%s11925_s20 + $0x18] sm:$0xff] %vm7846_vm2, %v7795_v25  ;;  %v8953_v54 = vpop.f32.mrb[168].mxu1  ;;  %v8891_v14 = vadd.f32 %v8890_v18, %v8889_v49  ;;  %v8892_v48 = vpop.f32.mrb[170].mxu0 }
 0x528   : > { %v8954_v59 = vpop.f32.mrb[169].mxu1  ;;  %v8893_v56 = vpop.f32.mrb[171].mxu0 }
 0x529   : > { %v7703_v31 = vadd.f32 %v8891_v14, %v11884_v36  ;;  %v8955_v11 = vadd.f32 %v8954_v59, %v8953_v54  ;;  %v8956_v4 = vpop.f32.mrb[170].mxu1  ;;  %v8894_v53 = vadd.f32 %v8893_v56, %v8892_v48 }
 0x52a   : > { %v8957_v51 = vpop.f32.mrb[171].mxu1 }
 0x52b   : > { %v7800_v45 = vadd.f32 %v8955_v11, %v7703_v31  ;;  %v7706_v34 = vadd.f32 %v8894_v53, %v11887_v38  ;;  %v8958_v63 = vadd.f32 %v8957_v51, %v8956_v4 }
 0x52d   : > { %7851 = vst.msk [vmem:[%s11925_s20 + $0x20] sm:$0xff] %vm7846_vm2, %v7800_v45  ;;  %v7803_v37 = vadd.f32 %v8958_v63, %v7706_v34  ;;  %v8895_v20 = vpop.f32.mrb[172].mxu0 }
 0x52e   : > { %v8896_v19 = vpop.f32.mrb[173].mxu0 }
 0x52f   : > { %7852 = vst.msk [vmem:[%s11925_s20 + $0x28] sm:$0xff] %vm7846_vm2, %v7803_v37  ;;  %v8959_v44 = vpop.f32.mrb[172].mxu1  ;;  %v8897_v27 = vadd.f32 %v8896_v19, %v8895_v20  ;;  %v8898_v36 = vpop.f32.mrb[174].mxu0 }
 0x530   : > { %v8960_v39 = vpop.f32.mrb[173].mxu1  ;;  %v8899_v17 = vpop.f32.mrb[175].mxu0 }
 0x531   : > { %v7711_v32 = vadd.f32 %v8897_v27, %v11890_v30  ;;  %v8961_v9 = vadd.f32 %v8960_v39, %v8959_v44  ;;  %v8962_v55 = vpop.f32.mrb[174].mxu1  ;;  %v8900_v38 = vadd.f32 %v8899_v17, %v8898_v36 }
 0x532   : > { %v8963_v57 = vpop.f32.mrb[175].mxu1 }
 0x533   : > { %v7808_v3 = vadd.f32 %v8961_v9, %v7711_v32  ;;  %v7714_v13 = vadd.f32 %v8900_v38, %v11893_v5  ;;  %v8964_v62 = vadd.f32 %v8963_v57, %v8962_v55 }
 0x535   : > { %7853 = vst.msk [vmem:[%s11925_s20 + $0x30] sm:$0xff] %vm7846_vm2, %v7808_v3  ;;  %v7811_v6 = vadd.f32 %v8964_v62, %v7714_v13  ;;  %v8901_v46 = vpop.f32.mrb[176].mxu0 }
 0x536   : > { %v8902_v12 = vpop.f32.mrb[177].mxu0 }
 0x537   : > { %7854 = vst.msk [vmem:[%s11925_s20 + $0x38] sm:$0xff] %vm7846_vm2, %v7811_v6  ;;  %v8965_v50 = vpop.f32.mrb[176].mxu1  ;;  %v8903_v40 = vadd.f32 %v8902_v12, %v8901_v46  ;;  %v8904_v30 = vpop.f32.mrb[178].mxu0 }
 0x538   : > { %v8966_v43 = vpop.f32.mrb[177].mxu1  ;;  %v8905_v10 = vpop.f32.mrb[179].mxu0 }
 0x539   : > { %v7719_v21 = vadd.f32 %v8903_v40, %v11896_v16  ;;  %v8967_v24 = vadd.f32 %v8966_v43, %v8965_v50  ;;  %v8968_v8 = vpop.f32.mrb[178].mxu1  ;;  %v8906_v5 = vadd.f32 %v8905_v10, %v8904_v30 }
 0x53a   : > { %v8969_v47 = vpop.f32.mrb[179].mxu1 }
 0x53b   : > { %v7816_v7 = vadd.f32 %v8967_v24, %v7719_v21  ;;  %v7722_v0 = vadd.f32 %v8906_v5, %v11899_v58  ;;  %v8970_v26 = vadd.f32 %v8969_v47, %v8968_v8 }
 0x53d   : > { %7855 = vst.msk [vmem:[%s11925_s20 + $0x40] sm:$0xff] %vm7846_vm2, %v7816_v7  ;;  %v7819_v29 = vadd.f32 %v8970_v26, %v7722_v0  ;;  %v8907_v61 = vpop.f32.mrb[180].mxu0 }
 0x53e   : > { %v8908_v15 = vpop.f32.mrb[181].mxu0 }
 0x53f   : > { %7856 = vst.msk [vmem:[%s11925_s20 + $0x48] sm:$0xff] %vm7846_vm2, %v7819_v29  ;;  %v8971_v52 = vpop.f32.mrb[180].mxu1  ;;  %v8909_v42 = vadd.f32 %v8908_v15, %v8907_v61  ;;  %v8910_v16 = vpop.f32.mrb[182].mxu0 }
 0x540   : > { %v8972_v28 = vpop.f32.mrb[181].mxu1  ;;  %v8911_v35 = vpop.f32.mrb[183].mxu0 }
 0x541   : > { %v7727_v22 = vadd.f32 %v8909_v42, %v11902_v1  ;;  %v8973_v25 = vadd.f32 %v8972_v28, %v8971_v52  ;;  %v8974_v49 = vpop.f32.mrb[182].mxu1  ;;  %v8912_v58 = vadd.f32 %v8911_v35, %v8910_v16 }
 0x542   : > { %v8975_v18 = vpop.f32.mrb[183].mxu1 }
 0x543   : > { %v7824_v54 = vadd.f32 %v8973_v25, %v7727_v22  ;;  %v7730_v14 = vadd.f32 %v8912_v58, %v11905_v33  ;;  %v8976_v48 = vadd.f32 %v8975_v18, %v8974_v49 }
 0x545   : > { %7857 = vst.msk [vmem:[%s11925_s20 + $0x50] sm:$0xff] %vm7846_vm2, %v7824_v54  ;;  %v7827_v59 = vadd.f32 %v8976_v48, %v7730_v14  ;;  %v8913_v56 = vpop.f32.mrb[184].mxu0 }
 0x546   : > { %v8914_v31 = vpop.f32.mrb[185].mxu0 }
 0x547   : > { %7858 = vst.msk [vmem:[%s11925_s20 + $0x58] sm:$0xff] %vm7846_vm2, %v7827_v59  ;;  %v8977_v11 = vpop.f32.mrb[184].mxu1  ;;  %v8915_v4 = vadd.f32 %v8914_v31, %v8913_v56  ;;  %v8916_v1 = vpop.f32.mrb[186].mxu0 }
 0x548   : > { %v8978_v53 = vpop.f32.mrb[185].mxu1  ;;  %v8917_v51 = vpop.f32.mrb[187].mxu0 }
 0x549   : > { %v7735_v45 = vadd.f32 %v8915_v4, %v11908_v60  ;;  %v8979_v34 = vadd.f32 %v8978_v53, %v8977_v11  ;;  %v8980_v63 = vpop.f32.mrb[186].mxu1  ;;  %v8918_v33 = vadd.f32 %v8917_v51, %v8916_v1 }
 0x54a   : > { %v8981_v37 = vpop.f32.mrb[187].mxu1 }
 0x54b   : > { %v7832_v20 = vadd.f32 %v8979_v34, %v7735_v45  ;;  %v7738_v19 = vadd.f32 %v8918_v33, %v11911_v41  ;;  %v8982_v44 = vadd.f32 %v8981_v37, %v8980_v63 }
 0x54d   : > { %7859 = vst.msk [vmem:[%s11925_s20 + $0x60] sm:$0xff] %vm7846_vm2, %v7832_v20  ;;  %v7835_v27 = vadd.f32 %v8982_v44, %v7738_v19  ;;  %v8919_v36 = vpop.f32.mrb[188].mxu0 }
 0x54e   : > { %v8920_v39 = vpop.f32.mrb[189].mxu0 }
 0x54f   : > { %7860 = vst.msk [vmem:[%s11925_s20 + $0x68] sm:$0xff] %vm7846_vm2, %v7835_v27  ;;  %v8983_v17 = vpop.f32.mrb[188].mxu1  ;;  %v8921_v32 = vadd.f32 %v8920_v39, %v8919_v36  ;;  %v8922_v60 = vpop.f32.mrb[190].mxu0 }
 0x550   : > { %v8984_v9 = vpop.f32.mrb[189].mxu1  ;;  %v8923_v55 = vpop.f32.mrb[191].mxu0 }
 0x551   : > { %v7743_v38 = vadd.f32 %v8921_v32, %v11914_v23  ;;  %v8985_v57 = vadd.f32 %v8984_v9, %v8983_v17  ;;  %v8986_v3 = vpop.f32.mrb[190].mxu1  ;;  %v8924_v41 = vadd.f32 %v8923_v55, %v8922_v60 }
 0x552   : > { %v8987_v13 = vpop.f32.mrb[191].mxu1 }
 0x553   : > { %v7840_v62 = vadd.f32 %v8985_v57, %v7743_v38  ;;  %v7746_v6 = vadd.f32 %v8924_v41, %v11917_v2  ;;  %v8988_v46 = vadd.f32 %v8987_v13, %v8986_v3 }
 0x555   : > { %7861 = vst.msk [vmem:[%s11925_s20 + $0x70] sm:$0xff] %vm7846_vm2, %v7840_v62  ;;  %v7843_v12 = vadd.f32 %v8988_v46, %v7746_v6 }
 0x557   : > { %7862 = vst.msk [vmem:[%s11925_s20 + $0x78] sm:$0xff] %vm7846_vm2, %v7843_v12 }
 0x558 PF: > { %s20_s24 = sadd.s32 1, %s9818_s24  }
 0x559   : > { %p17_p7 = scmp.ge.s32.totalorder %s20_s24, 4  }
 0x55b   :  { %19 = sbr.rel (!%p17_p7) target bundleno = 3 (0x3), region = 99 }
 0x562   :  { %7885 = vsyncpa [#allocation3], 1 }
 0x563   :  { %7887 = vsyncpa [#allocation3 + $0x1], 1 }
 0x564   :  { %7888 = vsyncpa [#allocation5], 1 }
 0x565   :  { %7889 = vsyncpa [#allocation8], 1 }

</bundles_post_ra>
